<compile_context>
chip_gen: v5e
topology: v5e:2x2
jax: 0.10.0
libtpu: 0.0.40
codegen_flags: <defaults>
</compile_context>

<pallas_src>
import math
import functools

import numpy as np
import jax
import jax.numpy as jnp
from jax import lax
from jax.experimental import pallas as pl
from jax.experimental.pallas import tpu as pltpu

# ----- module constants (synthetic small versions of valle's NUM_TEXT_TOKENS / NUM_MEL_BINS) -----
NUM_TEXT_TOKENS = 64
NUM_MEL_BINS = 16
D_MODEL = 32
NHEAD = 4
NUM_LAYERS = 2
FFN_DIM = 4 * D_MODEL
LN_EPS = 1e-5
NEG = -1e9
MXU_DTYPE = jnp.bfloat16  # matmul operand dtype (accumulation stays f32)


# ================================ in-kernel helpers ================================

def _ln(x, g, b):
    """LayerNorm over the last dim. g/b are (1, D). All math in f32."""
    mu = jnp.mean(x, axis=-1, keepdims=True)
    xc = x - mu
    var = jnp.mean(xc * xc, axis=-1, keepdims=True)
    return xc * lax.rsqrt(var + LN_EPS) * g + b


def _mm(a, w):
    """MXU matmul: cast activation to the (bf16) weight dtype, accumulate in f32."""
    return jnp.dot(a.astype(w.dtype), w, preferred_element_type=jnp.float32)


# batched dot_general dimension numbers (same patterns as the flash-attention reference kernel)
_DN_PROJ = (((2,), (1,)), ((0,), (0,)))   # (H,T,K) x (H,K,N) -> (H,T,N)
_DN_QK = (((2,), (2,)), ((0,), (0,)))     # (H,Tq,Dh) x (H,Tk,Dh) -> (H,Tq,Tk)


def _mha_sublayer(x, mem, lng, lnb, wq, bq, wk, bk, wv, bv, wo, bo, *, bias, is_self):
    """Pre-norm multi-head attention sub-layer, head-major, fully in VMEM.

    x:   (Tq, D) f32 residual input (query side)
    mem: (Tk, D) f32 key/value source for cross-attention (ignored when is_self)
    wq/wk/wv: (H, D, Dh) bf16, bq/bk/bv: (H, 1, Dh) f32
    wo: (H, Dh, D) bf16, bo: (1, D) f32
    bias: (Tq, Tk) f32 additive mask (shared across heads)
    """
    Tq, D = x.shape
    H, _, Dh = wq.shape
    h = _ln(x, lng, lnb)
    qsrc = jnp.broadcast_to(h.astype(MXU_DTYPE)[None], (H, Tq, D))
    if is_self:
        ksrc = qsrc
    else:
        Tk = mem.shape[0]
        ksrc = jnp.broadcast_to(mem.astype(MXU_DTYPE)[None], (H, Tk, D))

    q = lax.dot_general(qsrc, wq, _DN_PROJ, preferred_element_type=jnp.float32) + bq  # (H,Tq,Dh)
    k = lax.dot_general(ksrc, wk, _DN_PROJ, preferred_element_type=jnp.float32) + bk  # (H,Tk,Dh)
    v = lax.dot_general(ksrc, wv, _DN_PROJ, preferred_element_type=jnp.float32) + bv  # (H,Tk,Dh)

    s = lax.dot_general(q.astype(MXU_DTYPE), k.astype(MXU_DTYPE), _DN_QK,
                        preferred_element_type=jnp.float32)
    s = s * (1.0 / math.sqrt(Dh)) + bias[None]                                        # (H,Tq,Tk)

    m = jnp.max(s, axis=-1, keepdims=True)
    p = jnp.exp(s - m)
    p = p / jnp.sum(p, axis=-1, keepdims=True)          # exact divide (correctness feedback)

    o = lax.dot_general(p.astype(MXU_DTYPE), v.astype(MXU_DTYPE), _DN_PROJ,
                        preferred_element_type=jnp.float32)                           # (H,Tq,Dh)
    ctx = lax.dot_general(o.astype(MXU_DTYPE), wo, _DN_PROJ,
                          preferred_element_type=jnp.float32)                         # (H,Tq,D)
    return x + jnp.sum(ctx, axis=0) + bo                 # head merge = leading-axis sum (VPU adds)


def _ffn_sublayer(x, lng, lnb, w1, b1, w2, b2):
    h = _ln(x, lng, lnb)
    h = jnp.maximum(_mm(h, w1) + b1, 0.0)               # activation = relu
    return x + _mm(h, w2) + b2


# ================================ fused stack kernels ================================

def _encoder_kernel(lens_ref, x_ref, pe_ref,
                    ln1g, ln1b, wq, bq, wk, bk, wv, bv, wo, bo,
                    ln2g, ln2b, w1, b1, w2, b2,
                    fng, fnb,
                    o_ref, act_ref):
    b = pl.program_id(0)
    l = pl.program_id(1)

    @pl.when(l == 0)                                     # prologue: token emb + sine PE
    def _():
        act_ref[...] = x_ref[...] + pe_ref[...]

    x = act_ref[...]                                     # (S, D) VMEM-resident activation
    S = x.shape[0]
    kv_len = lens_ref[b]
    kidx = lax.broadcasted_iota(jnp.int32, (S, S), 1)
    pad_bias = jnp.where(kidx >= kv_len, NEG, 0.0)       # src_key_padding_mask, built in-kernel

    x = _mha_sublayer(x, None, ln1g[...], ln1b[...], wq[...], bq[...], wk[...], bk[...],
                      wv[...], bv[...], wo[...], bo[...], bias=pad_bias, is_self=True)
    x = _ffn_sublayer(x, ln2g[...], ln2b[...], w1[...], b1[...], w2[...], b2[...])
    act_ref[...] = x

    @pl.when(l == pl.num_programs(1) - 1)                # epilogue: final encoder LayerNorm
    def _():
        o_ref[...] = _ln(x, fng[...], fnb[...])


def _decoder_kernel(lens_ref, y_ref, pe_ref, mem_ref, pw_ref, pb_ref,
                    ln1g, ln1b, swq, sbq, swk, sbk, swv, sbv, swo, sbo,
                    ln2g, ln2b, cwq, cbq, cwk, cbk, cwv, cbv, cwo, cbo,
                    ln3g, ln3b, fw1, fb1, fw2, fb2,
                    fng, fnb, hw_ref, hb_ref, tgt_ref, ym_ref,
                    out_ref, loss_ref, act_ref):
    b = pl.program_id(0)
    l = pl.program_id(1)

    @pl.when(l == 0)                                     # prologue: decoder_prenet + sine PE
    def _():
        act_ref[...] = _mm(y_ref[...], pw_ref[...]) + pb_ref[...] + pe_ref[...]

    x = act_ref[...]                                     # (T, D)
    mem = mem_ref[...]                                   # (S, D) encoder output
    T = x.shape[0]
    S = mem.shape[0]
    mem_len = lens_ref[b]

    # causal self-attention (tgt_mask only, no tgt key-padding mask — matches reference)
    qi = lax.broadcasted_iota(jnp.int32, (T, T), 0)
    ki = lax.broadcasted_iota(jnp.int32, (T, T), 1)
    causal_bias = jnp.where(ki > qi, NEG, 0.0)
    x = _mha_sublayer(x, x, ln1g[...], ln1b[...], swq[...], sbq[...], swk[...], sbk[...],
                      swv[...], sbv[...], swo[...], sbo[...], bias=causal_bias, is_self=True)

    # cross-attention with memory key-padding mask
    cki = lax.broadcasted_iota(jnp.int32, (T, S), 1)
    cross_bias = jnp.where(cki >= mem_len, NEG, 0.0)
    x = _mha_sublayer(x, mem, ln2g[...], ln2b[...], cwq[...], cbq[...], cwk[...], cbk[...],
                      cwv[...], cbv[...], cwo[...], cbo[...], bias=cross_bias, is_self=False)

    x = _ffn_sublayer(x, ln3g[...], ln3b[...], fw1[...], fb1[...], fw2[...], fb2[...])
    act_ref[...] = x

    @pl.when(l == pl.num_programs(1) - 1)
    def _():
        # epilogue: final decoder LN + fused predict/stop projection + loss partial sums
        h = _ln(x, fng[...], fnb[...])
        out = _mm(h, hw_ref[...]) + hb_ref[...]          # (T, M+1) single lane-dense slab
        out_ref[...] = out

        pred = out[:, :NUM_MEL_BINS]
        z = out[:, NUM_MEL_BINS:]                        # (T, 1) stop logits
        d = pred - tgt_ref[...]
        mse = jnp.sum(d * d, keepdims=True)              # F.mse_loss(..., reduction='sum') partial

        t = ym_ref[...]                                  # y_mask_float, (T, 1)
        w = 1.0 + 4.0 * t
        # numerically stable BCE-with-logits: max(z,0) - z*t + log(1 + exp(-|z|))
        bce = jnp.sum(w * (jnp.maximum(z, 0.0) - z * t
                           + jnp.log(1.0 + jnp.exp(-jnp.abs(z)))), keepdims=True)
        loss_ref[...] = jnp.concatenate([mse, bce], axis=-1)   # (1, 2) per-batch-row partials


# ================================ pallas_call wrappers ================================

def _bspec(shape):
    """Batch-indexed block: (B, rest...) -> kernel ref (rest...)."""
    rest = tuple(shape[1:])
    zeros = (0,) * len(rest)
    return pl.BlockSpec((None,) + rest, lambda b, l, lens, z=zeros: (b,) + z)


def _lspec(shape):
    """Layer-stacked block: (L, rest...) -> kernel ref (rest...), streamed over the layer grid axis."""
    rest = tuple(shape[1:])
    zeros = (0,) * len(rest)
    return pl.BlockSpec((None,) + rest, lambda b, l, lens, z=zeros: (l,) + z)


def _fspec(shape):
    """Full (grid-invariant) block."""
    zeros = (0,) * len(shape)
    return pl.BlockSpec(tuple(shape), lambda b, l, lens, z=zeros: z)


def encoder_forward(x_emb, x_lens, params):
    B, S, D = x_emb.shape
    p = params["enc"]
    pe = sine_pe(S, D)
    weights = (p["ln1_g"], p["ln1_b"],
               p["self_wq"], p["self_bq"], p["self_wk"], p["self_bk"],
               p["self_wv"], p["self_bv"], p["self_wo"], p["self_bo"],
               p["ln2_g"], p["ln2_b"],
               p["ff_w1"], p["ff_b1"], p["ff_w2"], p["ff_b2"])
    finals = (params["enc_norm_g"], params["enc_norm_b"])
    gs = pltpu.PrefetchScalarGridSpec(
        num_scalar_prefetch=1, grid=(B, NUM_LAYERS),
        in_specs=[_bspec(x_emb.shape), _fspec(pe.shape)]
                 + [_lspec(w.shape) for w in weights]
                 + [_fspec(w.shape) for w in finals],
        out_specs=_bspec((B, S, D)),
        scratch_shapes=[pltpu.VMEM((S, D), jnp.float32)])
    return pl.pallas_call(
        _encoder_kernel,
        out_shape=jax.ShapeDtypeStruct((B, S, D), jnp.float32),
        grid_spec=gs,
        compiler_params=pltpu.CompilerParams(dimension_semantics=("parallel", "arbitrary")),
    )(x_lens, x_emb, pe, *weights, *finals)


def decoder_forward(y_in, mem, x_lens, targets, y_mask3, params):
    B, T, M = y_in.shape
    _, S, D = mem.shape
    p = params["dec"]
    pe = sine_pe(T, D)
    pre = (params["prenet_w"], params["prenet_b"])
    weights = (p["ln1_g"], p["ln1_b"],
               p["self_wq"], p["self_bq"], p["self_wk"], p["self_bk"],
               p["self_wv"], p["self_bv"], p["self_wo"], p["self_bo"],
               p["ln2_g"], p["ln2_b"],
               p["cross_wq"], p["cross_bq"], p["cross_wk"], p["cross_bk"],
               p["cross_wv"], p["cross_bv"], p["cross_wo"], p["cross_bo"],
               p["ln3_g"], p["ln3_b"],
               p["ff_w1"], p["ff_b1"], p["ff_w2"], p["ff_b2"])
    finals = (params["dec_norm_g"], params["dec_norm_b"], params["head_w"], params["head_b"])
    gs = pltpu.PrefetchScalarGridSpec(
        num_scalar_prefetch=1, grid=(B, NUM_LAYERS),
        in_specs=[_bspec(y_in.shape), _fspec(pe.shape), _bspec(mem.shape)]
                 + [_fspec(w.shape) for w in pre]
                 + [_lspec(w.shape) for w in weights]
                 + [_fspec(w.shape) for w in finals]
                 + [_bspec(targets.shape), _bspec(y_mask3.shape)],
        out_specs=(_bspec((B, T, M + 1)), _bspec((B, 1, 2))),
        scratch_shapes=[pltpu.VMEM((T, D), jnp.float32)])
    return pl.pallas_call(
        _decoder_kernel,
        out_shape=(jax.ShapeDtypeStruct((B, T, M + 1), jnp.float32),
                   jax.ShapeDtypeStruct((B, 1, 2), jnp.float32)),
        grid_spec=gs,
        compiler_params=pltpu.CompilerParams(dimension_semantics=("parallel", "arbitrary")),
    )(x_lens, y_in, pe, mem, *pre, *weights, *finals, targets, y_mask3)


# ================================ model glue ================================

@functools.lru_cache(maxsize=None)
def sine_pe(T, d):
    pos = np.arange(T, dtype=np.float64)[:, None]
    div = np.exp(np.arange(0, d, 2, dtype=np.float64) * -(math.log(10000.0) / d))
    pe = np.zeros((T, d), dtype=np.float64)
    pe[:, 0::2] = np.sin(pos * div)
    pe[:, 1::2] = np.cos(pos * div)
    return jnp.asarray(pe, jnp.float32)


def transformer_forward(params, x_tokens, x_lens, y, y_lens, reduction="sum"):
    assert reduction == "sum"
    B, S = x_tokens.shape
    T = y.shape[1]
    x_lens = x_lens.astype(jnp.int32)

    # text_embedding (gather) + encoder_prenet (Identity); sine PE is added inside the encoder kernel
    x_emb = params["emb"][x_tokens]                               # (B, S, D)
    enc_out = encoder_forward(x_emb, x_lens, params)              # fused encoder stack + final LN

    # decoder target preparation (plain JAX glue)
    y_mask = jnp.arange(T)[None, :] >= y_lens[:, None]            # make_pad_mask, (B, T) bool
    y_mask_f = y_mask.astype(jnp.float32)
    y_masked = y * (1.0 - y_mask_f[..., None])
    y_pad = jnp.pad(y_masked, ((0, 0), (1, 0), (0, 0)))           # F.pad(..., (0,0,1,0,0,0))
    y_in, targets = y_pad[:, :-1], y_pad[:, 1:]

    # fused decoder stack: prenet+PE prologue, layers, final LN + predict/stop head + loss partials
    head_out, loss_parts = decoder_forward(y_in, enc_out, x_lens, targets,
                                           y_mask_f[..., None], params)
    predict = head_out[..., :NUM_MEL_BINS]                        # (B, T, M)
    logits = head_out[..., NUM_MEL_BINS]                          # (B, T)
    total_loss = jnp.sum(loss_parts[:, 0, 0])                     # MSE-sum
    stop_loss = jnp.sum(loss_parts[:, 0, 1])                      # weighted-BCE-sum

    # BinaryAccuracy(threshold=0.5, multidim_average='global') — plain JAX metric glue
    stop_pred = (jax.nn.sigmoid(logits) >= 0.5).astype(jnp.int32)
    stop_accuracy = jnp.mean((stop_pred == y_mask.astype(jnp.int32)).astype(jnp.float32))

    metrics = {
        "stop_loss": stop_loss,
        "stop_accuracy": stop_accuracy * jnp.sum(y_lens).astype(jnp.float32),
    }
    return (enc_out, predict), total_loss + 100.0 * stop_loss, metrics


# ================================ parameter init ================================
# Projection weights are stored pre-transposed / head-major and in bf16 for the MXU;
# biases & LayerNorm affine params stay f32.

def init_params(key):
    keys = iter(jax.random.split(key, 64))
    L, D, H, F, M = NUM_LAYERS, D_MODEL, NHEAD, FFN_DIM, NUM_MEL_BINS
    Dh = D // H

    def nrm(shape, s=0.02, dtype=MXU_DTYPE):
        return (s * jax.random.normal(next(keys), shape)).astype(dtype)

    def zeros(shape):
        return jnp.zeros(shape, jnp.float32)

    def ones(shape):
        return jnp.ones(shape, jnp.float32)

    def attn(prefix):
        # head-major pre-split projections (q/k/v/out) — no in-kernel weight slicing
        return {
            prefix + "wq": nrm((L, H, D, Dh)), prefix + "bq": zeros((L, H, 1, Dh)),
            prefix + "wk": nrm((L, H, D, Dh)), prefix + "bk": zeros((L, H, 1, Dh)),
            prefix + "wv": nrm((L, H, D, Dh)), prefix + "bv": zeros((L, H, 1, Dh)),
            prefix + "wo": nrm((L, H, Dh, D)), prefix + "bo": zeros((L, 1, D)),
        }

    enc = {"ln1_g": ones((L, 1, D)), "ln1_b": zeros((L, 1, D)),
           "ln2_g": ones((L, 1, D)), "ln2_b": zeros((L, 1, D)),
           "ff_w1": nrm((L, D, F)), "ff_b1": zeros((L, 1, F)),
           "ff_w2": nrm((L, F, D)), "ff_b2": zeros((L, 1, D))}
    enc.update(attn("self_"))

    dec = {"ln1_g": ones((L, 1, D)), "ln1_b": zeros((L, 1, D)),
           "ln2_g": ones((L, 1, D)), "ln2_b": zeros((L, 1, D)),
           "ln3_g": ones((L, 1, D)), "ln3_b": zeros((L, 1, D)),
           "ff_w1": nrm((L, D, F)), "ff_b1": zeros((L, 1, F)),
           "ff_w2": nrm((L, F, D)), "ff_b2": zeros((L, 1, D))}
    dec.update(attn("self_"))
    dec.update(attn("cross_"))

    # fused predict_layer (D -> 16) + stop_layer (D -> 1) projection, (D, 17)
    head_w = jnp.concatenate([nrm((D, M)), nrm((D, 1))], axis=1)

    return dict(
        emb=jax.random.normal(next(keys), (NUM_TEXT_TOKENS, D)).astype(jnp.float32),
        enc=enc,
        enc_norm_g=ones((1, D)), enc_norm_b=zeros((1, D)),
        dec=dec,
        dec_norm_g=ones((1, D)), dec_norm_b=zeros((1, D)),
        prenet_w=nrm((M, D)), prenet_b=zeros((1, D)),
        head_w=head_w, head_b=zeros((1, M + 1)),
    )


# ================================ main ================================

if __name__ == "__main__":
    key = jax.random.PRNGKey(0)
    pkey, tkey, ykey = jax.random.split(key, 3)

    params = init_params(pkey)

    B, S, T = 2, 8, 8
    x_tokens = jax.random.randint(tkey, (B, S), 0, NUM_TEXT_TOKENS)
    x_lens = jnp.array([8, 5], dtype=jnp.int32)
    y = jax.random.normal(ykey, (B, T, NUM_MEL_BINS), dtype=jnp.float32)
    y_lens = jnp.array([8, 6], dtype=jnp.int32)

    fwd = jax.jit(transformer_forward)
    (enc_out, predict), loss, metrics = fwd(params, x_tokens, x_lens, y, y_lens)
    jax.block_until_ready((enc_out, predict, loss, metrics["stop_loss"]))

    assert enc_out.shape == (B, S, D_MODEL)
    assert predict.shape == (B, T, NUM_MEL_BINS)
    assert np.isfinite(float(loss))
    print("KERNEL_OK")
</pallas_src>

<mosaic_0001>
module attributes {stable_mosaic.version = 11 : i64} {
  func.func @_encoder_kernel(%arg0: i32, %arg1: i32, %arg2: memref<2xi32, #tpu.memory_space<smem>>, %arg3: memref<1x8x32xf32, #tpu.memory_space<vmem>>, %arg4: memref<8x32xf32, #tpu.memory_space<vmem>>, %arg5: memref<1x1x32xf32, #tpu.memory_space<vmem>>, %arg6: memref<1x1x32xf32, #tpu.memory_space<vmem>>, %arg7: memref<1x4x32x8xbf16, #tpu.memory_space<vmem>>, %arg8: memref<1x4x1x8xf32, #tpu.memory_space<vmem>>, %arg9: memref<1x4x32x8xbf16, #tpu.memory_space<vmem>>, %arg10: memref<1x4x1x8xf32, #tpu.memory_space<vmem>>, %arg11: memref<1x4x32x8xbf16, #tpu.memory_space<vmem>>, %arg12: memref<1x4x1x8xf32, #tpu.memory_space<vmem>>, %arg13: memref<1x4x8x32xbf16, #tpu.memory_space<vmem>>, %arg14: memref<1x1x32xf32, #tpu.memory_space<vmem>>, %arg15: memref<1x1x32xf32, #tpu.memory_space<vmem>>, %arg16: memref<1x1x32xf32, #tpu.memory_space<vmem>>, %arg17: memref<1x32x128xbf16, #tpu.memory_space<vmem>>, %arg18: memref<1x1x128xf32, #tpu.memory_space<vmem>>, %arg19: memref<1x128x32xbf16, #tpu.memory_space<vmem>>, %arg20: memref<1x1x32xf32, #tpu.memory_space<vmem>>, %arg21: memref<1x32xf32, #tpu.memory_space<vmem>>, %arg22: memref<1x32xf32, #tpu.memory_space<vmem>>, %arg23: memref<1x8x32xf32, #tpu.memory_space<vmem>>, %arg24: memref<8x32xf32, #tpu.memory_space<vmem>>) attributes {dimension_semantics = [#tpu.dimension_semantics<parallel>, #tpu.dimension_semantics<arbitrary>], iteration_bounds = array<i64: 2, 2>, scalar_prefetch = 1 : i64, scratch_operands = 1 : i64, tpu.core_type = #tpu.core_type<tc>, window_params = [{transform_indices = @transform_0, window_bounds = array<i64: 1, 8, 32>}, {pipeline_mode = #tpu.pipeline_mode<synchronous>, transform_indices = @transform_1, window_bounds = array<i64: 8, 32>}, {transform_indices = @transform_2, window_bounds = array<i64: 1, 1, 32>}, {transform_indices = @transform_3, window_bounds = array<i64: 1, 1, 32>}, {transform_indices = @transform_4, window_bounds = array<i64: 1, 4, 32, 8>}, {transform_indices = @transform_5, window_bounds = array<i64: 1, 4, 1, 8>}, {transform_indices = @transform_6, window_bounds = array<i64: 1, 4, 32, 8>}, {transform_indices = @transform_7, window_bounds = array<i64: 1, 4, 1, 8>}, {transform_indices = @transform_8, window_bounds = array<i64: 1, 4, 32, 8>}, {transform_indices = @transform_9, window_bounds = array<i64: 1, 4, 1, 8>}, {transform_indices = @transform_10, window_bounds = array<i64: 1, 4, 8, 32>}, {transform_indices = @transform_11, window_bounds = array<i64: 1, 1, 32>}, {transform_indices = @transform_12, window_bounds = array<i64: 1, 1, 32>}, {transform_indices = @transform_13, window_bounds = array<i64: 1, 1, 32>}, {transform_indices = @transform_14, window_bounds = array<i64: 1, 32, 128>}, {transform_indices = @transform_15, window_bounds = array<i64: 1, 1, 128>}, {transform_indices = @transform_16, window_bounds = array<i64: 1, 128, 32>}, {transform_indices = @transform_17, window_bounds = array<i64: 1, 1, 32>}, {pipeline_mode = #tpu.pipeline_mode<synchronous>, transform_indices = @transform_18, window_bounds = array<i64: 1, 32>}, {pipeline_mode = #tpu.pipeline_mode<synchronous>, transform_indices = @transform_19, window_bounds = array<i64: 1, 32>}, {transform_indices = @transform_20, window_bounds = array<i64: 1, 8, 32>}]} {
    %c0_i32 = arith.constant 0 : i32
    %0 = arith.cmpi eq, %arg1, %c0_i32 : i32
    %1 = arith.extui %0 : i1 to i32
    %c0_i32_0 = arith.constant 0 : i32
    %2 = arith.cmpi ne, %1, %c0_i32_0 : i32
    scf.if %2 {
      %c0_84 = arith.constant 0 : index
      %c0_85 = arith.constant 0 : index
      %c0_86 = arith.constant 0 : index
      %138 = vector.load %arg3[%c0_84, %c0_85, %c0_86] : memref<1x8x32xf32, #tpu.memory_space<vmem>>, vector<1x8x32xf32>
      %139 = vector.shape_cast %138 : vector<1x8x32xf32> to vector<8x32xf32>
      %c0_87 = arith.constant 0 : index
      %c0_88 = arith.constant 0 : index
      %140 = vector.load %arg4[%c0_87, %c0_88] : memref<8x32xf32, #tpu.memory_space<vmem>>, vector<8x32xf32>
      %141 = arith.addf %139, %140 : vector<8x32xf32>
      %c0_89 = arith.constant 0 : index
      %c0_90 = arith.constant 0 : index
      %142 = vector.load %arg24[%c0_89, %c0_90] : memref<8x32xf32, #tpu.memory_space<vmem>>, vector<8x32xf32>
      tpu.vector_store %arg24[%c0_89, %c0_90], %141 {strides = array<i32>} : memref<8x32xf32, #tpu.memory_space<vmem>>, vector<8x32xf32>,
    } else {
    }
    %c0 = arith.constant 0 : index
    %c0_1 = arith.constant 0 : index
    %3 = vector.load %arg24[%c0, %c0_1] : memref<8x32xf32, #tpu.memory_space<vmem>>, vector<8x32xf32>
    %4 = arith.index_cast %arg0 : i32 to index
    %5 = memref.load %arg2[%4] : memref<2xi32, #tpu.memory_space<smem>>
    %6 = tpu.iota {dimensions = array<i32: 1>} : vector<8x8xi32>
    %7 = vector.broadcast %5 : i32 to vector<8x8xi32>
    %8 = arith.cmpi sge, %6, %7 : vector<8x8xi32>
    %cst = arith.constant -1.000000e+09 : f32
    %cst_2 = arith.constant 0.000000e+00 : f32
    %9 = vector.broadcast %cst : f32 to vector<8x8xf32>
    %10 = vector.broadcast %cst_2 : f32 to vector<8x8xf32>
    %11 = arith.select %8, %9, %10 : vector<8x8xi1>, vector<8x8xf32>
    %c0_3 = arith.constant 0 : index
    %c0_4 = arith.constant 0 : index
    %c0_5 = arith.constant 0 : index
    %12 = vector.load %arg5[%c0_3, %c0_4, %c0_5] : memref<1x1x32xf32, #tpu.memory_space<vmem>>, vector<1x1x32xf32>
    %13 = vector.shape_cast %12 : vector<1x1x32xf32> to vector<1x32xf32>
    %c0_6 = arith.constant 0 : index
    %c0_7 = arith.constant 0 : index
    %c0_8 = arith.constant 0 : index
    %14 = vector.load %arg6[%c0_6, %c0_7, %c0_8] : memref<1x1x32xf32, #tpu.memory_space<vmem>>, vector<1x1x32xf32>
    %15 = vector.shape_cast %14 : vector<1x1x32xf32> to vector<1x32xf32>
    %c0_9 = arith.constant 0 : index
    %c0_10 = arith.constant 0 : index
    %c0_11 = arith.constant 0 : index
    %c0_12 = arith.constant 0 : index
    %16 = vector.load %arg7[%c0_9, %c0_10, %c0_11, %c0_12] : memref<1x4x32x8xbf16, #tpu.memory_space<vmem>>, vector<1x4x32x8xbf16>
    %17 = vector.shape_cast %16 : vector<1x4x32x8xbf16> to vector<4x32x8xbf16>
    %c0_13 = arith.constant 0 : index
    %c0_14 = arith.constant 0 : index
    %c0_15 = arith.constant 0 : index
    %c0_16 = arith.constant 0 : index
    %18 = vector.load %arg8[%c0_13, %c0_14, %c0_15, %c0_16] : memref<1x4x1x8xf32, #tpu.memory_space<vmem>>, vector<1x4x1x8xf32>
    %19 = vector.shape_cast %18 : vector<1x4x1x8xf32> to vector<4x1x8xf32>
    %c0_17 = arith.constant 0 : index
    %c0_18 = arith.constant 0 : index
    %c0_19 = arith.constant 0 : index
    %c0_20 = arith.constant 0 : index
    %20 = vector.load %arg9[%c0_17, %c0_18, %c0_19, %c0_20] : memref<1x4x32x8xbf16, #tpu.memory_space<vmem>>, vector<1x4x32x8xbf16>
    %21 = vector.shape_cast %20 : vector<1x4x32x8xbf16> to vector<4x32x8xbf16>
    %c0_21 = arith.constant 0 : index
    %c0_22 = arith.constant 0 : index
    %c0_23 = arith.constant 0 : index
    %c0_24 = arith.constant 0 : index
    %22 = vector.load %arg10[%c0_21, %c0_22, %c0_23, %c0_24] : memref<1x4x1x8xf32, #tpu.memory_space<vmem>>, vector<1x4x1x8xf32>
    %23 = vector.shape_cast %22 : vector<1x4x1x8xf32> to vector<4x1x8xf32>
    %c0_25 = arith.constant 0 : index
    %c0_26 = arith.constant 0 : index
    %c0_27 = arith.constant 0 : index
    %c0_28 = arith.constant 0 : index
    %24 = vector.load %arg11[%c0_25, %c0_26, %c0_27, %c0_28] : memref<1x4x32x8xbf16, #tpu.memory_space<vmem>>, vector<1x4x32x8xbf16>
    %25 = vector.shape_cast %24 : vector<1x4x32x8xbf16> to vector<4x32x8xbf16>
    %c0_29 = arith.constant 0 : index
    %c0_30 = arith.constant 0 : index
    %c0_31 = arith.constant 0 : index
    %c0_32 = arith.constant 0 : index
    %26 = vector.load %arg12[%c0_29, %c0_30, %c0_31, %c0_32] : memref<1x4x1x8xf32, #tpu.memory_space<vmem>>, vector<1x4x1x8xf32>
    %27 = vector.shape_cast %26 : vector<1x4x1x8xf32> to vector<4x1x8xf32>
    %c0_33 = arith.constant 0 : index
    %c0_34 = arith.constant 0 : index
    %c0_35 = arith.constant 0 : index
    %c0_36 = arith.constant 0 : index
    %28 = vector.load %arg13[%c0_33, %c0_34, %c0_35, %c0_36] : memref<1x4x8x32xbf16, #tpu.memory_space<vmem>>, vector<1x4x8x32xbf16>
    %29 = vector.shape_cast %28 : vector<1x4x8x32xbf16> to vector<4x8x32xbf16>
    %c0_37 = arith.constant 0 : index
    %c0_38 = arith.constant 0 : index
    %c0_39 = arith.constant 0 : index
    %30 = vector.load %arg14[%c0_37, %c0_38, %c0_39] : memref<1x1x32xf32, #tpu.memory_space<vmem>>, vector<1x1x32xf32>
    %31 = vector.shape_cast %30 : vector<1x1x32xf32> to vector<1x32xf32>
    %cst_40 = arith.constant dense<0.000000e+00> : vector<8xf32>
    %32 = vector.multi_reduction <add>, %3, %cst_40 [1] : vector<8x32xf32> to vector<8xf32>
    %33 = vector.shape_cast %32 : vector<8xf32> to vector<8x1xf32>
    %cst_41 = arith.constant 3.200000e+01 : f32
    %34 = vector.broadcast %cst_41 : f32 to vector<8x1xf32>
    %35 = arith.divf %33, %34 : vector<8x1xf32>
    %36 = vector.broadcast %35 : vector<8x1xf32> to vector<8x32xf32>
    %37 = arith.subf %3, %36 : vector<8x32xf32>
    %38 = arith.mulf %37, %37 : vector<8x32xf32>
    %cst_42 = arith.constant dense<0.000000e+00> : vector<8xf32>
    %39 = vector.multi_reduction <add>, %38, %cst_42 [1] : vector<8x32xf32> to vector<8xf32>
    %40 = vector.shape_cast %39 : vector<8xf32> to vector<8x1xf32>
    %cst_43 = arith.constant 3.200000e+01 : f32
    %41 = vector.broadcast %cst_43 : f32 to vector<8x1xf32>
    %42 = arith.divf %40, %41 : vector<8x1xf32>
    %cst_44 = arith.constant 9.99999974E-6 : f32
    %43 = vector.broadcast %cst_44 : f32 to vector<8x1xf32>
    %44 = arith.addf %42, %43 : vector<8x1xf32>
    %45 = math.rsqrt %44 : vector<8x1xf32>
    %46 = vector.broadcast %45 : vector<8x1xf32> to vector<8x32xf32>
    %47 = arith.mulf %37, %46 : vector<8x32xf32>
    %48 = vector.broadcast %13 : vector<1x32xf32> to vector<8x32xf32>
    %49 = arith.mulf %47, %48 : vector<8x32xf32>
    %50 = vector.broadcast %15 : vector<1x32xf32> to vector<8x32xf32>
    %51 = arith.addf %49, %50 : vector<8x32xf32>
    %52 = arith.truncf %51 : vector<8x32xf32> to vector<8x32xbf16>
    %53 = vector.shape_cast %52 : vector<8x32xbf16> to vector<1x8x32xbf16>
    %54 = vector.shape_cast %53 : vector<1x8x32xbf16> to vector<1x8x32xbf16>
    %55 = vector.broadcast %54 : vector<1x8x32xbf16> to vector<4x8x32xbf16>
    %cst_45 = arith.constant dense<0.000000e+00> : vector<4x8x8xf32>
    %56 = tpu.matmul %55, %17, %cst_45 {dimension_numbers = #tpu.dot_dimension_numbers<[2], [1], [1], [2], [0, 0, 0, 1, 1, 2], [0], [0]>} : vector<4x8x32xbf16>, vector<4x32x8xbf16>, vector<4x8x8xf32> -> vector<4x8x8xf32>
    %57 = vector.broadcast %19 : vector<4x1x8xf32> to vector<4x8x8xf32>
    %58 = arith.addf %56, %57 : vector<4x8x8xf32>
    %cst_46 = arith.constant dense<0.000000e+00> : vector<4x8x8xf32>
    %59 = tpu.matmul %55, %21, %cst_46 {dimension_numbers = #tpu.dot_dimension_numbers<[2], [1], [1], [2], [0, 0, 0, 1, 1, 2], [0], [0]>} : vector<4x8x32xbf16>, vector<4x32x8xbf16>, vector<4x8x8xf32> -> vector<4x8x8xf32>
    %60 = vector.broadcast %23 : vector<4x1x8xf32> to vector<4x8x8xf32>
    %61 = arith.addf %59, %60 : vector<4x8x8xf32>
    %cst_47 = arith.constant dense<0.000000e+00> : vector<4x8x8xf32>
    %62 = tpu.matmul %55, %25, %cst_47 {dimension_numbers = #tpu.dot_dimension_numbers<[2], [1], [1], [2], [0, 0, 0, 1, 1, 2], [0], [0]>} : vector<4x8x32xbf16>, vector<4x32x8xbf16>, vector<4x8x8xf32> -> vector<4x8x8xf32>
    %63 = vector.broadcast %27 : vector<4x1x8xf32> to vector<4x8x8xf32>
    %64 = arith.addf %62, %63 : vector<4x8x8xf32>
    %65 = arith.truncf %58 : vector<4x8x8xf32> to vector<4x8x8xbf16>
    %66 = arith.truncf %61 : vector<4x8x8xf32> to vector<4x8x8xbf16>
    %cst_48 = arith.constant dense<0.000000e+00> : vector<4x8x8xf32>
    %67 = tpu.matmul %65, %66, %cst_48 {dimension_numbers = #tpu.dot_dimension_numbers<[2], [2], [1], [1], [0, 0, 0, 1, 1, 1], [0], [0]>} : vector<4x8x8xbf16>, vector<4x8x8xbf16>, vector<4x8x8xf32> -> vector<4x8x8xf32>
    %cst_49 = arith.constant 0.353553385 : f32
    %68 = vector.broadcast %cst_49 : f32 to vector<4x8x8xf32>
    %69 = arith.mulf %67, %68 : vector<4x8x8xf32>
    %70 = vector.shape_cast %11 : vector<8x8xf32> to vector<1x8x8xf32>
    %71 = vector.broadcast %70 : vector<1x8x8xf32> to vector<4x8x8xf32>
    %72 = arith.addf %69, %71 : vector<4x8x8xf32>
    %cst_50 = arith.constant dense<0xFF800000> : vector<4x8xf32>
    %73 = vector.multi_reduction <maximumf>, %72, %cst_50 [2] : vector<4x8x8xf32> to vector<4x8xf32>
    %74 = vector.shape_cast %73 : vector<4x8xf32> to vector<4x8x1xf32>
    %75 = vector.broadcast %74 : vector<4x8x1xf32> to vector<4x8x8xf32>
    %76 = arith.subf %72, %75 : vector<4x8x8xf32>
    %77 = math.exp %76 : vector<4x8x8xf32>
    %cst_51 = arith.constant dense<0.000000e+00> : vector<4x8xf32>
    %78 = vector.multi_reduction <add>, %77, %cst_51 [2] : vector<4x8x8xf32> to vector<4x8xf32>
    %79 = vector.shape_cast %78 : vector<4x8xf32> to vector<4x8x1xf32>
    %80 = vector.broadcast %79 : vector<4x8x1xf32> to vector<4x8x8xf32>
    %81 = arith.divf %77, %80 : vector<4x8x8xf32>
    %82 = arith.truncf %81 : vector<4x8x8xf32> to vector<4x8x8xbf16>
    %83 = arith.truncf %64 : vector<4x8x8xf32> to vector<4x8x8xbf16>
    %cst_52 = arith.constant dense<0.000000e+00> : vector<4x8x8xf32>
    %84 = tpu.matmul %82, %83, %cst_52 {dimension_numbers = #tpu.dot_dimension_numbers<[2], [1], [1], [2], [0, 0, 0, 1, 1, 2], [0], [0]>} : vector<4x8x8xbf16>, vector<4x8x8xbf16>, vector<4x8x8xf32> -> vector<4x8x8xf32>
    %85 = arith.truncf %84 : vector<4x8x8xf32> to vector<4x8x8xbf16>
    %cst_53 = arith.constant dense<0.000000e+00> : vector<4x8x32xf32>
    %86 = tpu.matmul %85, %29, %cst_53 {dimension_numbers = #tpu.dot_dimension_numbers<[2], [1], [1], [2], [0, 0, 0, 1, 1, 2], [0], [0]>} : vector<4x8x8xbf16>, vector<4x8x32xbf16>, vector<4x8x32xf32> -> vector<4x8x32xf32>
    %cst_54 = arith.constant dense<0.000000e+00> : vector<8x32xf32>
    %87 = vector.multi_reduction <add>, %86, %cst_54 [0] : vector<4x8x32xf32> to vector<8x32xf32>
    %88 = arith.addf %3, %87 : vector<8x32xf32>
    %89 = vector.broadcast %31 : vector<1x32xf32> to vector<8x32xf32>
    %90 = arith.addf %88, %89 : vector<8x32xf32>
    %c0_55 = arith.constant 0 : index
    %c0_56 = arith.constant 0 : index
    %c0_57 = arith.constant 0 : index
    %91 = vector.load %arg15[%c0_55, %c0_56, %c0_57] : memref<1x1x32xf32, #tpu.memory_space<vmem>>, vector<1x1x32xf32>
    %92 = vector.shape_cast %91 : vector<1x1x32xf32> to vector<1x32xf32>
    %c0_58 = arith.constant 0 : index
    %c0_59 = arith.constant 0 : index
    %c0_60 = arith.constant 0 : index
    %93 = vector.load %arg16[%c0_58, %c0_59, %c0_60] : memref<1x1x32xf32, #tpu.memory_space<vmem>>, vector<1x1x32xf32>
    %94 = vector.shape_cast %93 : vector<1x1x32xf32> to vector<1x32xf32>
    %c0_61 = arith.constant 0 : index
    %c0_62 = arith.constant 0 : index
    %c0_63 = arith.constant 0 : index
    %95 = vector.load %arg17[%c0_61, %c0_62, %c0_63] : memref<1x32x128xbf16, #tpu.memory_space<vmem>>, vector<1x32x128xbf16>
    %96 = vector.shape_cast %95 : vector<1x32x128xbf16> to vector<32x128xbf16>
    %c0_64 = arith.constant 0 : index
    %c0_65 = arith.constant 0 : index
    %c0_66 = arith.constant 0 : index
    %97 = vector.load %arg18[%c0_64, %c0_65, %c0_66] : memref<1x1x128xf32, #tpu.memory_space<vmem>>, vector<1x1x128xf32>
    %98 = vector.shape_cast %97 : vector<1x1x128xf32> to vector<1x128xf32>
    %c0_67 = arith.constant 0 : index
    %c0_68 = arith.constant 0 : index
    %c0_69 = arith.constant 0 : index
    %99 = vector.load %arg19[%c0_67, %c0_68, %c0_69] : memref<1x128x32xbf16, #tpu.memory_space<vmem>>, vector<1x128x32xbf16>
    %100 = vector.shape_cast %99 : vector<1x128x32xbf16> to vector<128x32xbf16>
    %c0_70 = arith.constant 0 : index
    %c0_71 = arith.constant 0 : index
    %c0_72 = arith.constant 0 : index
    %101 = vector.load %arg20[%c0_70, %c0_71, %c0_72] : memref<1x1x32xf32, #tpu.memory_space<vmem>>, vector<1x1x32xf32>
    %102 = vector.shape_cast %101 : vector<1x1x32xf32> to vector<1x32xf32>
    %cst_73 = arith.constant dense<0.000000e+00> : vector<8xf32>
    %103 = vector.multi_reduction <add>, %90, %cst_73 [1] : vector<8x32xf32> to vector<8xf32>
    %104 = vector.shape_cast %103 : vector<8xf32> to vector<8x1xf32>
    %cst_74 = arith.constant 3.200000e+01 : f32
    %105 = vector.broadcast %cst_74 : f32 to vector<8x1xf32>
    %106 = arith.divf %104, %105 : vector<8x1xf32>
    %107 = vector.broadcast %106 : vector<8x1xf32> to vector<8x32xf32>
    %108 = arith.subf %90, %107 : vector<8x32xf32>
    %109 = arith.mulf %108, %108 : vector<8x32xf32>
    %cst_75 = arith.constant dense<0.000000e+00> : vector<8xf32>
    %110 = vector.multi_reduction <add>, %109, %cst_75 [1] : vector<8x32xf32> to vector<8xf32>
    %111 = vector.shape_cast %110 : vector<8xf32> to vector<8x1xf32>
    %cst_76 = arith.constant 3.200000e+01 : f32
    %112 = vector.broadcast %cst_76 : f32 to vector<8x1xf32>
    %113 = arith.divf %111, %112 : vector<8x1xf32>
    %cst_77 = arith.constant 9.99999974E-6 : f32
    %114 = vector.broadcast %cst_77 : f32 to vector<8x1xf32>
    %115 = arith.addf %113, %114 : vector<8x1xf32>
    %116 = math.rsqrt %115 : vector<8x1xf32>
    %117 = vector.broadcast %116 : vector<8x1xf32> to vector<8x32xf32>
    %118 = arith.mulf %108, %117 : vector<8x32xf32>
    %119 = vector.broadcast %92 : vector<1x32xf32> to vector<8x32xf32>
    %120 = arith.mulf %118, %119 : vector<8x32xf32>
    %121 = vector.broadcast %94 : vector<1x32xf32> to vector<8x32xf32>
    %122 = arith.addf %120, %121 : vector<8x32xf32>
    %123 = arith.truncf %122 : vector<8x32xf32> to vector<8x32xbf16>
    %cst_78 = arith.constant dense<0.000000e+00> : vector<8x128xf32>
    %124 = tpu.matmul %123, %96, %cst_78 {dimension_numbers = #tpu.dot_dimension_numbers<[1], [0], [0], [1], [0, 0, 1, 1], [], []>} : vector<8x32xbf16>, vector<32x128xbf16>, vector<8x128xf32> -> vector<8x128xf32>
    %125 = vector.broadcast %98 : vector<1x128xf32> to vector<8x128xf32>
    %126 = arith.addf %124, %125 : vector<8x128xf32>
    %cst_79 = arith.constant 0.000000e+00 : f32
    %127 = vector.broadcast %cst_79 : f32 to vector<8x128xf32>
    %128 = arith.maximumf %126, %127 : vector<8x128xf32>
    %129 = arith.truncf %128 : vector<8x128xf32> to vector<8x128xbf16>
    %cst_80 = arith.constant dense<0.000000e+00> : vector<8x32xf32>
    %130 = tpu.matmul %129, %100, %cst_80 {dimension_numbers = #tpu.dot_dimension_numbers<[1], [0], [0], [1], [0, 0, 1, 1], [], []>} : vector<8x128xbf16>, vector<128x32xbf16>, vector<8x32xf32> -> vector<8x32xf32>
    %131 = arith.addf %90, %130 : vector<8x32xf32>
    %132 = vector.broadcast %102 : vector<1x32xf32> to vector<8x32xf32>
    %133 = arith.addf %131, %132 : vector<8x32xf32>
    %c0_81 = arith.constant 0 : index
    %c0_82 = arith.constant 0 : index
    %134 = vector.load %arg24[%c0_81, %c0_82] : memref<8x32xf32, #tpu.memory_space<vmem>>, vector<8x32xf32>
    tpu.vector_store %arg24[%c0_81, %c0_82], %133 {strides = array<i32>} : memref<8x32xf32, #tpu.memory_space<vmem>>, vector<8x32xf32>,
    %c1_i32 = arith.constant 1 : i32
    %135 = arith.cmpi eq, %arg1, %c1_i32 : i32
    %136 = arith.extui %135 : i1 to i32
    %c0_i32_83 = arith.constant 0 : i32
    %137 = arith.cmpi ne, %136, %c0_i32_83 : i32
    scf.if %137 {
      %c0_84 = arith.constant 0 : index
      %c0_85 = arith.constant 0 : index
      %138 = vector.load %arg21[%c0_84, %c0_85] : memref<1x32xf32, #tpu.memory_space<vmem>>, vector<1x32xf32>
      %c0_86 = arith.constant 0 : index
      %c0_87 = arith.constant 0 : index
      %139 = vector.load %arg22[%c0_86, %c0_87] : memref<1x32xf32, #tpu.memory_space<vmem>>, vector<1x32xf32>
      %cst_88 = arith.constant dense<0.000000e+00> : vector<8xf32>
      %140 = vector.multi_reduction <add>, %133, %cst_88 [1] : vector<8x32xf32> to vector<8xf32>
      %141 = vector.shape_cast %140 : vector<8xf32> to vector<8x1xf32>
      %cst_89 = arith.constant 3.200000e+01 : f32
      %142 = vector.broadcast %cst_89 : f32 to vector<8x1xf32>
      %143 = arith.divf %141, %142 : vector<8x1xf32>
      %144 = vector.broadcast %143 : vector<8x1xf32> to vector<8x32xf32>
      %145 = arith.subf %133, %144 : vector<8x32xf32>
      %146 = arith.mulf %145, %145 : vector<8x32xf32>
      %cst_90 = arith.constant dense<0.000000e+00> : vector<8xf32>
      %147 = vector.multi_reduction <add>, %146, %cst_90 [1] : vector<8x32xf32> to vector<8xf32>
      %148 = vector.shape_cast %147 : vector<8xf32> to vector<8x1xf32>
      %cst_91 = arith.constant 3.200000e+01 : f32
      %149 = vector.broadcast %cst_91 : f32 to vector<8x1xf32>
      %150 = arith.divf %148, %149 : vector<8x1xf32>
      %cst_92 = arith.constant 9.99999974E-6 : f32
      %151 = vector.broadcast %cst_92 : f32 to vector<8x1xf32>
      %152 = arith.addf %150, %151 : vector<8x1xf32>
      %153 = math.rsqrt %152 : vector<8x1xf32>
      %154 = vector.broadcast %153 : vector<8x1xf32> to vector<8x32xf32>
      %155 = arith.mulf %145, %154 : vector<8x32xf32>
      %156 = vector.broadcast %138 : vector<1x32xf32> to vector<8x32xf32>
      %157 = arith.mulf %155, %156 : vector<8x32xf32>
      %158 = vector.broadcast %139 : vector<1x32xf32> to vector<8x32xf32>
      %159 = arith.addf %157, %158 : vector<8x32xf32>
      %c0_93 = arith.constant 0 : index
      %c0_94 = arith.constant 0 : index
      %c0_95 = arith.constant 0 : index
      %160 = vector.load %arg23[%c0_93, %c0_94, %c0_95] : memref<1x8x32xf32, #tpu.memory_space<vmem>>, vector<1x8x32xf32>
      %161 = vector.shape_cast %160 : vector<1x8x32xf32> to vector<8x32xf32>
      %162 = vector.shape_cast %159 : vector<8x32xf32> to vector<1x8x32xf32>
      tpu.vector_store %arg23[%c0_93, %c0_94, %c0_95], %162 {strides = array<i32>} : memref<1x8x32xf32, #tpu.memory_space<vmem>>, vector<1x8x32xf32>,
    } else {
    }
    return
  }
  func.func @transform_0(%arg0: i32, %arg1: i32, %arg2: memref<2xi32, #tpu.memory_space<smem>>) -> (i32, i32, i32) {
    %c0_i32 = arith.constant 0 : i32
    %c0_i32_0 = arith.constant 0 : i32
    %c0_i32_1 = arith.constant 0 : i32
    return %arg0, %c0_i32, %c0_i32_0 : i32, i32, i32
  }
  func.func @transform_1(%arg0: i32, %arg1: i32, %arg2: memref<2xi32, #tpu.memory_space<smem>>) -> (i32, i32) {
    %c0_i32 = arith.constant 0 : i32
    %c0_i32_0 = arith.constant 0 : i32
    %c0_i32_1 = arith.constant 0 : i32
    return %c0_i32, %c0_i32_0 : i32, i32
  }
  func.func @transform_2(%arg0: i32, %arg1: i32, %arg2: memref<2xi32, #tpu.memory_space<smem>>) -> (i32, i32, i32) {
    %c0_i32 = arith.constant 0 : i32
    %c0_i32_0 = arith.constant 0 : i32
    %c0_i32_1 = arith.constant 0 : i32
    return %arg1, %c0_i32, %c0_i32_0 : i32, i32, i32
  }
  func.func @transform_3(%arg0: i32, %arg1: i32, %arg2: memref<2xi32, #tpu.memory_space<smem>>) -> (i32, i32, i32) {
    %c0_i32 = arith.constant 0 : i32
    %c0_i32_0 = arith.constant 0 : i32
    %c0_i32_1 = arith.constant 0 : i32
    return %arg1, %c0_i32, %c0_i32_0 : i32, i32, i32
  }
  func.func @transform_4(%arg0: i32, %arg1: i32, %arg2: memref<2xi32, #tpu.memory_space<smem>>) -> (i32, i32, i32, i32) {
    %c0_i32 = arith.constant 0 : i32
    %c0_i32_0 = arith.constant 0 : i32
    %c0_i32_1 = arith.constant 0 : i32
    %c0_i32_2 = arith.constant 0 : i32
    return %arg1, %c0_i32, %c0_i32_0, %c0_i32_1 : i32, i32, i32, i32
  }
  func.func @transform_5(%arg0: i32, %arg1: i32, %arg2: memref<2xi32, #tpu.memory_space<smem>>) -> (i32, i32, i32, i32) {
    %c0_i32 = arith.constant 0 : i32
    %c0_i32_0 = arith.constant 0 : i32
    %c0_i32_1 = arith.constant 0 : i32
    %c0_i32_2 = arith.constant 0 : i32
    return %arg1, %c0_i32, %c0_i32_0, %c0_i32_1 : i32, i32, i32, i32
  }
  func.func @transform_6(%arg0: i32, %arg1: i32, %arg2: memref<2xi32, #tpu.memory_space<smem>>) -> (i32, i32, i32, i32) {
    %c0_i32 = arith.constant 0 : i32
    %c0_i32_0 = arith.constant 0 : i32
    %c0_i32_1 = arith.constant 0 : i32
    %c0_i32_2 = arith.constant 0 : i32
    return %arg1, %c0_i32, %c0_i32_0, %c0_i32_1 : i32, i32, i32, i32
  }
  func.func @transform_7(%arg0: i32, %arg1: i32, %arg2: memref<2xi32, #tpu.memory_space<smem>>) -> (i32, i32, i32, i32) {
    %c0_i32 = arith.constant 0 : i32
    %c0_i32_0 = arith.constant 0 : i32
    %c0_i32_1 = arith.constant 0 : i32
    %c0_i32_2 = arith.constant 0 : i32
    return %arg1, %c0_i32, %c0_i32_0, %c0_i32_1 : i32, i32, i32, i32
  }
  func.func @transform_8(%arg0: i32, %arg1: i32, %arg2: memref<2xi32, #tpu.memory_space<smem>>) -> (i32, i32, i32, i32) {
    %c0_i32 = arith.constant 0 : i32
    %c0_i32_0 = arith.constant 0 : i32
    %c0_i32_1 = arith.constant 0 : i32
    %c0_i32_2 = arith.constant 0 : i32
    return %arg1, %c0_i32, %c0_i32_0, %c0_i32_1 : i32, i32, i32, i32
  }
  func.func @transform_9(%arg0: i32, %arg1: i32, %arg2: memref<2xi32, #tpu.memory_space<smem>>) -> (i32, i32, i32, i32) {
    %c0_i32 = arith.constant 0 : i32
    %c0_i32_0 = arith.constant 0 : i32
    %c0_i32_1 = arith.constant 0 : i32
    %c0_i32_2 = arith.constant 0 : i32
    return %arg1, %c0_i32, %c0_i32_0, %c0_i32_1 : i32, i32, i32, i32
  }
  func.func @transform_10(%arg0: i32, %arg1: i32, %arg2: memref<2xi32, #tpu.memory_space<smem>>) -> (i32, i32, i32, i32) {
    %c0_i32 = arith.constant 0 : i32
    %c0_i32_0 = arith.constant 0 : i32
    %c0_i32_1 = arith.constant 0 : i32
    %c0_i32_2 = arith.constant 0 : i32
    return %arg1, %c0_i32, %c0_i32_0, %c0_i32_1 : i32, i32, i32, i32
  }
  func.func @transform_11(%arg0: i32, %arg1: i32, %arg2: memref<2xi32, #tpu.memory_space<smem>>) -> (i32, i32, i32) {
    %c0_i32 = arith.constant 0 : i32
    %c0_i32_0 = arith.constant 0 : i32
    %c0_i32_1 = arith.constant 0 : i32
    return %arg1, %c0_i32, %c0_i32_0 : i32, i32, i32
  }
  func.func @transform_12(%arg0: i32, %arg1: i32, %arg2: memref<2xi32, #tpu.memory_space<smem>>) -> (i32, i32, i32) {
    %c0_i32 = arith.constant 0 : i32
    %c0_i32_0 = arith.constant 0 : i32
    %c0_i32_1 = arith.constant 0 : i32
    return %arg1, %c0_i32, %c0_i32_0 : i32, i32, i32
  }
  func.func @transform_13(%arg0: i32, %arg1: i32, %arg2: memref<2xi32, #tpu.memory_space<smem>>) -> (i32, i32, i32) {
    %c0_i32 = arith.constant 0 : i32
    %c0_i32_0 = arith.constant 0 : i32
    %c0_i32_1 = arith.constant 0 : i32
    return %arg1, %c0_i32, %c0_i32_0 : i32, i32, i32
  }
  func.func @transform_14(%arg0: i32, %arg1: i32, %arg2: memref<2xi32, #tpu.memory_space<smem>>) -> (i32, i32, i32) {
    %c0_i32 = arith.constant 0 : i32
    %c0_i32_0 = arith.constant 0 : i32
    %c0_i32_1 = arith.constant 0 : i32
    return %arg1, %c0_i32, %c0_i32_0 : i32, i32, i32
  }
  func.func @transform_15(%arg0: i32, %arg1: i32, %arg2: memref<2xi32, #tpu.memory_space<smem>>) -> (i32, i32, i32) {
    %c0_i32 = arith.constant 0 : i32
    %c0_i32_0 = arith.constant 0 : i32
    %c0_i32_1 = arith.constant 0 : i32
    return %arg1, %c0_i32, %c0_i32_0 : i32, i32, i32
  }
  func.func @transform_16(%arg0: i32, %arg1: i32, %arg2: memref<2xi32, #tpu.memory_space<smem>>) -> (i32, i32, i32) {
    %c0_i32 = arith.constant 0 : i32
    %c0_i32_0 = arith.constant 0 : i32
    %c0_i32_1 = arith.constant 0 : i32
    return %arg1, %c0_i32, %c0_i32_0 : i32, i32, i32
  }
  func.func @transform_17(%arg0: i32, %arg1: i32, %arg2: memref<2xi32, #tpu.memory_space<smem>>) -> (i32, i32, i32) {
    %c0_i32 = arith.constant 0 : i32
    %c0_i32_0 = arith.constant 0 : i32
    %c0_i32_1 = arith.constant 0 : i32
    return %arg1, %c0_i32, %c0_i32_0 : i32, i32, i32
  }
  func.func @transform_18(%arg0: i32, %arg1: i32, %arg2: memref<2xi32, #tpu.memory_space<smem>>) -> (i32, i32) {
    %c0_i32 = arith.constant 0 : i32
    %c0_i32_0 = arith.constant 0 : i32
    %c0_i32_1 = arith.constant 0 : i32
    return %c0_i32, %c0_i32_0 : i32, i32
  }
  func.func @transform_19(%arg0: i32, %arg1: i32, %arg2: memref<2xi32, #tpu.memory_space<smem>>) -> (i32, i32) {
    %c0_i32 = arith.constant 0 : i32
    %c0_i32_0 = arith.constant 0 : i32
    %c0_i32_1 = arith.constant 0 : i32
    return %c0_i32, %c0_i32_0 : i32, i32
  }
  func.func @transform_20(%arg0: i32, %arg1: i32, %arg2: memref<2xi32, #tpu.memory_space<smem>>) -> (i32, i32, i32) {
    %c0_i32 = arith.constant 0 : i32
    %c0_i32_0 = arith.constant 0 : i32
    %c0_i32_1 = arith.constant 0 : i32
    return %arg0, %c0_i32, %c0_i32_0 : i32, i32, i32
  }
}

module attributes {stable_mosaic.version = 11 : i64} {
  func.func @_decoder_kernel(%arg0: i32, %arg1: i32, %arg2: memref<2xi32, #tpu.memory_space<smem>>, %arg3: memref<1x8x16xf32, #tpu.memory_space<vmem>>, %arg4: memref<8x32xf32, #tpu.memory_space<vmem>>, %arg5: memref<1x8x32xf32, #tpu.memory_space<vmem>>, %arg6: memref<16x32xbf16, #tpu.memory_space<vmem>>, %arg7: memref<1x32xf32, #tpu.memory_space<vmem>>, %arg8: memref<1x1x32xf32, #tpu.memory_space<vmem>>, %arg9: memref<1x1x32xf32, #tpu.memory_space<vmem>>, %arg10: memref<1x4x32x8xbf16, #tpu.memory_space<vmem>>, %arg11: memref<1x4x1x8xf32, #tpu.memory_space<vmem>>, %arg12: memref<1x4x32x8xbf16, #tpu.memory_space<vmem>>, %arg13: memref<1x4x1x8xf32, #tpu.memory_space<vmem>>, %arg14: memref<1x4x32x8xbf16, #tpu.memory_space<vmem>>, %arg15: memref<1x4x1x8xf32, #tpu.memory_space<vmem>>, %arg16: memref<1x4x8x32xbf16, #tpu.memory_space<vmem>>, %arg17: memref<1x1x32xf32, #tpu.memory_space<vmem>>, %arg18: memref<1x1x32xf32, #tpu.memory_space<vmem>>, %arg19: memref<1x1x32xf32, #tpu.memory_space<vmem>>, %arg20: memref<1x4x32x8xbf16, #tpu.memory_space<vmem>>, %arg21: memref<1x4x1x8xf32, #tpu.memory_space<vmem>>, %arg22: memref<1x4x32x8xbf16, #tpu.memory_space<vmem>>, %arg23: memref<1x4x1x8xf32, #tpu.memory_space<vmem>>, %arg24: memref<1x4x32x8xbf16, #tpu.memory_space<vmem>>, %arg25: memref<1x4x1x8xf32, #tpu.memory_space<vmem>>, %arg26: memref<1x4x8x32xbf16, #tpu.memory_space<vmem>>, %arg27: memref<1x1x32xf32, #tpu.memory_space<vmem>>, %arg28: memref<1x1x32xf32, #tpu.memory_space<vmem>>, %arg29: memref<1x1x32xf32, #tpu.memory_space<vmem>>, %arg30: memref<1x32x128xbf16, #tpu.memory_space<vmem>>, %arg31: memref<1x1x128xf32, #tpu.memory_space<vmem>>, %arg32: memref<1x128x32xbf16, #tpu.memory_space<vmem>>, %arg33: memref<1x1x32xf32, #tpu.memory_space<vmem>>, %arg34: memref<1x32xf32, #tpu.memory_space<vmem>>, %arg35: memref<1x32xf32, #tpu.memory_space<vmem>>, %arg36: memref<32x17xbf16, #tpu.memory_space<vmem>>, %arg37: memref<1x17xf32, #tpu.memory_space<vmem>>, %arg38: memref<1x8x16xf32, #tpu.memory_space<vmem>>, %arg39: memref<1x8x1xf32, #tpu.memory_space<vmem>>, %arg40: memref<1x8x17xf32, #tpu.memory_space<vmem>>, %arg41: memref<1x1x2xf32, #tpu.memory_space<vmem>>, %arg42: memref<8x32xf32, #tpu.memory_space<vmem>>) attributes {dimension_semantics = [#tpu.dimension_semantics<parallel>, #tpu.dimension_semantics<arbitrary>], iteration_bounds = array<i64: 2, 2>, scalar_prefetch = 1 : i64, scratch_operands = 1 : i64, tpu.core_type = #tpu.core_type<tc>, window_params = [{transform_indices = @transform_0, window_bounds = array<i64: 1, 8, 16>}, {pipeline_mode = #tpu.pipeline_mode<synchronous>, transform_indices = @transform_1, window_bounds = array<i64: 8, 32>}, {transform_indices = @transform_2, window_bounds = array<i64: 1, 8, 32>}, {pipeline_mode = #tpu.pipeline_mode<synchronous>, transform_indices = @transform_3, window_bounds = array<i64: 16, 32>}, {pipeline_mode = #tpu.pipeline_mode<synchronous>, transform_indices = @transform_4, window_bounds = array<i64: 1, 32>}, {transform_indices = @transform_5, window_bounds = array<i64: 1, 1, 32>}, {transform_indices = @transform_6, window_bounds = array<i64: 1, 1, 32>}, {transform_indices = @transform_7, window_bounds = array<i64: 1, 4, 32, 8>}, {transform_indices = @transform_8, window_bounds = array<i64: 1, 4, 1, 8>}, {transform_indices = @transform_9, window_bounds = array<i64: 1, 4, 32, 8>}, {transform_indices = @transform_10, window_bounds = array<i64: 1, 4, 1, 8>}, {transform_indices = @transform_11, window_bounds = array<i64: 1, 4, 32, 8>}, {transform_indices = @transform_12, window_bounds = array<i64: 1, 4, 1, 8>}, {transform_indices = @transform_13, window_bounds = array<i64: 1, 4, 8, 32>}, {transform_indices = @transform_14, window_bounds = array<i64: 1, 1, 32>}, {transform_indices = @transform_15, window_bounds = array<i64: 1, 1, 32>}, {transform_indices = @transform_16, window_bounds = array<i64: 1, 1, 32>}, {transform_indices = @transform_17, window_bounds = array<i64: 1, 4, 32, 8>}, {transform_indices = @transform_18, window_bounds = array<i64: 1, 4, 1, 8>}, {transform_indices = @transform_19, window_bounds = array<i64: 1, 4, 32, 8>}, {transform_indices = @transform_20, window_bounds = array<i64: 1, 4, 1, 8>}, {transform_indices = @transform_21, window_bounds = array<i64: 1, 4, 32, 8>}, {transform_indices = @transform_22, window_bounds = array<i64: 1, 4, 1, 8>}, {transform_indices = @transform_23, window_bounds = array<i64: 1, 4, 8, 32>}, {transform_indices = @transform_24, window_bounds = array<i64: 1, 1, 32>}, {transform_indices = @transform_25, window_bounds = array<i64: 1, 1, 32>}, {transform_indices = @transform_26, window_bounds = array<i64: 1, 1, 32>}, {transform_indices = @transform_27, window_bounds = array<i64: 1, 32, 128>}, {transform_indices = @transform_28, window_bounds = array<i64: 1, 1, 128>}, {transform_indices = @transform_29, window_bounds = array<i64: 1, 128, 32>}, {transform_indices = @transform_30, window_bounds = array<i64: 1, 1, 32>}, {pipeline_mode = #tpu.pipeline_mode<synchronous>, transform_indices = @transform_31, window_bounds = array<i64: 1, 32>}, {pipeline_mode = #tpu.pipeline_mode<synchronous>, transform_indices = @transform_32, window_bounds = array<i64: 1, 32>}, {pipeline_mode = #tpu.pipeline_mode<synchronous>, transform_indices = @transform_33, window_bounds = array<i64: 32, 17>}, {pipeline_mode = #tpu.pipeline_mode<synchronous>, transform_indices = @transform_34, window_bounds = array<i64: 1, 17>}, {transform_indices = @transform_35, window_bounds = array<i64: 1, 8, 16>}, {transform_indices = @transform_36, window_bounds = array<i64: 1, 8, 1>}, {transform_indices = @transform_37, window_bounds = array<i64: 1, 8, 17>}, {transform_indices = @transform_38, window_bounds = array<i64: 1, 1, 2>}]} {
    %c0_i32 = arith.constant 0 : i32
    %0 = arith.cmpi eq, %arg1, %c0_i32 : i32
    %1 = arith.extui %0 : i1 to i32
    %c0_i32_0 = arith.constant 0 : i32
    %2 = arith.cmpi ne, %1, %c0_i32_0 : i32
    scf.if %2 {
      %c0_141 = arith.constant 0 : index
      %c0_142 = arith.constant 0 : index
      %c0_143 = arith.constant 0 : index
      %229 = vector.load %arg3[%c0_141, %c0_142, %c0_143] : memref<1x8x16xf32, #tpu.memory_space<vmem>>, vector<1x8x16xf32>
      %230 = vector.shape_cast %229 : vector<1x8x16xf32> to vector<8x16xf32>
      %c0_144 = arith.constant 0 : index
      %c0_145 = arith.constant 0 : index
      %231 = vector.load %arg6[%c0_144, %c0_145] : memref<16x32xbf16, #tpu.memory_space<vmem>>, vector<16x32xbf16>
      %232 = arith.truncf %230 : vector<8x16xf32> to vector<8x16xbf16>
      %cst_146 = arith.constant dense<0.000000e+00> : vector<8x32xf32>
      %233 = tpu.matmul %232, %231, %cst_146 {dimension_numbers = #tpu.dot_dimension_numbers<[1], [0], [0], [1], [0, 0, 1, 1], [], []>} : vector<8x16xbf16>, vector<16x32xbf16>, vector<8x32xf32> -> vector<8x32xf32>
      %c0_147 = arith.constant 0 : index
      %c0_148 = arith.constant 0 : index
      %234 = vector.load %arg7[%c0_147, %c0_148] : memref<1x32xf32, #tpu.memory_space<vmem>>, vector<1x32xf32>
      %235 = vector.broadcast %234 : vector<1x32xf32> to vector<8x32xf32>
      %236 = arith.addf %233, %235 : vector<8x32xf32>
      %c0_149 = arith.constant 0 : index
      %c0_150 = arith.constant 0 : index
      %237 = vector.load %arg4[%c0_149, %c0_150] : memref<8x32xf32, #tpu.memory_space<vmem>>, vector<8x32xf32>
      %238 = arith.addf %236, %237 : vector<8x32xf32>
      %c0_151 = arith.constant 0 : index
      %c0_152 = arith.constant 0 : index
      %239 = vector.load %arg42[%c0_151, %c0_152] : memref<8x32xf32, #tpu.memory_space<vmem>>, vector<8x32xf32>
      tpu.vector_store %arg42[%c0_151, %c0_152], %238 {strides = array<i32>} : memref<8x32xf32, #tpu.memory_space<vmem>>, vector<8x32xf32>,
    } else {
    }
    %c0 = arith.constant 0 : index
    %c0_1 = arith.constant 0 : index
    %3 = vector.load %arg42[%c0, %c0_1] : memref<8x32xf32, #tpu.memory_space<vmem>>, vector<8x32xf32>
    %c0_2 = arith.constant 0 : index
    %c0_3 = arith.constant 0 : index
    %c0_4 = arith.constant 0 : index
    %4 = vector.load %arg5[%c0_2, %c0_3, %c0_4] : memref<1x8x32xf32, #tpu.memory_space<vmem>>, vector<1x8x32xf32>
    %5 = vector.shape_cast %4 : vector<1x8x32xf32> to vector<8x32xf32>
    %6 = arith.index_cast %arg0 : i32 to index
    %7 = memref.load %arg2[%6] : memref<2xi32, #tpu.memory_space<smem>>
    %8 = tpu.iota {dimensions = array<i32: 0>} : vector<8x8xi32>
    %9 = tpu.iota {dimensions = array<i32: 1>} : vector<8x8xi32>
    %10 = arith.cmpi sgt, %9, %8 : vector<8x8xi32>
    %cst = arith.constant -1.000000e+09 : f32
    %cst_5 = arith.constant 0.000000e+00 : f32
    %11 = vector.broadcast %cst : f32 to vector<8x8xf32>
    %12 = vector.broadcast %cst_5 : f32 to vector<8x8xf32>
    %13 = arith.select %10, %11, %12 : vector<8x8xi1>, vector<8x8xf32>
    %c0_6 = arith.constant 0 : index
    %c0_7 = arith.constant 0 : index
    %c0_8 = arith.constant 0 : index
    %14 = vector.load %arg8[%c0_6, %c0_7, %c0_8] : memref<1x1x32xf32, #tpu.memory_space<vmem>>, vector<1x1x32xf32>
    %15 = vector.shape_cast %14 : vector<1x1x32xf32> to vector<1x32xf32>
    %c0_9 = arith.constant 0 : index
    %c0_10 = arith.constant 0 : index
    %c0_11 = arith.constant 0 : index
    %16 = vector.load %arg9[%c0_9, %c0_10, %c0_11] : memref<1x1x32xf32, #tpu.memory_space<vmem>>, vector<1x1x32xf32>
    %17 = vector.shape_cast %16 : vector<1x1x32xf32> to vector<1x32xf32>
    %c0_12 = arith.constant 0 : index
    %c0_13 = arith.constant 0 : index
    %c0_14 = arith.constant 0 : index
    %c0_15 = arith.constant 0 : index
    %18 = vector.load %arg10[%c0_12, %c0_13, %c0_14, %c0_15] : memref<1x4x32x8xbf16, #tpu.memory_space<vmem>>, vector<1x4x32x8xbf16>
    %19 = vector.shape_cast %18 : vector<1x4x32x8xbf16> to vector<4x32x8xbf16>
    %c0_16 = arith.constant 0 : index
    %c0_17 = arith.constant 0 : index
    %c0_18 = arith.constant 0 : index
    %c0_19 = arith.constant 0 : index
    %20 = vector.load %arg11[%c0_16, %c0_17, %c0_18, %c0_19] : memref<1x4x1x8xf32, #tpu.memory_space<vmem>>, vector<1x4x1x8xf32>
    %21 = vector.shape_cast %20 : vector<1x4x1x8xf32> to vector<4x1x8xf32>
    %c0_20 = arith.constant 0 : index
    %c0_21 = arith.constant 0 : index
    %c0_22 = arith.constant 0 : index
    %c0_23 = arith.constant 0 : index
    %22 = vector.load %arg12[%c0_20, %c0_21, %c0_22, %c0_23] : memref<1x4x32x8xbf16, #tpu.memory_space<vmem>>, vector<1x4x32x8xbf16>
    %23 = vector.shape_cast %22 : vector<1x4x32x8xbf16> to vector<4x32x8xbf16>
    %c0_24 = arith.constant 0 : index
    %c0_25 = arith.constant 0 : index
    %c0_26 = arith.constant 0 : index
    %c0_27 = arith.constant 0 : index
    %24 = vector.load %arg13[%c0_24, %c0_25, %c0_26, %c0_27] : memref<1x4x1x8xf32, #tpu.memory_space<vmem>>, vector<1x4x1x8xf32>
    %25 = vector.shape_cast %24 : vector<1x4x1x8xf32> to vector<4x1x8xf32>
    %c0_28 = arith.constant 0 : index
    %c0_29 = arith.constant 0 : index
    %c0_30 = arith.constant 0 : index
    %c0_31 = arith.constant 0 : index
    %26 = vector.load %arg14[%c0_28, %c0_29, %c0_30, %c0_31] : memref<1x4x32x8xbf16, #tpu.memory_space<vmem>>, vector<1x4x32x8xbf16>
    %27 = vector.shape_cast %26 : vector<1x4x32x8xbf16> to vector<4x32x8xbf16>
    %c0_32 = arith.constant 0 : index
    %c0_33 = arith.constant 0 : index
    %c0_34 = arith.constant 0 : index
    %c0_35 = arith.constant 0 : index
    %28 = vector.load %arg15[%c0_32, %c0_33, %c0_34, %c0_35] : memref<1x4x1x8xf32, #tpu.memory_space<vmem>>, vector<1x4x1x8xf32>
    %29 = vector.shape_cast %28 : vector<1x4x1x8xf32> to vector<4x1x8xf32>
    %c0_36 = arith.constant 0 : index
    %c0_37 = arith.constant 0 : index
    %c0_38 = arith.constant 0 : index
    %c0_39 = arith.constant 0 : index
    %30 = vector.load %arg16[%c0_36, %c0_37, %c0_38, %c0_39] : memref<1x4x8x32xbf16, #tpu.memory_space<vmem>>, vector<1x4x8x32xbf16>
    %31 = vector.shape_cast %30 : vector<1x4x8x32xbf16> to vector<4x8x32xbf16>
    %c0_40 = arith.constant 0 : index
    %c0_41 = arith.constant 0 : index
    %c0_42 = arith.constant 0 : index
    %32 = vector.load %arg17[%c0_40, %c0_41, %c0_42] : memref<1x1x32xf32, #tpu.memory_space<vmem>>, vector<1x1x32xf32>
    %33 = vector.shape_cast %32 : vector<1x1x32xf32> to vector<1x32xf32>
    %cst_43 = arith.constant dense<0.000000e+00> : vector<8xf32>
    %34 = vector.multi_reduction <add>, %3, %cst_43 [1] : vector<8x32xf32> to vector<8xf32>
    %35 = vector.shape_cast %34 : vector<8xf32> to vector<8x1xf32>
    %cst_44 = arith.constant 3.200000e+01 : f32
    %36 = vector.broadcast %cst_44 : f32 to vector<8x1xf32>
    %37 = arith.divf %35, %36 : vector<8x1xf32>
    %38 = vector.broadcast %37 : vector<8x1xf32> to vector<8x32xf32>
    %39 = arith.subf %3, %38 : vector<8x32xf32>
    %40 = arith.mulf %39, %39 : vector<8x32xf32>
    %cst_45 = arith.constant dense<0.000000e+00> : vector<8xf32>
    %41 = vector.multi_reduction <add>, %40, %cst_45 [1] : vector<8x32xf32> to vector<8xf32>
    %42 = vector.shape_cast %41 : vector<8xf32> to vector<8x1xf32>
    %cst_46 = arith.constant 3.200000e+01 : f32
    %43 = vector.broadcast %cst_46 : f32 to vector<8x1xf32>
    %44 = arith.divf %42, %43 : vector<8x1xf32>
    %cst_47 = arith.constant 9.99999974E-6 : f32
    %45 = vector.broadcast %cst_47 : f32 to vector<8x1xf32>
    %46 = arith.addf %44, %45 : vector<8x1xf32>
    %47 = math.rsqrt %46 : vector<8x1xf32>
    %48 = vector.broadcast %47 : vector<8x1xf32> to vector<8x32xf32>
    %49 = arith.mulf %39, %48 : vector<8x32xf32>
    %50 = vector.broadcast %15 : vector<1x32xf32> to vector<8x32xf32>
    %51 = arith.mulf %49, %50 : vector<8x32xf32>
    %52 = vector.broadcast %17 : vector<1x32xf32> to vector<8x32xf32>
    %53 = arith.addf %51, %52 : vector<8x32xf32>
    %54 = arith.truncf %53 : vector<8x32xf32> to vector<8x32xbf16>
    %55 = vector.shape_cast %54 : vector<8x32xbf16> to vector<1x8x32xbf16>
    %56 = vector.shape_cast %55 : vector<1x8x32xbf16> to vector<1x8x32xbf16>
    %57 = vector.broadcast %56 : vector<1x8x32xbf16> to vector<4x8x32xbf16>
    %cst_48 = arith.constant dense<0.000000e+00> : vector<4x8x8xf32>
    %58 = tpu.matmul %57, %19, %cst_48 {dimension_numbers = #tpu.dot_dimension_numbers<[2], [1], [1], [2], [0, 0, 0, 1, 1, 2], [0], [0]>} : vector<4x8x32xbf16>, vector<4x32x8xbf16>, vector<4x8x8xf32> -> vector<4x8x8xf32>
    %59 = vector.broadcast %21 : vector<4x1x8xf32> to vector<4x8x8xf32>
    %60 = arith.addf %58, %59 : vector<4x8x8xf32>
    %cst_49 = arith.constant dense<0.000000e+00> : vector<4x8x8xf32>
    %61 = tpu.matmul %57, %23, %cst_49 {dimension_numbers = #tpu.dot_dimension_numbers<[2], [1], [1], [2], [0, 0, 0, 1, 1, 2], [0], [0]>} : vector<4x8x32xbf16>, vector<4x32x8xbf16>, vector<4x8x8xf32> -> vector<4x8x8xf32>
    %62 = vector.broadcast %25 : vector<4x1x8xf32> to vector<4x8x8xf32>
    %63 = arith.addf %61, %62 : vector<4x8x8xf32>
    %cst_50 = arith.constant dense<0.000000e+00> : vector<4x8x8xf32>
    %64 = tpu.matmul %57, %27, %cst_50 {dimension_numbers = #tpu.dot_dimension_numbers<[2], [1], [1], [2], [0, 0, 0, 1, 1, 2], [0], [0]>} : vector<4x8x32xbf16>, vector<4x32x8xbf16>, vector<4x8x8xf32> -> vector<4x8x8xf32>
    %65 = vector.broadcast %29 : vector<4x1x8xf32> to vector<4x8x8xf32>
    %66 = arith.addf %64, %65 : vector<4x8x8xf32>
    %67 = arith.truncf %60 : vector<4x8x8xf32> to vector<4x8x8xbf16>
    %68 = arith.truncf %63 : vector<4x8x8xf32> to vector<4x8x8xbf16>
    %cst_51 = arith.constant dense<0.000000e+00> : vector<4x8x8xf32>
    %69 = tpu.matmul %67, %68, %cst_51 {dimension_numbers = #tpu.dot_dimension_numbers<[2], [2], [1], [1], [0, 0, 0, 1, 1, 1], [0], [0]>} : vector<4x8x8xbf16>, vector<4x8x8xbf16>, vector<4x8x8xf32> -> vector<4x8x8xf32>
    %cst_52 = arith.constant 0.353553385 : f32
    %70 = vector.broadcast %cst_52 : f32 to vector<4x8x8xf32>
    %71 = arith.mulf %69, %70 : vector<4x8x8xf32>
    %72 = vector.shape_cast %13 : vector<8x8xf32> to vector<1x8x8xf32>
    %73 = vector.broadcast %72 : vector<1x8x8xf32> to vector<4x8x8xf32>
    %74 = arith.addf %71, %73 : vector<4x8x8xf32>
    %cst_53 = arith.constant dense<0xFF800000> : vector<4x8xf32>
    %75 = vector.multi_reduction <maximumf>, %74, %cst_53 [2] : vector<4x8x8xf32> to vector<4x8xf32>
    %76 = vector.shape_cast %75 : vector<4x8xf32> to vector<4x8x1xf32>
    %77 = vector.broadcast %76 : vector<4x8x1xf32> to vector<4x8x8xf32>
    %78 = arith.subf %74, %77 : vector<4x8x8xf32>
    %79 = math.exp %78 : vector<4x8x8xf32>
    %cst_54 = arith.constant dense<0.000000e+00> : vector<4x8xf32>
    %80 = vector.multi_reduction <add>, %79, %cst_54 [2] : vector<4x8x8xf32> to vector<4x8xf32>
    %81 = vector.shape_cast %80 : vector<4x8xf32> to vector<4x8x1xf32>
    %82 = vector.broadcast %81 : vector<4x8x1xf32> to vector<4x8x8xf32>
    %83 = arith.divf %79, %82 : vector<4x8x8xf32>
    %84 = arith.truncf %83 : vector<4x8x8xf32> to vector<4x8x8xbf16>
    %85 = arith.truncf %66 : vector<4x8x8xf32> to vector<4x8x8xbf16>
    %cst_55 = arith.constant dense<0.000000e+00> : vector<4x8x8xf32>
    %86 = tpu.matmul %84, %85, %cst_55 {dimension_numbers = #tpu.dot_dimension_numbers<[2], [1], [1], [2], [0, 0, 0, 1, 1, 2], [0], [0]>} : vector<4x8x8xbf16>, vector<4x8x8xbf16>, vector<4x8x8xf32> -> vector<4x8x8xf32>
    %87 = arith.truncf %86 : vector<4x8x8xf32> to vector<4x8x8xbf16>
    %cst_56 = arith.constant dense<0.000000e+00> : vector<4x8x32xf32>
    %88 = tpu.matmul %87, %31, %cst_56 {dimension_numbers = #tpu.dot_dimension_numbers<[2], [1], [1], [2], [0, 0, 0, 1, 1, 2], [0], [0]>} : vector<4x8x8xbf16>, vector<4x8x32xbf16>, vector<4x8x32xf32> -> vector<4x8x32xf32>
    %cst_57 = arith.constant dense<0.000000e+00> : vector<8x32xf32>
    %89 = vector.multi_reduction <add>, %88, %cst_57 [0] : vector<4x8x32xf32> to vector<8x32xf32>
    %90 = arith.addf %3, %89 : vector<8x32xf32>
    %91 = vector.broadcast %33 : vector<1x32xf32> to vector<8x32xf32>
    %92 = arith.addf %90, %91 : vector<8x32xf32>
    %93 = tpu.iota {dimensions = array<i32: 1>} : vector<8x8xi32>
    %94 = vector.broadcast %7 : i32 to vector<8x8xi32>
    %95 = arith.cmpi sge, %93, %94 : vector<8x8xi32>
    %cst_58 = arith.constant -1.000000e+09 : f32
    %cst_59 = arith.constant 0.000000e+00 : f32
    %96 = vector.broadcast %cst_58 : f32 to vector<8x8xf32>
    %97 = vector.broadcast %cst_59 : f32 to vector<8x8xf32>
    %98 = arith.select %95, %96, %97 : vector<8x8xi1>, vector<8x8xf32>
    %c0_60 = arith.constant 0 : index
    %c0_61 = arith.constant 0 : index
    %c0_62 = arith.constant 0 : index
    %99 = vector.load %arg18[%c0_60, %c0_61, %c0_62] : memref<1x1x32xf32, #tpu.memory_space<vmem>>, vector<1x1x32xf32>
    %100 = vector.shape_cast %99 : vector<1x1x32xf32> to vector<1x32xf32>
    %c0_63 = arith.constant 0 : index
    %c0_64 = arith.constant 0 : index
    %c0_65 = arith.constant 0 : index
    %101 = vector.load %arg19[%c0_63, %c0_64, %c0_65] : memref<1x1x32xf32, #tpu.memory_space<vmem>>, vector<1x1x32xf32>
    %102 = vector.shape_cast %101 : vector<1x1x32xf32> to vector<1x32xf32>
    %c0_66 = arith.constant 0 : index
    %c0_67 = arith.constant 0 : index
    %c0_68 = arith.constant 0 : index
    %c0_69 = arith.constant 0 : index
    %103 = vector.load %arg20[%c0_66, %c0_67, %c0_68, %c0_69] : memref<1x4x32x8xbf16, #tpu.memory_space<vmem>>, vector<1x4x32x8xbf16>
    %104 = vector.shape_cast %103 : vector<1x4x32x8xbf16> to vector<4x32x8xbf16>
    %c0_70 = arith.constant 0 : index
    %c0_71 = arith.constant 0 : index
    %c0_72 = arith.constant 0 : index
    %c0_73 = arith.constant 0 : index
    %105 = vector.load %arg21[%c0_70, %c0_71, %c0_72, %c0_73] : memref<1x4x1x8xf32, #tpu.memory_space<vmem>>, vector<1x4x1x8xf32>
    %106 = vector.shape_cast %105 : vector<1x4x1x8xf32> to vector<4x1x8xf32>
    %c0_74 = arith.constant 0 : index
    %c0_75 = arith.constant 0 : index
    %c0_76 = arith.constant 0 : index
    %c0_77 = arith.constant 0 : index
    %107 = vector.load %arg22[%c0_74, %c0_75, %c0_76, %c0_77] : memref<1x4x32x8xbf16, #tpu.memory_space<vmem>>, vector<1x4x32x8xbf16>
    %108 = vector.shape_cast %107 : vector<1x4x32x8xbf16> to vector<4x32x8xbf16>
    %c0_78 = arith.constant 0 : index
    %c0_79 = arith.constant 0 : index
    %c0_80 = arith.constant 0 : index
    %c0_81 = arith.constant 0 : index
    %109 = vector.load %arg23[%c0_78, %c0_79, %c0_80, %c0_81] : memref<1x4x1x8xf32, #tpu.memory_space<vmem>>, vector<1x4x1x8xf32>
    %110 = vector.shape_cast %109 : vector<1x4x1x8xf32> to vector<4x1x8xf32>
    %c0_82 = arith.constant 0 : index
    %c0_83 = arith.constant 0 : index
    %c0_84 = arith.constant 0 : index
    %c0_85 = arith.constant 0 : index
    %111 = vector.load %arg24[%c0_82, %c0_83, %c0_84, %c0_85] : memref<1x4x32x8xbf16, #tpu.memory_space<vmem>>, vector<1x4x32x8xbf16>
    %112 = vector.shape_cast %111 : vector<1x4x32x8xbf16> to vector<4x32x8xbf16>
    %c0_86 = arith.constant 0 : index
    %c0_87 = arith.constant 0 : index
    %c0_88 = arith.constant 0 : index
    %c0_89 = arith.constant 0 : index
    %113 = vector.load %arg25[%c0_86, %c0_87, %c0_88, %c0_89] : memref<1x4x1x8xf32, #tpu.memory_space<vmem>>, vector<1x4x1x8xf32>
    %114 = vector.shape_cast %113 : vector<1x4x1x8xf32> to vector<4x1x8xf32>
    %c0_90 = arith.constant 0 : index
    %c0_91 = arith.constant 0 : index
    %c0_92 = arith.constant 0 : index
    %c0_93 = arith.constant 0 : index
    %115 = vector.load %arg26[%c0_90, %c0_91, %c0_92, %c0_93] : memref<1x4x8x32xbf16, #tpu.memory_space<vmem>>, vector<1x4x8x32xbf16>
    %116 = vector.shape_cast %115 : vector<1x4x8x32xbf16> to vector<4x8x32xbf16>
    %c0_94 = arith.constant 0 : index
    %c0_95 = arith.constant 0 : index
    %c0_96 = arith.constant 0 : index
    %117 = vector.load %arg27[%c0_94, %c0_95, %c0_96] : memref<1x1x32xf32, #tpu.memory_space<vmem>>, vector<1x1x32xf32>
    %118 = vector.shape_cast %117 : vector<1x1x32xf32> to vector<1x32xf32>
    %cst_97 = arith.constant dense<0.000000e+00> : vector<8xf32>
    %119 = vector.multi_reduction <add>, %92, %cst_97 [1] : vector<8x32xf32> to vector<8xf32>
    %120 = vector.shape_cast %119 : vector<8xf32> to vector<8x1xf32>
    %cst_98 = arith.constant 3.200000e+01 : f32
    %121 = vector.broadcast %cst_98 : f32 to vector<8x1xf32>
    %122 = arith.divf %120, %121 : vector<8x1xf32>
    %123 = vector.broadcast %122 : vector<8x1xf32> to vector<8x32xf32>
    %124 = arith.subf %92, %123 : vector<8x32xf32>
    %125 = arith.mulf %124, %124 : vector<8x32xf32>
    %cst_99 = arith.constant dense<0.000000e+00> : vector<8xf32>
    %126 = vector.multi_reduction <add>, %125, %cst_99 [1] : vector<8x32xf32> to vector<8xf32>
    %127 = vector.shape_cast %126 : vector<8xf32> to vector<8x1xf32>
    %cst_100 = arith.constant 3.200000e+01 : f32
    %128 = vector.broadcast %cst_100 : f32 to vector<8x1xf32>
    %129 = arith.divf %127, %128 : vector<8x1xf32>
    %cst_101 = arith.constant 9.99999974E-6 : f32
    %130 = vector.broadcast %cst_101 : f32 to vector<8x1xf32>
    %131 = arith.addf %129, %130 : vector<8x1xf32>
    %132 = math.rsqrt %131 : vector<8x1xf32>
    %133 = vector.broadcast %132 : vector<8x1xf32> to vector<8x32xf32>
    %134 = arith.mulf %124, %133 : vector<8x32xf32>
    %135 = vector.broadcast %100 : vector<1x32xf32> to vector<8x32xf32>
    %136 = arith.mulf %134, %135 : vector<8x32xf32>
    %137 = vector.broadcast %102 : vector<1x32xf32> to vector<8x32xf32>
    %138 = arith.addf %136, %137 : vector<8x32xf32>
    %139 = arith.truncf %138 : vector<8x32xf32> to vector<8x32xbf16>
    %140 = vector.shape_cast %139 : vector<8x32xbf16> to vector<1x8x32xbf16>
    %141 = vector.shape_cast %140 : vector<1x8x32xbf16> to vector<1x8x32xbf16>
    %142 = vector.broadcast %141 : vector<1x8x32xbf16> to vector<4x8x32xbf16>
    %143 = arith.truncf %5 : vector<8x32xf32> to vector<8x32xbf16>
    %144 = vector.shape_cast %143 : vector<8x32xbf16> to vector<1x8x32xbf16>
    %145 = vector.shape_cast %144 : vector<1x8x32xbf16> to vector<1x8x32xbf16>
    %146 = vector.broadcast %145 : vector<1x8x32xbf16> to vector<4x8x32xbf16>
    %cst_102 = arith.constant dense<0.000000e+00> : vector<4x8x8xf32>
    %147 = tpu.matmul %142, %104, %cst_102 {dimension_numbers = #tpu.dot_dimension_numbers<[2], [1], [1], [2], [0, 0, 0, 1, 1, 2], [0], [0]>} : vector<4x8x32xbf16>, vector<4x32x8xbf16>, vector<4x8x8xf32> -> vector<4x8x8xf32>
    %148 = vector.broadcast %106 : vector<4x1x8xf32> to vector<4x8x8xf32>
    %149 = arith.addf %147, %148 : vector<4x8x8xf32>
    %cst_103 = arith.constant dense<0.000000e+00> : vector<4x8x8xf32>
    %150 = tpu.matmul %146, %108, %cst_103 {dimension_numbers = #tpu.dot_dimension_numbers<[2], [1], [1], [2], [0, 0, 0, 1, 1, 2], [0], [0]>} : vector<4x8x32xbf16>, vector<4x32x8xbf16>, vector<4x8x8xf32> -> vector<4x8x8xf32>
    %151 = vector.broadcast %110 : vector<4x1x8xf32> to vector<4x8x8xf32>
    %152 = arith.addf %150, %151 : vector<4x8x8xf32>
    %cst_104 = arith.constant dense<0.000000e+00> : vector<4x8x8xf32>
    %153 = tpu.matmul %146, %112, %cst_104 {dimension_numbers = #tpu.dot_dimension_numbers<[2], [1], [1], [2], [0, 0, 0, 1, 1, 2], [0], [0]>} : vector<4x8x32xbf16>, vector<4x32x8xbf16>, vector<4x8x8xf32> -> vector<4x8x8xf32>
    %154 = vector.broadcast %114 : vector<4x1x8xf32> to vector<4x8x8xf32>
    %155 = arith.addf %153, %154 : vector<4x8x8xf32>
    %156 = arith.truncf %149 : vector<4x8x8xf32> to vector<4x8x8xbf16>
    %157 = arith.truncf %152 : vector<4x8x8xf32> to vector<4x8x8xbf16>
    %cst_105 = arith.constant dense<0.000000e+00> : vector<4x8x8xf32>
    %158 = tpu.matmul %156, %157, %cst_105 {dimension_numbers = #tpu.dot_dimension_numbers<[2], [2], [1], [1], [0, 0, 0, 1, 1, 1], [0], [0]>} : vector<4x8x8xbf16>, vector<4x8x8xbf16>, vector<4x8x8xf32> -> vector<4x8x8xf32>
    %cst_106 = arith.constant 0.353553385 : f32
    %159 = vector.broadcast %cst_106 : f32 to vector<4x8x8xf32>
    %160 = arith.mulf %158, %159 : vector<4x8x8xf32>
    %161 = vector.shape_cast %98 : vector<8x8xf32> to vector<1x8x8xf32>
    %162 = vector.broadcast %161 : vector<1x8x8xf32> to vector<4x8x8xf32>
    %163 = arith.addf %160, %162 : vector<4x8x8xf32>
    %cst_107 = arith.constant dense<0xFF800000> : vector<4x8xf32>
    %164 = vector.multi_reduction <maximumf>, %163, %cst_107 [2] : vector<4x8x8xf32> to vector<4x8xf32>
    %165 = vector.shape_cast %164 : vector<4x8xf32> to vector<4x8x1xf32>
    %166 = vector.broadcast %165 : vector<4x8x1xf32> to vector<4x8x8xf32>
    %167 = arith.subf %163, %166 : vector<4x8x8xf32>
    %168 = math.exp %167 : vector<4x8x8xf32>
    %cst_108 = arith.constant dense<0.000000e+00> : vector<4x8xf32>
    %169 = vector.multi_reduction <add>, %168, %cst_108 [2] : vector<4x8x8xf32> to vector<4x8xf32>
    %170 = vector.shape_cast %169 : vector<4x8xf32> to vector<4x8x1xf32>
    %171 = vector.broadcast %170 : vector<4x8x1xf32> to vector<4x8x8xf32>
    %172 = arith.divf %168, %171 : vector<4x8x8xf32>
    %173 = arith.truncf %172 : vector<4x8x8xf32> to vector<4x8x8xbf16>
    %174 = arith.truncf %155 : vector<4x8x8xf32> to vector<4x8x8xbf16>
    %cst_109 = arith.constant dense<0.000000e+00> : vector<4x8x8xf32>
    %175 = tpu.matmul %173, %174, %cst_109 {dimension_numbers = #tpu.dot_dimension_numbers<[2], [1], [1], [2], [0, 0, 0, 1, 1, 2], [0], [0]>} : vector<4x8x8xbf16>, vector<4x8x8xbf16>, vector<4x8x8xf32> -> vector<4x8x8xf32>
    %176 = arith.truncf %175 : vector<4x8x8xf32> to vector<4x8x8xbf16>
    %cst_110 = arith.constant dense<0.000000e+00> : vector<4x8x32xf32>
    %177 = tpu.matmul %176, %116, %cst_110 {dimension_numbers = #tpu.dot_dimension_numbers<[2], [1], [1], [2], [0, 0, 0, 1, 1, 2], [0], [0]>} : vector<4x8x8xbf16>, vector<4x8x32xbf16>, vector<4x8x32xf32> -> vector<4x8x32xf32>
    %cst_111 = arith.constant dense<0.000000e+00> : vector<8x32xf32>
    %178 = vector.multi_reduction <add>, %177, %cst_111 [0] : vector<4x8x32xf32> to vector<8x32xf32>
    %179 = arith.addf %92, %178 : vector<8x32xf32>
    %180 = vector.broadcast %118 : vector<1x32xf32> to vector<8x32xf32>
    %181 = arith.addf %179, %180 : vector<8x32xf32>
    %c0_112 = arith.constant 0 : index
    %c0_113 = arith.constant 0 : index
    %c0_114 = arith.constant 0 : index
    %182 = vector.load %arg28[%c0_112, %c0_113, %c0_114] : memref<1x1x32xf32, #tpu.memory_space<vmem>>, vector<1x1x32xf32>
    %183 = vector.shape_cast %182 : vector<1x1x32xf32> to vector<1x32xf32>
    %c0_115 = arith.constant 0 : index
    %c0_116 = arith.constant 0 : index
    %c0_117 = arith.constant 0 : index
    %184 = vector.load %arg29[%c0_115, %c0_116, %c0_117] : memref<1x1x32xf32, #tpu.memory_space<vmem>>, vector<1x1x32xf32>
    %185 = vector.shape_cast %184 : vector<1x1x32xf32> to vector<1x32xf32>
    %c0_118 = arith.constant 0 : index
    %c0_119 = arith.constant 0 : index
    %c0_120 = arith.constant 0 : index
    %186 = vector.load %arg30[%c0_118, %c0_119, %c0_120] : memref<1x32x128xbf16, #tpu.memory_space<vmem>>, vector<1x32x128xbf16>
    %187 = vector.shape_cast %186 : vector<1x32x128xbf16> to vector<32x128xbf16>
    %c0_121 = arith.constant 0 : index
    %c0_122 = arith.constant 0 : index
    %c0_123 = arith.constant 0 : index
    %188 = vector.load %arg31[%c0_121, %c0_122, %c0_123] : memref<1x1x128xf32, #tpu.memory_space<vmem>>, vector<1x1x128xf32>
    %189 = vector.shape_cast %188 : vector<1x1x128xf32> to vector<1x128xf32>
    %c0_124 = arith.constant 0 : index
    %c0_125 = arith.constant 0 : index
    %c0_126 = arith.constant 0 : index
    %190 = vector.load %arg32[%c0_124, %c0_125, %c0_126] : memref<1x128x32xbf16, #tpu.memory_space<vmem>>, vector<1x128x32xbf16>
    %191 = vector.shape_cast %190 : vector<1x128x32xbf16> to vector<128x32xbf16>
    %c0_127 = arith.constant 0 : index
    %c0_128 = arith.constant 0 : index
    %c0_129 = arith.constant 0 : index
    %192 = vector.load %arg33[%c0_127, %c0_128, %c0_129] : memref<1x1x32xf32, #tpu.memory_space<vmem>>, vector<1x1x32xf32>
    %193 = vector.shape_cast %192 : vector<1x1x32xf32> to vector<1x32xf32>
    %cst_130 = arith.constant dense<0.000000e+00> : vector<8xf32>
    %194 = vector.multi_reduction <add>, %181, %cst_130 [1] : vector<8x32xf32> to vector<8xf32>
    %195 = vector.shape_cast %194 : vector<8xf32> to vector<8x1xf32>
    %cst_131 = arith.constant 3.200000e+01 : f32
    %196 = vector.broadcast %cst_131 : f32 to vector<8x1xf32>
    %197 = arith.divf %195, %196 : vector<8x1xf32>
    %198 = vector.broadcast %197 : vector<8x1xf32> to vector<8x32xf32>
    %199 = arith.subf %181, %198 : vector<8x32xf32>
    %200 = arith.mulf %199, %199 : vector<8x32xf32>
    %cst_132 = arith.constant dense<0.000000e+00> : vector<8xf32>
    %201 = vector.multi_reduction <add>, %200, %cst_132 [1] : vector<8x32xf32> to vector<8xf32>
    %202 = vector.shape_cast %201 : vector<8xf32> to vector<8x1xf32>
    %cst_133 = arith.constant 3.200000e+01 : f32
    %203 = vector.broadcast %cst_133 : f32 to vector<8x1xf32>
    %204 = arith.divf %202, %203 : vector<8x1xf32>
    %cst_134 = arith.constant 9.99999974E-6 : f32
    %205 = vector.broadcast %cst_134 : f32 to vector<8x1xf32>
    %206 = arith.addf %204, %205 : vector<8x1xf32>
    %207 = math.rsqrt %206 : vector<8x1xf32>
    %208 = vector.broadcast %207 : vector<8x1xf32> to vector<8x32xf32>
    %209 = arith.mulf %199, %208 : vector<8x32xf32>
    %210 = vector.broadcast %183 : vector<1x32xf32> to vector<8x32xf32>
    %211 = arith.mulf %209, %210 : vector<8x32xf32>
    %212 = vector.broadcast %185 : vector<1x32xf32> to vector<8x32xf32>
    %213 = arith.addf %211, %212 : vector<8x32xf32>
    %214 = arith.truncf %213 : vector<8x32xf32> to vector<8x32xbf16>
    %cst_135 = arith.constant dense<0.000000e+00> : vector<8x128xf32>
    %215 = tpu.matmul %214, %187, %cst_135 {dimension_numbers = #tpu.dot_dimension_numbers<[1], [0], [0], [1], [0, 0, 1, 1], [], []>} : vector<8x32xbf16>, vector<32x128xbf16>, vector<8x128xf32> -> vector<8x128xf32>
    %216 = vector.broadcast %189 : vector<1x128xf32> to vector<8x128xf32>
    %217 = arith.addf %215, %216 : vector<8x128xf32>
    %cst_136 = arith.constant 0.000000e+00 : f32
    %218 = vector.broadcast %cst_136 : f32 to vector<8x128xf32>
    %219 = arith.maximumf %217, %218 : vector<8x128xf32>
    %220 = arith.truncf %219 : vector<8x128xf32> to vector<8x128xbf16>
    %cst_137 = arith.constant dense<0.000000e+00> : vector<8x32xf32>
    %221 = tpu.matmul %220, %191, %cst_137 {dimension_numbers = #tpu.dot_dimension_numbers<[1], [0], [0], [1], [0, 0, 1, 1], [], []>} : vector<8x128xbf16>, vector<128x32xbf16>, vector<8x32xf32> -> vector<8x32xf32>
    %222 = arith.addf %181, %221 : vector<8x32xf32>
    %223 = vector.broadcast %193 : vector<1x32xf32> to vector<8x32xf32>
    %224 = arith.addf %222, %223 : vector<8x32xf32>
    %c0_138 = arith.constant 0 : index
    %c0_139 = arith.constant 0 : index
    %225 = vector.load %arg42[%c0_138, %c0_139] : memref<8x32xf32, #tpu.memory_space<vmem>>, vector<8x32xf32>
    tpu.vector_store %arg42[%c0_138, %c0_139], %224 {strides = array<i32>} : memref<8x32xf32, #tpu.memory_space<vmem>>, vector<8x32xf32>,
    %c1_i32 = arith.constant 1 : i32
    %226 = arith.cmpi eq, %arg1, %c1_i32 : i32
    %227 = arith.extui %226 : i1 to i32
    %c0_i32_140 = arith.constant 0 : i32
    %228 = arith.cmpi ne, %227, %c0_i32_140 : i32
    scf.if %228 {
      %c0_141 = arith.constant 0 : index
      %c0_142 = arith.constant 0 : index
      %229 = vector.load %arg34[%c0_141, %c0_142] : memref<1x32xf32, #tpu.memory_space<vmem>>, vector<1x32xf32>
      %c0_143 = arith.constant 0 : index
      %c0_144 = arith.constant 0 : index
      %230 = vector.load %arg35[%c0_143, %c0_144] : memref<1x32xf32, #tpu.memory_space<vmem>>, vector<1x32xf32>
      %cst_145 = arith.constant dense<0.000000e+00> : vector<8xf32>
      %231 = vector.multi_reduction <add>, %224, %cst_145 [1] : vector<8x32xf32> to vector<8xf32>
      %232 = vector.shape_cast %231 : vector<8xf32> to vector<8x1xf32>
      %cst_146 = arith.constant 3.200000e+01 : f32
      %233 = vector.broadcast %cst_146 : f32 to vector<8x1xf32>
      %234 = arith.divf %232, %233 : vector<8x1xf32>
      %235 = vector.broadcast %234 : vector<8x1xf32> to vector<8x32xf32>
      %236 = arith.subf %224, %235 : vector<8x32xf32>
      %237 = arith.mulf %236, %236 : vector<8x32xf32>
      %cst_147 = arith.constant dense<0.000000e+00> : vector<8xf32>
      %238 = vector.multi_reduction <add>, %237, %cst_147 [1] : vector<8x32xf32> to vector<8xf32>
      %239 = vector.shape_cast %238 : vector<8xf32> to vector<8x1xf32>
      %cst_148 = arith.constant 3.200000e+01 : f32
      %240 = vector.broadcast %cst_148 : f32 to vector<8x1xf32>
      %241 = arith.divf %239, %240 : vector<8x1xf32>
      %cst_149 = arith.constant 9.99999974E-6 : f32
      %242 = vector.broadcast %cst_149 : f32 to vector<8x1xf32>
      %243 = arith.addf %241, %242 : vector<8x1xf32>
      %244 = math.rsqrt %243 : vector<8x1xf32>
      %245 = vector.broadcast %244 : vector<8x1xf32> to vector<8x32xf32>
      %246 = arith.mulf %236, %245 : vector<8x32xf32>
      %247 = vector.broadcast %229 : vector<1x32xf32> to vector<8x32xf32>
      %248 = arith.mulf %246, %247 : vector<8x32xf32>
      %249 = vector.broadcast %230 : vector<1x32xf32> to vector<8x32xf32>
      %250 = arith.addf %248, %249 : vector<8x32xf32>
      %c0_150 = arith.constant 0 : index
      %c0_151 = arith.constant 0 : index
      %251 = vector.load %arg36[%c0_150, %c0_151] : memref<32x17xbf16, #tpu.memory_space<vmem>>, vector<32x17xbf16>
      %252 = arith.truncf %250 : vector<8x32xf32> to vector<8x32xbf16>
      %cst_152 = arith.constant dense<0.000000e+00> : vector<8x17xf32>
      %253 = tpu.matmul %252, %251, %cst_152 {dimension_numbers = #tpu.dot_dimension_numbers<[1], [0], [0], [1], [0, 0, 1, 1], [], []>} : vector<8x32xbf16>, vector<32x17xbf16>, vector<8x17xf32> -> vector<8x17xf32>
      %c0_153 = arith.constant 0 : index
      %c0_154 = arith.constant 0 : index
      %254 = vector.load %arg37[%c0_153, %c0_154] : memref<1x17xf32, #tpu.memory_space<vmem>>, vector<1x17xf32>
      %255 = vector.broadcast %254 : vector<1x17xf32> to vector<8x17xf32>
      %256 = arith.addf %253, %255 : vector<8x17xf32>
      %c0_155 = arith.constant 0 : index
      %c0_156 = arith.constant 0 : index
      %c0_157 = arith.constant 0 : index
      %257 = vector.load %arg40[%c0_155, %c0_156, %c0_157] : memref<1x8x17xf32, #tpu.memory_space<vmem>>, vector<1x8x17xf32>
      %258 = vector.shape_cast %257 : vector<1x8x17xf32> to vector<8x17xf32>
      %259 = vector.shape_cast %256 : vector<8x17xf32> to vector<1x8x17xf32>
      tpu.vector_store %arg40[%c0_155, %c0_156, %c0_157], %259 {strides = array<i32>} : memref<1x8x17xf32, #tpu.memory_space<vmem>>, vector<1x8x17xf32>,
      %260 = vector.extract_strided_slice %256 {offsets = [0, 0], sizes = [8, 16], strides = [1, 1]} : vector<8x17xf32> to vector<8x16xf32>
      %261 = vector.extract_strided_slice %256 {offsets = [0, 16], sizes = [8, 1], strides = [1, 1]} : vector<8x17xf32> to vector<8x1xf32>
      %c0_158 = arith.constant 0 : index
      %c0_159 = arith.constant 0 : index
      %c0_160 = arith.constant 0 : index
      %262 = vector.load %arg38[%c0_158, %c0_159, %c0_160] : memref<1x8x16xf32, #tpu.memory_space<vmem>>, vector<1x8x16xf32>
      %263 = vector.shape_cast %262 : vector<1x8x16xf32> to vector<8x16xf32>
      %264 = arith.subf %260, %263 : vector<8x16xf32>
      %265 = arith.mulf %264, %264 : vector<8x16xf32>
      %266 = vector.shape_cast %265 : vector<8x16xf32> to vector<1x8x16xf32>
      %cst_161 = arith.constant dense<0.000000e+00> : vector<1xf32>
      %267 = vector.multi_reduction <add>, %266, %cst_161 [1, 2] : vector<1x8x16xf32> to vector<1xf32>
      %268 = vector.shape_cast %267 : vector<1xf32> to vector<1x1x1xf32>
      %269 = vector.extract %268[0, 0, 0] : f32 from vector<1x1x1xf32>
      %270 = vector.broadcast %269 : f32 to vector<1x1xf32>
      %c0_162 = arith.constant 0 : index
      %c0_163 = arith.constant 0 : index
      %c0_164 = arith.constant 0 : index
      %271 = vector.load %arg39[%c0_162, %c0_163, %c0_164] : memref<1x8x1xf32, #tpu.memory_space<vmem>>, vector<1x8x1xf32>
      %272 = vector.shape_cast %271 : vector<1x8x1xf32> to vector<8x1xf32>
      %cst_165 = arith.constant 4.000000e+00 : f32
      %273 = vector.broadcast %cst_165 : f32 to vector<8x1xf32>
      %274 = arith.mulf %273, %272 : vector<8x1xf32>
      %cst_166 = arith.constant 1.000000e+00 : f32
      %275 = vector.broadcast %cst_166 : f32 to vector<8x1xf32>
      %276 = arith.addf %275, %274 : vector<8x1xf32>
      %cst_167 = arith.constant 0.000000e+00 : f32
      %277 = vector.broadcast %cst_167 : f32 to vector<8x1xf32>
      %278 = arith.maximumf %261, %277 : vector<8x1xf32>
      %279 = arith.mulf %261, %272 : vector<8x1xf32>
      %280 = arith.subf %278, %279 : vector<8x1xf32>
      %281 = math.absf %261 : vector<8x1xf32>
      %cst_168 = arith.constant 0.000000e+00 : f32
      %282 = vector.broadcast %cst_168 : f32 to vector<8x1xf32>
      %283 = arith.subf %282, %281 : vector<8x1xf32>
      %284 = math.exp %283 : vector<8x1xf32>
      %cst_169 = arith.constant 1.000000e+00 : f32
      %285 = vector.broadcast %cst_169 : f32 to vector<8x1xf32>
      %286 = arith.addf %285, %284 : vector<8x1xf32>
      %287 = math.log %286 : vector<8x1xf32>
      %288 = arith.addf %280, %287 : vector<8x1xf32>
      %289 = arith.mulf %276, %288 : vector<8x1xf32>
      %290 = vector.shape_cast %289 : vector<8x1xf32> to vector<1x8x1xf32>
      %cst_170 = arith.constant dense<0.000000e+00> : vector<1xf32>
      %291 = vector.multi_reduction <add>, %290, %cst_170 [1, 2] : vector<1x8x1xf32> to vector<1xf32>
      %292 = vector.shape_cast %291 : vector<1xf32> to vector<1x1x1xf32>
      %293 = vector.extract %292[0, 0, 0] : f32 from vector<1x1x1xf32>
      %294 = vector.broadcast %293 : f32 to vector<1x1xf32>
      %295 = tpu.concatenate %270, %294 in 1 : vector<1x1xf32>, vector<1x1xf32> -> vector<1x2xf32>
      %c0_171 = arith.constant 0 : index
      %c0_172 = arith.constant 0 : index
      %c0_173 = arith.constant 0 : index
      %296 = vector.load %arg41[%c0_171, %c0_172, %c0_173] : memref<1x1x2xf32, #tpu.memory_space<vmem>>, vector<1x1x2xf32>
      %297 = vector.shape_cast %296 : vector<1x1x2xf32> to vector<1x2xf32>
      %298 = vector.shape_cast %295 : vector<1x2xf32> to vector<1x1x2xf32>
      tpu.vector_store %arg41[%c0_171, %c0_172, %c0_173], %298 {strides = array<i32>} : memref<1x1x2xf32, #tpu.memory_space<vmem>>, vector<1x1x2xf32>,
    } else {
    }
    return
  }
  func.func @transform_0(%arg0: i32, %arg1: i32, %arg2: memref<2xi32, #tpu.memory_space<smem>>) -> (i32, i32, i32) {
    %c0_i32 = arith.constant 0 : i32
    %c0_i32_0 = arith.constant 0 : i32
    %c0_i32_1 = arith.constant 0 : i32
    return %arg0, %c0_i32, %c0_i32_0 : i32, i32, i32
  }
  func.func @transform_1(%arg0: i32, %arg1: i32, %arg2: memref<2xi32, #tpu.memory_space<smem>>) -> (i32, i32) {
    %c0_i32 = arith.constant 0 : i32
    %c0_i32_0 = arith.constant 0 : i32
    %c0_i32_1 = arith.constant 0 : i32
    return %c0_i32, %c0_i32_0 : i32, i32
  }
  func.func @transform_2(%arg0: i32, %arg1: i32, %arg2: memref<2xi32, #tpu.memory_space<smem>>) -> (i32, i32, i32) {
    %c0_i32 = arith.constant 0 : i32
    %c0_i32_0 = arith.constant 0 : i32
    %c0_i32_1 = arith.constant 0 : i32
    return %arg0, %c0_i32, %c0_i32_0 : i32, i32, i32
  }
  func.func @transform_3(%arg0: i32, %arg1: i32, %arg2: memref<2xi32, #tpu.memory_space<smem>>) -> (i32, i32) {
    %c0_i32 = arith.constant 0 : i32
    %c0_i32_0 = arith.constant 0 : i32
    %c0_i32_1 = arith.constant 0 : i32
    return %c0_i32, %c0_i32_0 : i32, i32
  }
  func.func @transform_4(%arg0: i32, %arg1: i32, %arg2: memref<2xi32, #tpu.memory_space<smem>>) -> (i32, i32) {
    %c0_i32 = arith.constant 0 : i32
    %c0_i32_0 = arith.constant 0 : i32
    %c0_i32_1 = arith.constant 0 : i32
    return %c0_i32, %c0_i32_0 : i32, i32
  }
  func.func @transform_5(%arg0: i32, %arg1: i32, %arg2: memref<2xi32, #tpu.memory_space<smem>>) -> (i32, i32, i32) {
    %c0_i32 = arith.constant 0 : i32
    %c0_i32_0 = arith.constant 0 : i32
    %c0_i32_1 = arith.constant 0 : i32
    return %arg1, %c0_i32, %c0_i32_0 : i32, i32, i32
  }
  func.func @transform_6(%arg0: i32, %arg1: i32, %arg2: memref<2xi32, #tpu.memory_space<smem>>) -> (i32, i32, i32) {
    %c0_i32 = arith.constant 0 : i32
    %c0_i32_0 = arith.constant 0 : i32
    %c0_i32_1 = arith.constant 0 : i32
    return %arg1, %c0_i32, %c0_i32_0 : i32, i32, i32
  }
  func.func @transform_7(%arg0: i32, %arg1: i32, %arg2: memref<2xi32, #tpu.memory_space<smem>>) -> (i32, i32, i32, i32) {
    %c0_i32 = arith.constant 0 : i32
    %c0_i32_0 = arith.constant 0 : i32
    %c0_i32_1 = arith.constant 0 : i32
    %c0_i32_2 = arith.constant 0 : i32
    return %arg1, %c0_i32, %c0_i32_0, %c0_i32_1 : i32, i32, i32, i32
  }
  func.func @transform_8(%arg0: i32, %arg1: i32, %arg2: memref<2xi32, #tpu.memory_space<smem>>) -> (i32, i32, i32, i32) {
    %c0_i32 = arith.constant 0 : i32
    %c0_i32_0 = arith.constant 0 : i32
    %c0_i32_1 = arith.constant 0 : i32
    %c0_i32_2 = arith.constant 0 : i32
    return %arg1, %c0_i32, %c0_i32_0, %c0_i32_1 : i32, i32, i32, i32
  }
  func.func @transform_9(%arg0: i32, %arg1: i32, %arg2: memref<2xi32, #tpu.memory_space<smem>>) -> (i32, i32, i32, i32) {
    %c0_i32 = arith.constant 0 : i32
    %c0_i32_0 = arith.constant 0 : i32
    %c0_i32_1 = arith.constant 0 : i32
    %c0_i32_2 = arith.constant 0 : i32
    return %arg1, %c0_i32, %c0_i32_0, %c0_i32_1 : i32, i32, i32, i32
  }
  func.func @transform_10(%arg0: i32, %arg1: i32, %arg2: memref<2xi32, #tpu.memory_space<smem>>) -> (i32, i32, i32, i32) {
    %c0_i32 = arith.constant 0 : i32
    %c0_i32_0 = arith.constant 0 : i32
    %c0_i32_1 = arith.constant 0 : i32
    %c0_i32_2 = arith.constant 0 : i32
    return %arg1, %c0_i32, %c0_i32_0, %c0_i32_1 : i32, i32, i32, i32
  }
  func.func @transform_11(%arg0: i32, %arg1: i32, %arg2: memref<2xi32, #tpu.memory_space<smem>>) -> (i32, i32, i32, i32) {
    %c0_i32 = arith.constant 0 : i32
    %c0_i32_0 = arith.constant 0 : i32
    %c0_i32_1 = arith.constant 0 : i32
    %c0_i32_2 = arith.constant 0 : i32
    return %arg1, %c0_i32, %c0_i32_0, %c0_i32_1 : i32, i32, i32, i32
  }
  func.func @transform_12(%arg0: i32, %arg1: i32, %arg2: memref<2xi32, #tpu.memory_space<smem>>) -> (i32, i32, i32, i32) {
    %c0_i32 = arith.constant 0 : i32
    %c0_i32_0 = arith.constant 0 : i32
    %c0_i32_1 = arith.constant 0 : i32
    %c0_i32_2 = arith.constant 0 : i32
    return %arg1, %c0_i32, %c0_i32_0, %c0_i32_1 : i32, i32, i32, i32
  }
  func.func @transform_13(%arg0: i32, %arg1: i32, %arg2: memref<2xi32, #tpu.memory_space<smem>>) -> (i32, i32, i32, i32) {
    %c0_i32 = arith.constant 0 : i32
    %c0_i32_0 = arith.constant 0 : i32
    %c0_i32_1 = arith.constant 0 : i32
    %c0_i32_2 = arith.constant 0 : i32
    return %arg1, %c0_i32, %c0_i32_0, %c0_i32_1 : i32, i32, i32, i32
  }
  func.func @transform_14(%arg0: i32, %arg1: i32, %arg2: memref<2xi32, #tpu.memory_space<smem>>) -> (i32, i32, i32) {
    %c0_i32 = arith.constant 0 : i32
    %c0_i32_0 = arith.constant 0 : i32
    %c0_i32_1 = arith.constant 0 : i32
    return %arg1, %c0_i32, %c0_i32_0 : i32, i32, i32
  }
  func.func @transform_15(%arg0: i32, %arg1: i32, %arg2: memref<2xi32, #tpu.memory_space<smem>>) -> (i32, i32, i32) {
    %c0_i32 = arith.constant 0 : i32
    %c0_i32_0 = arith.constant 0 : i32
    %c0_i32_1 = arith.constant 0 : i32
    return %arg1, %c0_i32, %c0_i32_0 : i32, i32, i32
  }
  func.func @transform_16(%arg0: i32, %arg1: i32, %arg2: memref<2xi32, #tpu.memory_space<smem>>) -> (i32, i32, i32) {
    %c0_i32 = arith.constant 0 : i32
    %c0_i32_0 = arith.constant 0 : i32
    %c0_i32_1 = arith.constant 0 : i32
    return %arg1, %c0_i32, %c0_i32_0 : i32, i32, i32
  }
  func.func @transform_17(%arg0: i32, %arg1: i32, %arg2: memref<2xi32, #tpu.memory_space<smem>>) -> (i32, i32, i32, i32) {
    %c0_i32 = arith.constant 0 : i32
    %c0_i32_0 = arith.constant 0 : i32
    %c0_i32_1 = arith.constant 0 : i32
    %c0_i32_2 = arith.constant 0 : i32
    return %arg1, %c0_i32, %c0_i32_0, %c0_i32_1 : i32, i32, i32, i32
  }
  func.func @transform_18(%arg0: i32, %arg1: i32, %arg2: memref<2xi32, #tpu.memory_space<smem>>) -> (i32, i32, i32, i32) {
    %c0_i32 = arith.constant 0 : i32
    %c0_i32_0 = arith.constant 0 : i32
    %c0_i32_1 = arith.constant 0 : i32
    %c0_i32_2 = arith.constant 0 : i32
    return %arg1, %c0_i32, %c0_i32_0, %c0_i32_1 : i32, i32, i32, i32
  }
  func.func @transform_19(%arg0: i32, %arg1: i32, %arg2: memref<2xi32, #tpu.memory_space<smem>>) -> (i32, i32, i32, i32) {
    %c0_i32 = arith.constant 0 : i32
    %c0_i32_0 = arith.constant 0 : i32
    %c0_i32_1 = arith.constant 0 : i32
    %c0_i32_2 = arith.constant 0 : i32
    return %arg1, %c0_i32, %c0_i32_0, %c0_i32_1 : i32, i32, i32, i32
  }
  func.func @transform_20(%arg0: i32, %arg1: i32, %arg2: memref<2xi32, #tpu.memory_space<smem>>) -> (i32, i32, i32, i32) {
    %c0_i32 = arith.constant 0 : i32
    %c0_i32_0 = arith.constant 0 : i32
    %c0_i32_1 = arith.constant 0 : i32
    %c0_i32_2 = arith.constant 0 : i32
    return %arg1, %c0_i32, %c0_i32_0, %c0_i32_1 : i32, i32, i32, i32
  }
  func.func @transform_21(%arg0: i32, %arg1: i32, %arg2: memref<2xi32, #tpu.memory_space<smem>>) -> (i32, i32, i32, i32) {
    %c0_i32 = arith.constant 0 : i32
    %c0_i32_0 = arith.constant 0 : i32
    %c0_i32_1 = arith.constant 0 : i32
    %c0_i32_2 = arith.constant 0 : i32
    return %arg1, %c0_i32, %c0_i32_0, %c0_i32_1 : i32, i32, i32, i32
  }
  func.func @transform_22(%arg0: i32, %arg1: i32, %arg2: memref<2xi32, #tpu.memory_space<smem>>) -> (i32, i32, i32, i32) {
    %c0_i32 = arith.constant 0 : i32
    %c0_i32_0 = arith.constant 0 : i32
    %c0_i32_1 = arith.constant 0 : i32
    %c0_i32_2 = arith.constant 0 : i32
    return %arg1, %c0_i32, %c0_i32_0, %c0_i32_1 : i32, i32, i32, i32
  }
  func.func @transform_23(%arg0: i32, %arg1: i32, %arg2: memref<2xi32, #tpu.memory_space<smem>>) -> (i32, i32, i32, i32) {
    %c0_i32 = arith.constant 0 : i32
    %c0_i32_0 = arith.constant 0 : i32
    %c0_i32_1 = arith.constant 0 : i32
    %c0_i32_2 = arith.constant 0 : i32
    return %arg1, %c0_i32, %c0_i32_0, %c0_i32_1 : i32, i32, i32, i32
  }
  func.func @transform_24(%arg0: i32, %arg1: i32, %arg2: memref<2xi32, #tpu.memory_space<smem>>) -> (i32, i32, i32) {
    %c0_i32 = arith.constant 0 : i32
    %c0_i32_0 = arith.constant 0 : i32
    %c0_i32_1 = arith.constant 0 : i32
    return %arg1, %c0_i32, %c0_i32_0 : i32, i32, i32
  }
  func.func @transform_25(%arg0: i32, %arg1: i32, %arg2: memref<2xi32, #tpu.memory_space<smem>>) -> (i32, i32, i32) {
    %c0_i32 = arith.constant 0 : i32
    %c0_i32_0 = arith.constant 0 : i32
    %c0_i32_1 = arith.constant 0 : i32
    return %arg1, %c0_i32, %c0_i32_0 : i32, i32, i32
  }
  func.func @transform_26(%arg0: i32, %arg1: i32, %arg2: memref<2xi32, #tpu.memory_space<smem>>) -> (i32, i32, i32) {
    %c0_i32 = arith.constant 0 : i32
    %c0_i32_0 = arith.constant 0 : i32
    %c0_i32_1 = arith.constant 0 : i32
    return %arg1, %c0_i32, %c0_i32_0 : i32, i32, i32
  }
  func.func @transform_27(%arg0: i32, %arg1: i32, %arg2: memref<2xi32, #tpu.memory_space<smem>>) -> (i32, i32, i32) {
    %c0_i32 = arith.constant 0 : i32
    %c0_i32_0 = arith.constant 0 : i32
    %c0_i32_1 = arith.constant 0 : i32
    return %arg1, %c0_i32, %c0_i32_0 : i32, i32, i32
  }
  func.func @transform_28(%arg0: i32, %arg1: i32, %arg2: memref<2xi32, #tpu.memory_space<smem>>) -> (i32, i32, i32) {
    %c0_i32 = arith.constant 0 : i32
    %c0_i32_0 = arith.constant 0 : i32
    %c0_i32_1 = arith.constant 0 : i32
    return %arg1, %c0_i32, %c0_i32_0 : i32, i32, i32
  }
  func.func @transform_29(%arg0: i32, %arg1: i32, %arg2: memref<2xi32, #tpu.memory_space<smem>>) -> (i32, i32, i32) {
    %c0_i32 = arith.constant 0 : i32
    %c0_i32_0 = arith.constant 0 : i32
    %c0_i32_1 = arith.constant 0 : i32
    return %arg1, %c0_i32, %c0_i32_0 : i32, i32, i32
  }
  func.func @transform_30(%arg0: i32, %arg1: i32, %arg2: memref<2xi32, #tpu.memory_space<smem>>) -> (i32, i32, i32) {
    %c0_i32 = arith.constant 0 : i32
    %c0_i32_0 = arith.constant 0 : i32
    %c0_i32_1 = arith.constant 0 : i32
    return %arg1, %c0_i32, %c0_i32_0 : i32, i32, i32
  }
  func.func @transform_31(%arg0: i32, %arg1: i32, %arg2: memref<2xi32, #tpu.memory_space<smem>>) -> (i32, i32) {
    %c0_i32 = arith.constant 0 : i32
    %c0_i32_0 = arith.constant 0 : i32
    %c0_i32_1 = arith.constant 0 : i32
    return %c0_i32, %c0_i32_0 : i32, i32
  }
  func.func @transform_32(%arg0: i32, %arg1: i32, %arg2: memref<2xi32, #tpu.memory_space<smem>>) -> (i32, i32) {
    %c0_i32 = arith.constant 0 : i32
    %c0_i32_0 = arith.constant 0 : i32
    %c0_i32_1 = arith.constant 0 : i32
    return %c0_i32, %c0_i32_0 : i32, i32
  }
  func.func @transform_33(%arg0: i32, %arg1: i32, %arg2: memref<2xi32, #tpu.memory_space<smem>>) -> (i32, i32) {
    %c0_i32 = arith.constant 0 : i32
    %c0_i32_0 = arith.constant 0 : i32
    %c0_i32_1 = arith.constant 0 : i32
    return %c0_i32, %c0_i32_0 : i32, i32
  }
  func.func @transform_34(%arg0: i32, %arg1: i32, %arg2: memref<2xi32, #tpu.memory_space<smem>>) -> (i32, i32) {
    %c0_i32 = arith.constant 0 : i32
    %c0_i32_0 = arith.constant 0 : i32
    %c0_i32_1 = arith.constant 0 : i32
    return %c0_i32, %c0_i32_0 : i32, i32
  }
  func.func @transform_35(%arg0: i32, %arg1: i32, %arg2: memref<2xi32, #tpu.memory_space<smem>>) -> (i32, i32, i32) {
    %c0_i32 = arith.constant 0 : i32
    %c0_i32_0 = arith.constant 0 : i32
    %c0_i32_1 = arith.constant 0 : i32
    return %arg0, %c0_i32, %c0_i32_0 : i32, i32, i32
  }
  func.func @transform_36(%arg0: i32, %arg1: i32, %arg2: memref<2xi32, #tpu.memory_space<smem>>) -> (i32, i32, i32) {
    %c0_i32 = arith.constant 0 : i32
    %c0_i32_0 = arith.constant 0 : i32
    %c0_i32_1 = arith.constant 0 : i32
    return %arg0, %c0_i32, %c0_i32_0 : i32, i32, i32
  }
  func.func @transform_37(%arg0: i32, %arg1: i32, %arg2: memref<2xi32, #tpu.memory_space<smem>>) -> (i32, i32, i32) {
    %c0_i32 = arith.constant 0 : i32
    %c0_i32_0 = arith.constant 0 : i32
    %c0_i32_1 = arith.constant 0 : i32
    return %arg0, %c0_i32, %c0_i32_0 : i32, i32, i32
  }
  func.func @transform_38(%arg0: i32, %arg1: i32, %arg2: memref<2xi32, #tpu.memory_space<smem>>) -> (i32, i32, i32) {
    %c0_i32 = arith.constant 0 : i32
    %c0_i32_0 = arith.constant 0 : i32
    %c0_i32_1 = arith.constant 0 : i32
    return %arg0, %c0_i32, %c0_i32_0 : i32, i32, i32
  }
}

</mosaic_0001>

<bundles_post_ra>
// kernel: transformer_forward.2
= control target key start
LH: loop header
LB: loop body
LE: loop exit
PB: predicated region body
PF: predicated region fallthrough
CT: control target
= control target key end

     0   :  { %s2539_s27 = smov [#allocation4]   ;;  %s2970_s0 = inlined_call_operand.vmem [shape: s32[2], index: 0, kind: input, shape index: {}]   ;;  %s2971_s1 = inlined_call_operand.vmem [shape: f32[2,8,32], index: 1, kind: input, shape index: {}]   ;;  %s2972_s2 = inlined_call_operand.vmem [shape: f32[8,32], index: 2, kind: input, shape index: {}]   ;;  %s2973_s3 = inlined_call_operand.vmem [shape: f32[2,1,32], index: 3, kind: input, shape index: {}]   ;;  %s2974_s4 = inlined_call_operand.vmem [shape: f32[2,1,32], index: 4, kind: input, shape index: {}]   ;;  %s2975_s5 = inlined_call_operand.vmem [shape: bf16[2,4,32,8], index: 5, kind: input, shape index: {}]   ;;  %s2976_s6 = inlined_call_operand.vmem [shape: f32[2,4,1,8], index: 6, kind: input, shape index: {}]   ;;  %s2977_s7 = inlined_call_operand.vmem [shape: bf16[2,4,32,8], index: 7, kind: input, shape index: {}]   ;;  %s2978_s8 = inlined_call_operand.vmem [shape: f32[2,4,1,8], index: 8, kind: input, shape index: {}]   ;;  %s2979_s9 = inlined_call_operand.vmem [shape: bf16[2,4,32,8], index: 9, kind: input, shape index: {}]   ;;  %s2980_s10 = inlined_call_operand.vmem [shape: f32[2,4,1,8], index: 10, kind: input, shape index: {}]   ;;  %s2981_s11 = inlined_call_operand.vmem [shape: bf16[2,4,8,32], index: 11, kind: input, shape index: {}]   ;;  %s2982_s12 = inlined_call_operand.vmem [shape: f32[2,1,32], index: 12, kind: input, shape index: {}]   ;;  %s2983_s13 = inlined_call_operand.vmem [shape: f32[2,1,32], index: 13, kind: input, shape index: {}]   ;;  %s2984_s14 = inlined_call_operand.vmem [shape: f32[2,1,32], index: 14, kind: input, shape index: {}]   ;;  %s2985_s15 = inlined_call_operand.vmem [shape: bf16[2,32,128], index: 15, kind: input, shape index: {}]   ;;  %s2986_s16 = inlined_call_operand.vmem [shape: f32[2,1,128], index: 16, kind: input, shape index: {}]   ;;  %s2987_s17 = inlined_call_operand.vmem [shape: bf16[2,128,32], index: 17, kind: input, shape index: {}]   ;;  %s2988_s18 = inlined_call_operand.vmem [shape: f32[2,1,32], index: 18, kind: input, shape index: {}]   ;;  %s2989_s19 = inlined_call_operand.vmem [shape: f32[1,32], index: 19, kind: input, shape index: {}]   ;;  %s2990_s20 = inlined_call_operand.vmem [shape: f32[1,32], index: 20, kind: input, shape index: {}]   ;;  %s2991_s21 = inlined_call_operand.vmem [shape: f32[2,8,32], index: 21, kind: output, shape index: {}]  }
   0x1   :  { %3000 = sst [smem:[#allocation16_spill]] %s2970_s0 }
   0x2   :  { %3001 = sst [smem:[#allocation17_spill]] %s2971_s1 }
   0x3   :  { %3002 = sst [smem:[#allocation18_spill]] %s2972_s2 }
   0x4   :  { %3003 = sst [smem:[#allocation19_spill]] %s2973_s3 }
   0x5   :  { %3004 = sst [smem:[#allocation20_spill]] %s2974_s4 }
   0x6   :  { %3005 = sst [smem:[#allocation21_spill]] %s2975_s5 }
   0x7   :  { %3006 = sst [smem:[#allocation22_spill]] %s2976_s6 }
   0x8   :  { %3007 = sst [smem:[#allocation23_spill]] %s2977_s7 }
   0x9   :  { %3008 = sst [smem:[#allocation24_spill]] %s2978_s8 }
   0xa   :  { %3009 = sst [smem:[#allocation25_spill]] %s2979_s9 }
   0xb   :  { %3010 = sst [smem:[#allocation26_spill]] %s2980_s10 }
   0xc   :  { %3011 = sst [smem:[#allocation27_spill]] %s2981_s11 }
   0xd   :  { %3012 = sst [smem:[#allocation28_spill]] %s2984_s14 }
   0xe   :  { %3013 = sst [smem:[#allocation29_spill]] %s2985_s15 }
   0xf   :  { %3014 = sst [smem:[#allocation30_spill]] %s2988_s18 }
  0x10   :  { %3015 = sst [smem:[#allocation31_spill]] %s2989_s19 }
  0x11   :  { %3016 = sst [smem:[#allocation32_spill]] %s2990_s20 }
  0x12   :  { %3017 = sst [smem:[#allocation33_spill]] %s2991_s21 }
  0x13   :  { %s3018_s26 = sld [smem:[#allocation16_spill]] }
  0x19   :  { %s27_s15 = sshll.u32 %s3018_s26, 4  ;;  %s28_s15 = int_to_ptr.vmem [resolvable:$true] %s27_s15 }
  0x1a   :  { %30 = dma.vmem_to_smem %s28_s15, 16, %s2539_s27, [#allocation3] }
  0x1b   :  { %2517 = dma.done.wait [#allocation3], 16 }
  0x1c   :  { %2518 = vsyncadd [#allocation3], 4294967280 }
  0x1d   :  { %33 = sfence }
  0x1e   :  { %s2655_s3 = smov 0   ;;  %s2657_s28 = smov 0  }
  0x1f   :  { %s2659_s29 = smov 0   ;;  %s2661_s0 = smov 0  }
  0x20   :  { %s2663_s4 = smov 0  }
  0x21 LB: > { %3019 = sst [smem:[#allocation6_spill]] %s2521_s3  ;;  %s48_s15 = sadd.s32 1, %s2529_s29  ;;  %s2537_s4 = sphi %s2663_s4, %s39_s4   ;;  %s2533_s0 = sphi %s2661_s0, %s3065_s0   ;;  %s2529_s29 = sphi %s2659_s29, %s3064_s29   ;;  %s2525_s28 = sphi %s2657_s28, %s3063_s28   ;;  %s2521_s3 = sphi %s2655_s3, %s3062_s3  }
  0x22   : > { %3020 = sst [smem:[#allocation7_spill]] %s2525_s28  ;;  %s51_s30 = sadd.s32 1, %s2533_s0 }
  0x23   : > { %3021 = sst [smem:[#allocation8_spill]] %s2529_s29  ;;  %p49_p0 = scmp.ge.s32.totalorder %s48_s15, 2 }
  0x24   : > { %3022 = sst [smem:[#allocation9_spill]] %s2533_s0  ;;  %p2174_p1 = scmp.ge.s32.totalorder %s2537_s4, 1 }
  0x25   : > { %3023 = sst [smem:[#allocation10_spill]] %s2537_s4  ;;  %p725_p2 = scmp.lt.s32.totalorder %s2537_s4, 5 }
  0x26   : > { %s3067_s15 = smov (%p49_p0, %s48_s15), 0  ;;  %s3069_s30 = smov (!%p49_p0, %s51_s30), %s2533_s0 }
  0x27   : > { %3024 = sst [smem:[#allocation11_spill]] %s3067_s15  ;;  %p726_p3 = pnand %p2174_p1, %p725_p2 }
  0x28   : > { %p53_p4 = scmp.ge.s32.totalorder %s3069_s30, 2 }
  0x29   : > { %729 = sbr.rel (%p726_p3) target bundleno = 2027 (0x7eb), region = 100 }
  0x2a   : > { %s3071_s30 = smov (%p53_p4, %s3069_s30), 0 }
  0x2b   : > { %3025 = sst [smem:[#allocation12_spill]] %s3071_s30 }
  0x2e   : > { %p844_p5 = scmp.lt.s32.totalorder %s2525_s28, 1  ;;  %p848_p6 = scmp.lt.s32.totalorder %s2521_s3, 1 }
  0x2f   : > { %s3026_s2 = sld [smem:[#allocation17_spill]] }
  0x30   : > { %s845_s5 = scalar_select %p844_p5, %s2525_s28, 1 }
  0x31   : > { %s2693_s22 = scalar_select %p848_p6, %s2521_s3, 1 }
  0x32   : > { %s2175_s23 = sshll.u32 %s845_s5, 3  ;;  %s3029_s21 = sld [smem:[#allocation21_spill]] }
  0x33   : > { %s2357_s19 = sshll.u32 %s2693_s22, 6  ;;  %s2178_s18 = sshll.u32 %s2693_s22, 2 }
  0x34   : > { %s3030_s6 = sld [smem:[#allocation22_spill]]  ;;  %s2360_s24 = sshll.u32 %s2693_s22, 4 }
  0x35   : > { %s847_s25 = scalar_lea.vmem %s3026_s2, %s2175_s23  ;;  %s3032_s7 = sld [smem:[#allocation23_spill]] }
  0x36   : > { %s3033_s8 = sld [smem:[#allocation24_spill]]  ;;  %s2768_s29 = scalar_lea.vmem %s2987_s17, %s2357_s19 }
  0x37   : > { %s3034_s9 = sld [smem:[#allocation25_spill]] }
  0x38   : > { %s2710_s5 = scalar_lea.vmem %s3029_s21, %s2357_s19  ;;  %s3035_s10 = sld [smem:[#allocation26_spill]] }
  0x39   : > { %s3037_s11 = sld [smem:[#allocation27_spill]] }
  0x3a   : > { %s2716_s2 = scalar_lea.vmem %s3030_s6, %s2178_s18  ;;  %s3041_s3 = sld [smem:[#allocation30_spill]] }
  0x3b   : > { %3031 = sst [smem:[#allocation13_spill]] %s2716_s2  ;;  %s2721_s27 = scalar_lea.vmem %s3032_s7, %s2357_s19 }
  0x3c   : > { %s2726_s4 = scalar_lea.vmem %s3033_s8, %s2178_s18  ;;  %s3042_s20 = sld [smem:[#allocation33_spill]] }
  0x3d   : > { %s2731_s21 = scalar_lea.vmem %s3034_s9, %s2357_s19 }
  0x3e   : > { %s2736_s1 = scalar_lea.vmem %s3035_s10, %s2178_s18  ;;  %s3040_s10 = sld [smem:[#allocation29_spill]] }
  0x3f   : > { %3036 = sst [smem:[#allocation14_spill]] %s2736_s1  ;;  %s2742_s30 = scalar_lea.vmem %s3037_s11, %s2360_s24 }
  0x40   : > { %3038 = sst [smem:[#allocation15_spill]] %s2742_s30  ;;  %s902_s11 = scalar_lea.vmem %s2986_s16, %s2693_s22 }
  0x41   : > { %s910_s0 = scalar_lea.vmem %s3041_s3, %s2693_s22 }
  0x42   : > { %s2777_s14 = scalar_lea.vmem %s3042_s20, %s2175_s23 }
  0x44   : > { %s2759_s1 = scalar_lea.vmem %s3040_s10, %s2360_s24  ;;  %s3043_s10 = sld [smem:[#allocation6_spill]] }
  0x4a   : > { %p2192_p7 = scmp.ne.s32.totalorder %s3043_s10, 0 }
  0x4b   : > { %s3044_s15 = sld [smem:[#allocation18_spill]] (!%p2192_p7) }
  0x4c   : > { %919 = sbr.rel (%p2192_p7) target bundleno = 86 (0x56), region = 104 }
  0x51   : > { %v920_v0 = vld [vmem:[%s847_s25] sm:$0xff]  ;;  %vm923_vm0 = vcmask 261120  }
  0x52   : > { %v921_v1 = vld [vmem:[%s3044_s15] sm:$0xff] }
  0x53   : > { %v922_v2 = vadd.f32 %v921_v1, %v920_v0 }
  0x55   : > { %924 = vst.msk [vmem:[#allocation2] sm:$0xff] %vm923_vm0, %v922_v2 }
  0x56 PF: > { %vm999_vm1 = vcmask 261120   ;;  %v2540_v5 = vmov 32.0   ;;  %v2364_v17 = vld [vmem:[%s2710_s5 + $0x8] sm:$0xff]  ;;  %v2366_v18 = vld [vmem:[%s2710_s5 + $0x18] sm:$0xff]  ;;  %v2363_v21 = vld [vmem:[%s2710_s5] sm:$0xff]  ;;  %s3045_s25 = sld [smem:[#allocation19_spill]]  ;;  %s3053_s9 = scalar_lea.vmem %s2982_s12, %s2693_s22 }
  0x57   : > { %2459 = vrcp.f32 %v2540_v5  ;;  %v2370_v19 = vld [vmem:[%s2710_s5 + $0x38] sm:$0xff]  ;;  %1071 = vmatpush.bf16.msra.mxu0 %v2364_v17  ;;  %1096 = vmatpush.bf16.msra.mxu2 %v2366_v18  ;;  %v2365_v22 = vld [vmem:[%s2710_s5 + $0x10] sm:$0xff]  ;;  %v2368_v26 = vld [vmem:[%s2710_s5 + $0x28] sm:$0xff]  ;;  %s3047_s20 = sld [smem:[#allocation20_spill]]  ;;  %vm1385_vm6 = vcmask 64512   ;;  %vm1577_vm7 = vcmask 1043456   ;;  %s3054_s10 = scalar_lea.vmem %s2983_s13, %s2693_s22 }
  0x58   : > { %v2374_v20 = vld [vmem:[%s2721_s27 + $0x18] sm:$0xff]  ;;  %1146 = vmatpush.bf16.msra.mxu3 %v2370_v19  ;;  %v2369_v23 = vld [vmem:[%s2710_s5 + $0x30] sm:$0xff]  ;;  %v2372_v27 = vld [vmem:[%s2721_s27 + $0x8] sm:$0xff]  ;;  %s3049_s26 = sld [smem:[#allocation13_spill]] }
  0x59   : > { %1208 = vmatpush.bf16.msra.mxu1 %v2374_v20  ;;  %v2373_v24 = vld [vmem:[%s2721_s27 + $0x10] sm:$0xff]  ;;  %v2378_v28 = vld [vmem:[%s2721_s27 + $0x38] sm:$0xff]  ;;  %v2367_v31 = vld [vmem:[%s2710_s5 + $0x20] sm:$0xff]  ;;  %s3052_s7 = sld [smem:[#allocation15_spill]] }
  0x5a   : > { %v2382_v30 = vld [vmem:[%s2731_s21 + $0x18] sm:$0xff]  ;;  %v2371_v32 = vld [vmem:[%s2721_s27] sm:$0xff]  ;;  %v2377_v34 = vld [vmem:[%s2721_s27 + $0x30] sm:$0xff]  ;;  %s3055_s15 = sld [smem:[#allocation28_spill]] }
  0x5b   : > { %1072 = vmatpush.bf16.msra.mxu0 %v2363_v21  ;;  %1097 = vmatpush.bf16.msra.mxu2 %v2365_v22  ;;  %v2381_v35 = vld [vmem:[%s2731_s21 + $0x10] sm:$0xff]  ;;  %v2376_v49 = vld [vmem:[%s2721_s27 + $0x28] sm:$0xff]  ;;  %v2386_v51 = vld [vmem:[%s2731_s21 + $0x38] sm:$0xff] }
  0x5c   : > { %v2783_v3 = vld [vmem:[#allocation2] sm:$0xff]  ;;  %1147 = vmatpush.bf16.msra.mxu3 %v2369_v23  ;;  %s3046_s5 = scalar_lea.vmem %s3045_s25, %s2693_s22  ;;  %v2380_v50 = vld [vmem:[%s2731_s21 + $0x8] sm:$0xff]  ;;  %v2385_v54 = vld [vmem:[%s2731_s21 + $0x30] sm:$0xff] }
  0x5d   : > { %v1000_v4 = vsel %vm999_vm1, %v2783_v3, 0.0  ;;  %v2460_v6 = vpop.eup %2459  ;;  %1209 = vmatpush.bf16.msra.mxu1 %v2373_v24  ;;  %v2440_v42 = vld [vmem:[%s3046_s5] ss:$0 sm:$0xff]  ;;  %s3048_s6 = scalar_lea.vmem %s3047_s20, %s2693_s22  ;;  %v2384_v55 = vld [vmem:[%s2731_s21 + $0x28] sm:$0xff]  ;;  %v2443_v57 = vld [vmem:[%s2726_s4 + $0x1] ss:$0 sm:$0xff] }
  0x5e   : > { %1001 = vadd.xlane.f32.xlu0 %v1000_v4  ;;  %v1004_v7 = vmul.f32 32.0, %v2460_v6  ;;  %vm1008_vm2 = vweird.f32 %v2460_v6  ;;  %v2441_v44 = vld [vmem:[%s3048_s6] ss:$0 sm:$0xff]  ;;  %v2444_v62 = vld [vmem:[%s3049_s26 + $0x1] ss:$0 sm:$0xff] }
  0x5f   : > { %1121 = vmatpush.bf16.msrb.mxu2 %v2368_v26  ;;  %1183 = vmatpush.bf16.msrb.mxu0 %v2372_v27  ;;  %v2375_v52 = vld [vmem:[%s2721_s27 + $0x20] sm:$0xff]  ;;  %s3050_s27 = sld [smem:[#allocation14_spill]] }
  0x60   : > { %v1005_v8 = vsub.f32 1.0, %v1004_v7  ;;  %1258 = vmatpush.bf16.msrb.mxu3 %v2378_v28  ;;  %v2379_v53 = vld [vmem:[%s2731_s21] sm:$0xff]  ;;  %s3056_s19 = scalar_lea.vmem %s3055_s15, %s2693_s22 }
  0x61   : > { %1320 = vmatpush.bf16.msrb.mxu1 %v2382_v30  ;;  %v2383_v56 = vld [vmem:[%s2731_s21 + $0x20] sm:$0xff] }
  0x62   : > { %v1006_v9 = vmul.f32 %v2460_v6, %v1005_v8  ;;  %v2446_v7 = vld [vmem:[%s2726_s4] ss:$0 sm:$0xff]  ;;  %v2449_v19 = vld [vmem:[%s2726_s4 + $0x3] ss:$0 sm:$0xff] }
  0x63   : > { %1122 = vmatpush.bf16.msrb.mxu2 %v2367_v31  ;;  %1184 = vmatpush.bf16.msrb.mxu0 %v2371_v32  ;;  %v2445_v28 = vld [vmem:[%s3049_s26 + $0x3] ss:$0 sm:$0xff] }
  0x64   : > { %v1007_v10 = vadd.f32 %v2460_v6, %v1006_v9  ;;  %1259 = vmatpush.bf16.msrb.mxu3 %v2377_v34 }
  0x65   : > { %1321 = vmatpush.bf16.msrb.mxu1 %v2381_v35  ;;  %v2447_v9 = vld [vmem:[%s3050_s27 + $0x1] ss:$0 sm:$0xff]  ;;  %v2450_v32 = vld [vmem:[%s3050_s27] ss:$0 sm:$0xff] }
  0x66   : > { %v2787_v11 = vsel %vm1008_vm2, %v2460_v6, %v1007_v10 }
  0xd1   : > { %v1002_v12 = vpop.xlane.xlu0 %1001 }
  0xd2   : > { %v1010_v13 = vmul.f32 %v2787_v11, %v1002_v12 }
  0xd4   : > { %v1011_v14 = vsub.f32 %v2783_v3, %v1010_v13 }
  0xd6   : > { %v1012_v15 = vmul.f32 %v1011_v14, %v1011_v14 }
  0xd8   : > { %v1013_v16 = vsel %vm999_vm1, %v1012_v15, 0.0 }
  0xd9   : > { %1014 = vadd.xlane.f32.xlu0 %v1013_v16  ;;  %v2442_v16 = vld [vmem:[%s3049_s26] ss:$0 sm:$0xff] }
 0x14c   : > { %v1015_v25 = vpop.xlane.xlu0 %1014 }
 0x14d   : > { %v1016_v29 = vmul.f32 %v1015_v25, %v2787_v11 }
 0x14f   : > { %v1017_v33 = vadd.f32 1e-05, %v1016_v29 }
 0x151   : > { %2461 = vrsqrt.f32 %v1017_v33  ;;  %vm1024_vm4 = vweird.f32 %v1017_v33 }
 0x157   : > { %v2462_v36 = vpop.eup %2461 }
 0x158   : > { %v1019_v37 = vmul.f32 %v2462_v36, %v1017_v33  ;;  %vm1025_vm3 = vweird.f32 %v2462_v36 }
 0x159   : > { %vm1026_vm5 = vmor %vm1024_vm4, %vm1025_vm3 }
 0x15a   : > { %v1020_v38 = vmul.f32 %v2462_v36, %v1019_v37 }
 0x15c   : > { %v1021_v39 = vmul.f32 0.5, %v1020_v38 }
 0x15e   : > { %v1022_v40 = vsub.f32 1.5, %v1021_v39 }
 0x160   : > { %v1023_v41 = vmul.f32 %v2462_v36, %v1022_v40  ;;  %v2451_v40 = vld [vmem:[%s2726_s4 + $0x2] ss:$0 sm:$0xff]  ;;  %s3051_s4 = sld [smem:[#allocation7_spill]] }
 0x162   : > { %v1027_v43 = vsel %vm1026_vm5, %v2462_v36, %v1023_v41  ;;  %v2452_v41 = vld [vmem:[%s3050_s27 + $0x3] ss:$0 sm:$0xff] }
 0x163   : > { %v1028_v45 = vmul.f32 %v1027_v43, %v1011_v14 }
 0x165   : > { %v1032_v46 = vmul.f32 %v2440_v42, %v1028_v45 }
 0x166   : > { %s926_s21 = sld [smem:[#allocation4 + %s3051_s4]] }
 0x167   : > { %v1036_v47 = vadd.f32 %v2441_v44, %v1032_v46 }
 0x169   : > { %v1037_v48 = vpack.c.bf16 %v1036_v47, %v1036_v47 }
 0x16b   : > { %2201 = vmatmul.msk.bf16.vlgmr.msra.gmra.mxu0 %vm999_vm1, %v1037_v48  ;;  %2210 = vmatmul.msk.bf16.vlgmr.msra.gmra.mxu2 %vm999_vm1, %v1037_v48 }
 0x16c   : > { %2228 = vmatmul.msk.bf16.vlgmr.msra.gmra.mxu3 %vm999_vm1, %v1037_v48  ;;  %2246 = vmatmul.msk.bf16.vlgmr.msra.gmra.mxu1 %vm999_vm1, %v1037_v48 }
 0x16d   : > { %1233 = vmatpush.bf16.msra.mxu2 %v2376_v49  ;;  %1295 = vmatpush.bf16.msra.mxu0 %v2380_v50 }
 0x16e   : > { %1370 = vmatpush.bf16.msra.mxu3 %v2386_v51 }
 0x171   : > { %1234 = vmatpush.bf16.msra.mxu2 %v2375_v52  ;;  %1296 = vmatpush.bf16.msra.mxu0 %v2379_v53 }
 0x172   : > { %1371 = vmatpush.bf16.msra.mxu3 %v2385_v54 }
 0x17b   : > { %2219 = vmatmul.msk.bf16.vlgmr.msrb.gmra.mxu2 %vm999_vm1, %v1037_v48  ;;  %2237 = vmatmul.msk.bf16.vlgmr.msrb.gmra.mxu0 %vm999_vm1, %v1037_v48 }
 0x17c   : > { %2264 = vmatmul.msk.bf16.vlgmr.msrb.gmra.mxu3 %vm999_vm1, %v1037_v48  ;;  %2282 = vmatmul.msk.bf16.vlgmr.msrb.gmra.mxu1 %vm999_vm1, %v1037_v48 }
 0x17d   : > { %1345 = vmatpush.bf16.msrb.mxu2 %v2384_v55 }
 0x181   : > { %1346 = vmatpush.bf16.msrb.mxu2 %v2383_v56 }
 0x18b   : > { %2255 = vmatmul.msk.bf16.vlgmr.msra.gmra.mxu2 %vm999_vm1, %v1037_v48  ;;  %2273 = vmatmul.msk.bf16.vlgmr.msra.gmra.mxu0 %vm999_vm1, %v1037_v48 }
 0x18c   : > { %2300 = vmatmul.msk.bf16.vlgmr.msra.gmra.mxu3 %vm999_vm1, %v1037_v48 }
 0x19b   : > { %2291 = vmatmul.msk.bf16.vlgmr.msrb.gmra.mxu2 %vm999_vm1, %v1037_v48  ;;  %v2448_v48 = vld [vmem:[%s3049_s26 + $0x2] ss:$0 sm:$0xff] }
 0x1e8   : > { %v1074_v58 = vpop.f32.mrf.mxu0 }
 0x1e9   : > { %v1211_v59 = vpop.f32.mrf.mxu1  ;;  %v1075_v23 = vadd.f32 %v2442_v16, %v1074_v58 }
 0x1ea   : > { %v1212_v60 = vadd.f32 %v2443_v57, %v1211_v59  ;;  %v2453_v57 = vld [vmem:[%s3050_s27 + $0x2] ss:$0 sm:$0xff] }
 0x1eb   : > { %v1377_v30 = vpack.c.bf16 %v1075_v23, %v1075_v23 }
 0x1ec   : > { %v1382_v61 = vpack.c.bf16 %v1212_v60, %v1212_v60 }
 0x1ee   : > { %v1409_v63 = vsel %vm1385_vm6, %v1382_v61, 0  ;;  %v1099_v0 = vpop.f32.mrf.mxu2 }
 0x1ef   : > { %v1149_v1 = vpop.f32.mrf.mxu3  ;;  %1418 = vmatpush.bf16.xpose.msra.mxu1 %v1409_v63  ;;  %v1100_v2 = vadd.f32 %v2444_v62, %v1099_v0  ;;  %v927_v0 = vlaneseq }
 0x1f0   : > { %v1076_v4 = vpop.f32.mrf.mxu0  ;;  %v1150_v33 = vadd.f32 %v2445_v28, %v1149_v1 }
 0x1f1   : > { %v1213_v5 = vpop.f32.mrf.mxu1  ;;  %v1378_v6 = vpack.c.bf16 %v1100_v2, %v1100_v2  ;;  %v928_v2 = vand.u32 127, %v927_v0  ;;  %v929_v4 = vstv %s926_s21 }
 0x1f2   : > { %v1380_v38 = vpack.c.bf16 %v1150_v33, %v1150_v33 }
 0x1f3   : > { %vm930_vm8 = vcmp.ge.s32.totalorder %v928_v2, %v929_v4 }
 0x1f6   : > { %2302 = vmatmul.msk.bf16.vlgmr.msra.gmra.mxu1 %vm1385_vm6, %v1378_v6  ;;  %v1101_v8 = vpop.f32.mrf.mxu2 }
 0x1f7   : > { %v1151_v10 = vpop.f32.mrf.mxu3 }
 0x1f8   : > { %v1186_v12 = vpop.f32.mrf.mxu0 }
 0x1f9   : > { %v1187_v13 = vadd.f32 %v2446_v7, %v1186_v12  ;;  %v1323_v14 = vpop.f32.mrf.mxu1  ;;  %v2541_v7 = vmov 0.0  }
 0x1fa   : > { %v1324_v15 = vadd.f32 %v2447_v9, %v1323_v14  ;;  %v931_v8 = vsel %vm930_vm8, -1e+09, %v2541_v7 }
 0x1fb   : > { %v1381_v17 = vpack.c.bf16 %v1187_v13, %v1187_v13 }
 0x1fc   : > { %v1571_v18 = vpack.c.bf16 %v1324_v15, %v1324_v15 }
 0x1fd   : > { %v1390_v20 = vsel %vm1385_vm6, %v1381_v17, 0 }
 0x1fe   : > { %v1598_v21 = vsel %vm1577_vm7, %v1571_v18, 0  ;;  %v1124_v22 = vpop.f32.mrf.mxu2  ;;  %1399 = vmatpush.bf16.xpose.msrb.mxu0 %v1390_v20 }
 0x1ff   : > { %v1261_v24 = vpop.f32.mrf.mxu3  ;;  %1607 = vmatpush.bf16.msrb.mxu1 %v1598_v21  ;;  %v1125_v53 = vadd.f32 %v2448_v48, %v1124_v22 }
 0x200   : > { %v1262_v25 = vadd.f32 %v2449_v19, %v1261_v24  ;;  %v1188_v26 = vpop.f32.mrf.mxu0 }
 0x201   : > { %v1325_v27 = vpop.f32.mrf.mxu1  ;;  %v1379_v56 = vpack.c.bf16 %v1125_v53, %v1125_v53 }
 0x202   : > { %v1384_v29 = vpack.c.bf16 %v1262_v25, %v1262_v25 }
 0x204   : > { %v1447_v31 = vsel %vm1385_vm6, %v1384_v29, 0 }
 0x205   : > { %1456 = vmatpush.bf16.xpose.msrb.mxu3 %v1447_v31  ;;  %2301 = vmatmul.msk.bf16.vlgmr.msrb.gmra.mxu0 %vm1385_vm6, %v1377_v30 }
 0x206   : > { %v1126_v34 = vpop.f32.mrf.mxu2 }
 0x207   : > { %v1263_v35 = vpop.f32.mrf.mxu3 }
 0x208   : > { %v1298_v36 = vpop.f32.mrf.mxu0 }
 0x209   : > { %v1299_v37 = vadd.f32 %v2450_v32, %v1298_v36 }
 0x20b   : > { %v1570_v39 = vpack.c.bf16 %v1299_v37, %v1299_v37 }
 0x20c   : > { %2304 = vmatmul.msk.bf16.vlgmr.msrb.gmra.mxu3 %vm1385_vm6, %v1380_v38 }
 0x20d   : > { %v1579_v42 = vsel %vm1577_vm7, %v1570_v39, 0 }
 0x20e   : > { %v1236_v43 = vpop.f32.mrf.mxu2  ;;  %1588 = vmatpush.bf16.msra.mxu0 %v1579_v42 }
 0x20f   : > { %v1237_v44 = vadd.f32 %v2451_v40, %v1236_v43  ;;  %v1373_v45 = vpop.f32.mrf.mxu3 }
 0x210   : > { %v1374_v46 = vadd.f32 %v2452_v41, %v1373_v45  ;;  %v1300_v47 = vpop.f32.mrf.mxu0 }
 0x211   : > { %v1383_v49 = vpack.c.bf16 %v1237_v44, %v1237_v44 }
 0x212   : > { %v1573_v50 = vpack.c.bf16 %v1374_v46, %v1374_v46 }
 0x213   : > { %v1428_v51 = vsel %vm1385_vm6, %v1383_v49, 0 }
 0x214   : > { %v1636_v52 = vsel %vm1577_vm7, %v1573_v50, 0  ;;  %1437 = vmatpush.bf16.xpose.msra.mxu2 %v1428_v51 }
 0x215   : > { %1645 = vmatpush.bf16.msra.mxu3 %v1636_v52 }
 0x216   : > { %v1238_v54 = vpop.f32.mrf.mxu2 }
 0x217   : > { %v1375_v55 = vpop.f32.mrf.mxu3 }
 0x21b   : > { %2303 = vmatmul.msk.bf16.vlgmr.msra.gmra.mxu2 %vm1385_vm6, %v1379_v56 }
 0x21e   : > { %v1348_v58 = vpop.f32.mrf.mxu2 }
 0x21f   : > { %v1349_v59 = vadd.f32 %v2453_v57, %v1348_v58 }
 0x221   : > { %v1572_v60 = vpack.c.bf16 %v1349_v59, %v1349_v59 }
 0x223   : > { %v1617_v61 = vsel %vm1577_vm7, %v1572_v60, 0 }
 0x224   : > { %1626 = vmatpush.bf16.msrb.mxu2 %v1617_v61 }
 0x226   : > { %v1350_v62 = vpop.f32.mrf.mxu2 }
 0x273   : > { %v1420_v63 = vpop.f32.mrf.mxu1 }
 0x274   : > { %v1463_v10 = vmul.f32 0.35355338, %v1420_v63 }
 0x276   : > { %v1467_v14 = vadd.f32 %v1463_v10, %v931_v8 }
 0x278   : > { %v1473_v16 = vsel %vm1385_vm6, %v1467_v14, -inf }
 0x27b   : > { %v1422_v1 = vpop.f32.mrf.mxu1 }
 0x282   : > { %v1401_v5 = vpop.f32.mrf.mxu0 }
 0x283   : > { %v1462_v6 = vmul.f32 0.35355338, %v1401_v5 }
 0x285   : > { %v1466_v9 = vadd.f32 %v1462_v6, %v931_v8 }
 0x287   : > { %v1470_v12 = vsel %vm1385_vm6, %v1466_v9, -inf }
 0x288   : > { %1471 = vmax.xlane.f32.xlu2 %v1470_v12 }
 0x28a   : > { %v1403_v13 = vpop.f32.mrf.mxu0 }
 0x28f   : > { %v1458_v15 = vpop.f32.mrf.mxu3 }
 0x290   : > { %1474 = vmax.xlane.f32.xlu2 %v1473_v16  ;;  %v1465_v21 = vmul.f32 0.35355338, %v1458_v15 }
 0x292   : > { %v1469_v24 = vadd.f32 %v1465_v21, %v931_v8 }
 0x294   : > { %v1479_v25 = vsel %vm1385_vm6, %v1469_v24, -inf }
 0x297   : > { %v1460_v17 = vpop.f32.mrf.mxu3 }
 0x29e   : > { %v1439_v18 = vpop.f32.mrf.mxu2 }
 0x29f   : > { %v1464_v19 = vmul.f32 0.35355338, %v1439_v18 }
 0x2a1   : > { %v1468_v20 = vadd.f32 %v1464_v19, %v931_v8 }
 0x2a3   : > { %v1476_v22 = vsel %vm1385_vm6, %v1468_v20, -inf }
 0x2a4   : > { %1477 = vmax.xlane.f32.xlu1 %v1476_v22 }
 0x2a6   : > { %v1441_v23 = vpop.f32.mrf.mxu2 }
 0x2ac   : > { %1480 = vmax.xlane.f32.xlu1 %v1479_v25 }
 0x2fb   : > { %v1472_v26 = vpop.xlane.xlu2 %1471 }
 0x2fc   : > { %v1482_v27 = vsub.f32 %v1466_v9, %v1472_v26 }
 0x2fe   : > { %v1486_v28 = vmul.f32 1.442695, %v1482_v27 }
 0x300   : > { %2463 = vpow2.f32 %v1486_v28 }
 0x303   : > { %v1475_v31 = vpop.xlane.xlu2 %1474 }
 0x304   : > { %v1483_v34 = vsub.f32 %v1467_v14, %v1475_v31 }
 0x306   : > { %v2464_v29 = vpop.eup %2463  ;;  %v1488_v36 = vmul.f32 1.442695, %v1483_v34 }
 0x307   : > { %v1494_v30 = vsel %vm1385_vm6, %v2464_v29, 0.0 }
 0x308   : > { %1495 = vadd.xlane.f32.xlu2 %v1494_v30 }
 0x317   : > { %v1478_v32 = vpop.xlane.xlu1 %1477 }
 0x318   : > { %v1484_v33 = vsub.f32 %v1468_v20, %v1478_v32 }
 0x31a   : > { %v1490_v35 = vmul.f32 1.442695, %v1484_v33 }
 0x31c   : > { %2465 = vpow2.f32 %v1490_v35 }
 0x31d   : > { %2467 = vpow2.f32 %v1488_v36  ;;  %v994_v36 = vld [vmem:[%s3052_s7] sm:$0xf] }
 0x31f   : > { %v1481_v37 = vpop.xlane.xlu1 %1480 }
 0x320   : > { %v1485_v38 = vsub.f32 %v1469_v24, %v1481_v37  ;;  %v1659_v37 = vsel %vm1577_vm7, %v994_v36, 0 }
 0x321   : > { %1668 = vmatpush.bf16.msrb.mxu0 %v1659_v37  ;;  %v2456_v37 = vld [vmem:[%s3056_s19] ss:$0 sm:$0xff] }
 0x322   : > { %v2466_v39 = vpop.eup %2465  ;;  %v1492_v40 = vmul.f32 1.442695, %v1485_v38 }
 0x323   : > { %v1500_v41 = vsel %vm1385_vm6, %v2466_v39, 0.0  ;;  %v2870_v42 = vpop.eup %2467 }
 0x324   : > { %2469 = vpow2.f32 %v1492_v40  ;;  %1501 = vadd.xlane.f32.xlu0 %v1500_v41  ;;  %v1497_v45 = vsel %vm1385_vm6, %v2870_v42, 0.0  ;;  %v996_v40 = vld [vmem:[%s3052_s7 + $0x8] sm:$0xf] }
 0x325   : > { %v1697_v41 = vsel %vm1577_vm7, %v996_v40, 0 }
 0x326   : > { %1706 = vmatpush.bf16.msra.mxu2 %v1697_v41  ;;  %v2390_v41 = vld [vmem:[%s2768_s29 + $0x8] sm:$0xff] }
 0x32a   : > { %v2872_v43 = vpop.eup %2469 }
 0x32b   : > { %v1503_v44 = vsel %vm1385_vm6, %v2872_v43, 0.0 }
 0x32c   : > { %1504 = vadd.xlane.f32.xlu1 %v1503_v44  ;;  %1498 = vadd.xlane.f32.xlu0 %v1497_v45  ;;  %v997_v44 = vld [vmem:[%s3052_s7 + $0xc] sm:$0xf] }
 0x32d   : > { %v1716_v45 = vsel %vm1577_vm7, %v997_v44, 0 }
 0x32e   : > { %1725 = vmatpush.bf16.msrb.mxu3 %v1716_v45 }
 0x37b   : > { %v1496_v46 = vpop.xlane.xlu2 %1495 }
 0x37c   : > { %2471 = vrcp.f32 %v1496_v46  ;;  %v1517_v50 = vand.u32 2147483648, %v1496_v46  ;;  %v1515_v52 = vand.u32 2147483647, %v1496_v46  ;;  %vm1511_vm10 = vweird.f32 %v1496_v46 }
 0x37e   : > { %v1518_v54 = vor.u32 1.1754944e-38, %v1517_v50  ;;  %vm1516_vm12 = vcmp.eq.f32.partialorder %v1515_v52, 8.507059e+37 }
 0x382   : > { %v2472_v47 = vpop.eup %2471 }
 0x383   : > { %v1507_v48 = vmul.f32 %v2472_v47, %v1496_v46  ;;  %vm1512_vm9 = vweird.f32 %v2472_v47 }
 0x384   : > { %vm1513_vm11 = vmor %vm1511_vm10, %vm1512_vm9 }
 0x385   : > { %v1508_v49 = vsub.f32 1.0, %v1507_v48 }
 0x387   : > { %v1509_v51 = vmul.f32 %v2472_v47, %v1508_v49 }
 0x389   : > { %v1510_v53 = vadd.f32 %v2472_v47, %v1509_v51 }
 0x38b   : > { %v1514_v55 = vsel %vm1513_vm11, %v2472_v47, %v1510_v53 }
 0x38c   : > { %v1519_v56 = vsel %vm1516_vm12, %v1518_v54, %v1514_v55 }
 0x38d   : > { %v1520_v57 = vmul.f32 %v2464_v29, %v1519_v56 }
 0x38f   : > { %v1566_v58 = vpack.c.bf16 %v1520_v57, %v1520_v57 }
 0x391   : > { %2305 = vmatmul.msk.bf16.vlgmr.msra.gmra.mxu0 %vm1385_vm6, %v1566_v58 }
 0x397   : > { %v1502_v59 = vpop.xlane.xlu0 %1501 }
 0x398   : > { %2473 = vrcp.f32 %v1502_v59  ;;  %v1547_v1 = vand.u32 2147483648, %v1502_v59  ;;  %v1545_v4 = vand.u32 2147483647, %v1502_v59  ;;  %vm1541_vm14 = vweird.f32 %v1502_v59 }
 0x39a   : > { %v1548_v7 = vor.u32 1.1754944e-38, %v1547_v1  ;;  %vm1546_vm0 = vcmp.eq.f32.partialorder %v1545_v4, 8.507059e+37 }
 0x39e   : > { %v2474_v60 = vpop.eup %2473 }
 0x39f   : > { %v1537_v61 = vmul.f32 %v2474_v60, %v1502_v59  ;;  %v1505_v62 = vpop.xlane.xlu1 %1504  ;;  %v1499_v63 = vpop.xlane.xlu0 %1498  ;;  %vm1542_vm13 = vweird.f32 %v2474_v60 }
 0x3a0   : > { %2475 = vrcp.f32 %v1505_v62  ;;  %vm1543_vm15 = vmor %vm1541_vm14, %vm1542_vm13  ;;  %v1560_v16 = vand.u32 2147483647, %v1505_v62  ;;  %v1562_v17 = vand.u32 2147483648, %v1505_v62  ;;  %v1532_v20 = vand.u32 2147483648, %v1499_v63 }
 0x3a1   : > { %v1538_v0 = vsub.f32 1.0, %v1537_v61  ;;  %2477 = vrcp.f32 %v1499_v63  ;;  %v1530_v23 = vand.u32 2147483647, %v1499_v63  ;;  %vm1556_vm4 = vweird.f32 %v1505_v62 }
 0x3a2   : > { %v1563_v25 = vor.u32 1.1754944e-38, %v1562_v17  ;;  %vm1526_vm8 = vweird.f32 %v1499_v63  ;;  %vm1561_vm9 = vcmp.eq.f32.partialorder %v1560_v16, 8.507059e+37  ;;  %v1533_v28 = vor.u32 1.1754944e-38, %v1532_v20 }
 0x3a3   : > { %v1539_v2 = vmul.f32 %v2474_v60, %v1538_v0  ;;  %vm1531_vm11 = vcmp.eq.f32.partialorder %v1530_v23, 8.507059e+37 }
 0x3a5   : > { %v1540_v5 = vadd.f32 %v2474_v60, %v1539_v2 }
 0x3a6   : > { %v2476_v6 = vpop.eup %2475 }
 0x3a7   : > { %v2478_v8 = vpop.eup %2477  ;;  %v1544_v9 = vsel %vm1543_vm15, %v2474_v60, %v1540_v5  ;;  %v1552_v10 = vmul.f32 %v2476_v6, %v1505_v62  ;;  %vm1557_vm2 = vweird.f32 %v2476_v6 }
 0x3a8   : > { %v1549_v12 = vsel %vm1546_vm0, %v1548_v7, %v1544_v9  ;;  %v1522_v13 = vmul.f32 %v2478_v8, %v1499_v63  ;;  %vm1527_vm3 = vweird.f32 %v2478_v8  ;;  %vm1558_vm5 = vmor %vm1556_vm4, %vm1557_vm2  ;;  %v2454_v7 = vld [vmem:[%s3053_s9] ss:$0 sm:$0xff] }
 0x3a9   : > { %v1550_v14 = vmul.f32 %v2466_v39, %v1549_v12  ;;  %v1553_v15 = vsub.f32 1.0, %v1552_v10  ;;  %vm1528_vm10 = vmor %vm1526_vm8, %vm1527_vm3 }
 0x3aa   : > { %v1523_v18 = vsub.f32 1.0, %v1522_v13 }
 0x3ab   : > { %v1554_v19 = vmul.f32 %v2476_v6, %v1553_v15  ;;  %v1568_v21 = vpack.c.bf16 %v1550_v14, %v1550_v14 }
 0x3ac   : > { %v1524_v22 = vmul.f32 %v2478_v8, %v1523_v18  ;;  %v2388_v18 = vld [vmem:[%s2759_s1 + $0x8] sm:$0xff] }
 0x3ad   : > { %v1555_v24 = vadd.f32 %v2476_v6, %v1554_v19  ;;  %2307 = vmatmul.msk.bf16.vlgmr.msrb.gmra.mxu2 %vm1385_vm6, %v1568_v21  ;;  %1822 = vmatpush.bf16.msra.mxu0 %v2388_v18  ;;  %v2387_v19 = vld [vmem:[%s2759_s1] sm:$0xff] }
 0x3ae   : > { %v1525_v26 = vadd.f32 %v2478_v8, %v1524_v22  ;;  %v2395_v22 = vld [vmem:[%s2768_s29 + $0x30] sm:$0xff] }
 0x3af   : > { %v1559_v27 = vsel %vm1558_vm5, %v2476_v6, %v1555_v24  ;;  %v2394_v24 = vld [vmem:[%s2768_s29 + $0x28] sm:$0xff] }
 0x3b0   : > { %v1564_v29 = vsel %vm1561_vm9, %v1563_v25, %v1559_v27  ;;  %v1529_v30 = vsel %vm1528_vm10, %v2478_v8, %v1525_v26  ;;  %v2393_v25 = vld [vmem:[%s2768_s29 + $0x20] sm:$0xff] }
 0x3b1   : > { %v1565_v31 = vmul.f32 %v2872_v43, %v1564_v29  ;;  %v1534_v32 = vsel %vm1531_vm11, %v1533_v28, %v1529_v30  ;;  %1823 = vmatpush.bf16.msra.mxu0 %v2387_v19  ;;  %v2392_v28 = vld [vmem:[%s2768_s29 + $0x18] sm:$0xff] }
 0x3b2   : > { %v1535_v33 = vmul.f32 %v2870_v42, %v1534_v32  ;;  %v995_v42 = vld [vmem:[%s3052_s7 + $0x4] sm:$0xf] }
 0x3b3   : > { %v1569_v34 = vpack.c.bf16 %v1565_v31, %v1565_v31  ;;  %v1678_v43 = vsel %vm1577_vm7, %v995_v42, 0  ;;  %v2391_v31 = vld [vmem:[%s2768_s29 + $0x10] sm:$0xff]  ;;  %v2389_v42 = vld [vmem:[%s2768_s29] sm:$0xff] }
 0x3b4   : > { %v1567_v35 = vpack.c.bf16 %v1535_v33, %v1535_v33  ;;  %1687 = vmatpush.bf16.msra.mxu1 %v1678_v43  ;;  %v2457_v43 = vld [vmem:[%s902_s11] ss:$0 sm:$0xff] }
 0x3b5   : > { %2308 = vmatmul.msk.bf16.vlgmr.msra.gmra.mxu3 %vm1385_vm6, %v1569_v34  ;;  %v2455_v34 = vld [vmem:[%s3054_s10] ss:$0 sm:$0xff] }
 0x3b6   : > { %2306 = vmatmul.msk.bf16.vlgmr.msrb.gmra.mxu1 %vm1385_vm6, %v1567_v35 }
 0x40e   : > { %v1590_v38 = vpop.f32.mrf.mxu0 }
 0x40f   : > { %v1651_v39 = vpack.c.bf16 %v1590_v38, %v1590_v38 }
 0x411   : > { %2309 = vmatmul.msk.bf16.vlgmr.msrb.gmra.mxu0 %vm1385_vm6, %v1651_v39 }
 0x416   : > { %v1592_v46 = vpop.f32.mrf.mxu0 }
 0x430   : > { %v1628_v47 = vpop.f32.mrf.mxu2 }
 0x431   : > { %v1653_v48 = vpack.c.bf16 %v1628_v47, %v1628_v47 }
 0x433   : > { %v1609_v49 = vpop.f32.mrf.mxu1  ;;  %2311 = vmatmul.msk.bf16.vlgmr.msra.gmra.mxu2 %vm1385_vm6, %v1653_v48 }
 0x434   : > { %v1652_v50 = vpack.c.bf16 %v1609_v49, %v1609_v49  ;;  %v2458_v49 = vld [vmem:[%s910_s0] ss:$0 sm:$0xff] }
 0x436   : > { %2310 = vmatmul.msk.bf16.vlgmr.msra.gmra.mxu1 %vm1385_vm6, %v1652_v50 }
 0x438   : > { %v1630_v51 = vpop.f32.mrf.mxu2  ;;  %v1647_v52 = vpop.f32.mrf.mxu3 }
 0x439   : > { %v1654_v53 = vpack.c.bf16 %v1647_v52, %v1647_v52 }
 0x43b   : > { %v1611_v54 = vpop.f32.mrf.mxu1  ;;  %2312 = vmatmul.msk.bf16.vlgmr.msrb.gmra.mxu3 %vm1385_vm6, %v1654_v53 }
 0x440   : > { %v1649_v55 = vpop.f32.mrf.mxu3 }
 0x48e   : > { %v1670_v56 = vpop.f32.mrf.mxu0 }
 0x48f   : > { %v1731_v61 = vsel %vm999_vm1, %v1670_v56, 0.0 }
 0x496   : > { %v1672_v57 = vpop.f32.mrf.mxu0 }
 0x4b3   : > { %v1689_v58 = vpop.f32.mrf.mxu1 }
 0x4b4   : > { %v1732_v60 = vsel %vm999_vm1, %v1689_v58, 0.0 }
 0x4b5   : > { %v1733_v0 = vadd.f32 %v1732_v60, %v1731_v61 }
 0x4b6   : > { %v1708_v59 = vpop.f32.mrf.mxu2 }
 0x4b7   : > { %v1734_v62 = vsel %vm999_vm1, %v1708_v59, 0.0 }
 0x4b8   : > { %v1735_v1 = vadd.f32 %v1734_v62, %v1733_v0 }
 0x4bb   : > { %v1691_v63 = vpop.f32.mrf.mxu1 }
 0x4be   : > { %v1710_v2 = vpop.f32.mrf.mxu2  ;;  %v1727_v4 = vpop.f32.mrf.mxu3 }
 0x4bf   : > { %v1736_v5 = vsel %vm999_vm1, %v1727_v4, 0.0 }
 0x4c0   : > { %v1737_v6 = vadd.f32 %v1736_v5, %v1735_v1 }
 0x4c2   : > { %v1738_v8 = vadd.f32 %v1737_v6, %v2783_v3  ;;  %v2396_v3 = vld [vmem:[%s2768_s29 + $0x38] sm:$0xff]  ;;  %s3058_s29 = sld [smem:[#allocation6_spill]] }
 0x4c3   : > { %1879 = vmatpush.bf16.msrb.mxu1 %v2396_v3 }
 0x4c4   : > { %v1742_v9 = vadd.f32 %v2454_v7, %v1738_v8 }
 0x4c6   : > { %v1729_v10 = vpop.f32.mrf.mxu3  ;;  %v1767_v12 = vsel %vm999_vm1, %v1742_v9, 0.0 }
 0x4c7   : > { %1768 = vadd.xlane.f32.xlu1 %v1767_v12  ;;  %1880 = vmatpush.bf16.msrb.mxu1 %v2395_v22 }
 0x4c8   : > { %p2354_p8 = scmp.ne.s32.totalorder %s3058_s29, 1 }
 0x4c9   : > { %s3059_s0 = sld [smem:[#allocation31_spill]] (!%p2354_p8) }
 0x4ca   : > { %s3060_s26 = sld [smem:[#allocation32_spill]] (!%p2354_p8) }
 0x4cb   : > { %1881 = vmatpush.bf16.msrb.mxu1 %v2394_v24 }
 0x4cf   : > { %1882 = vmatpush.bf16.msrb.mxu1 %v2393_v25 }
 0x4d3   : > { %1883 = vmatpush.bf16.msrb.mxu1 %v2392_v28 }
 0x4d7   : > { %1884 = vmatpush.bf16.msrb.mxu1 %v2391_v31 }
 0x4db   : > { %1885 = vmatpush.bf16.msrb.mxu1 %v2390_v41 }
 0x4df   : > { %1886 = vmatpush.bf16.msrb.mxu1 %v2389_v42 }
 0x53a   : > { %v1769_v13 = vpop.xlane.xlu1 %1768 }
 0x53b   : > { %v1770_v14 = vmul.f32 %v1769_v13, %v2787_v11 }
 0x53d   : > { %v1771_v15 = vsub.f32 %v1742_v9, %v1770_v14 }
 0x53f   : > { %v1772_v16 = vmul.f32 %v1771_v15, %v1771_v15 }
 0x541   : > { %v1773_v17 = vsel %vm999_vm1, %v1772_v16, 0.0 }
 0x542   : > { %1774 = vadd.xlane.f32.xlu2 %v1773_v17 }
 0x5b5   : > { %v1775_v20 = vpop.xlane.xlu2 %1774 }
 0x5b6   : > { %v1776_v21 = vmul.f32 %v1775_v20, %v2787_v11 }
 0x5b8   : > { %v1777_v23 = vadd.f32 1e-05, %v1776_v21 }
 0x5ba   : > { %2479 = vrsqrt.f32 %v1777_v23  ;;  %vm1784_vm7 = vweird.f32 %v1777_v23 }
 0x5c0   : > { %v2480_v26 = vpop.eup %2479 }
 0x5c1   : > { %v1779_v27 = vmul.f32 %v2480_v26, %v1777_v23  ;;  %vm1785_vm6 = vweird.f32 %v2480_v26 }
 0x5c2   : > { %vm1786_vm12 = vmor %vm1784_vm7, %vm1785_vm6 }
 0x5c3   : > { %v1780_v29 = vmul.f32 %v2480_v26, %v1779_v27 }
 0x5c5   : > { %v1781_v30 = vmul.f32 0.5, %v1780_v29 }
 0x5c7   : > { %v1782_v32 = vsub.f32 1.5, %v1781_v30 }
 0x5c9   : > { %v1783_v33 = vmul.f32 %v2480_v26, %v1782_v32 }
 0x5cb   : > { %v1787_v35 = vsel %vm1786_vm12, %v2480_v26, %v1783_v33 }
 0x5cc   : > { %v1788_v36 = vmul.f32 %v1787_v35, %v1771_v15 }
 0x5ce   : > { %v1792_v38 = vmul.f32 %v2455_v34, %v1788_v36 }
 0x5d0   : > { %v1796_v39 = vadd.f32 %v2456_v37, %v1792_v38 }
 0x5d2   : > { %v1797_v40 = vpack.c.bf16 %v1796_v39, %v1796_v39 }
 0x5d4   : > { %2321 = vmatmul.msk.bf16.vlgmr.msra.gmra.mxu0 %vm999_vm1, %v1797_v40 }
 0x651   : > { %v1825_v44 = vpop.f32.mrf.mxu0 }
 0x652   : > { %v1826_v45 = vadd.f32 %v2457_v43, %v1825_v44 }
 0x654   : > { %v1829_v46 = vmax.f32 %v1826_v45, 0.0 }
 0x656   : > { %v1830_v47 = vpack.c.bf16 %v1829_v46, %v1829_v46 }
 0x658   : > { %1887 = vmatmul.bf16.vlgmr.msrb.gmra.mxu1 %v1830_v47 }
 0x659   : > { %v1827_v48 = vpop.f32.mrf.mxu0 }
 0x6d5   : > { %v1888_v50 = vpop.f32.mrf.mxu1 }
 0x6d6   : > { %v1892_v51 = vadd.f32 %v1888_v50, %v1742_v9 }
 0x6d8   : > { %v1896_v52 = vadd.f32 %v2458_v49, %v1892_v51 }
 0x6d9   : > { %1901 = sbr.rel (%p2354_p8) target bundleno = 2027 (0x7eb), region = 108 }
 0x6da   : > { %1897 = vst.msk [vmem:[#allocation2] sm:$0xff] %vm999_vm1, %v1896_v52 }
 0x6dd   : > { %v1890_v53 = vpop.f32.mrf.mxu1 }
 0x6de   : > { %v1904_v54 = vsel %vm999_vm1, %v1896_v52, 0.0  ;;  %v2481_v6 = vld [vmem:[%s3059_s0] ss:$0 sm:$0xff] }
 0x6df   : > { %1905 = vadd.xlane.f32.xlu0 %v1904_v54 }
 0x752   : > { %v1906_v55 = vpop.xlane.xlu0 %1905 }
 0x753   : > { %v1907_v56 = vmul.f32 %v1906_v55, %v2787_v11 }
 0x755   : > { %v1908_v57 = vsub.f32 %v1896_v52, %v1907_v56 }
 0x757   : > { %v1909_v58 = vmul.f32 %v1908_v57, %v1908_v57 }
 0x759   : > { %v1910_v59 = vsel %vm999_vm1, %v1909_v58, 0.0 }
 0x75a   : > { %1911 = vadd.xlane.f32.xlu0 %v1910_v59 }
 0x7cd   : > { %v1912_v60 = vpop.xlane.xlu0 %1911 }
 0x7ce   : > { %v1913_v61 = vmul.f32 %v1912_v60, %v2787_v11  ;;  %v2482_v11 = vld [vmem:[%s3060_s26] ss:$0 sm:$0xff] }
 0x7d0   : > { %v1914_v62 = vadd.f32 1e-05, %v1913_v61 }
 0x7d2   : > { %2483 = vrsqrt.f32 %v1914_v62  ;;  %vm1921_vm14 = vweird.f32 %v1914_v62 }
 0x7d8   : > { %v2484_v63 = vpop.eup %2483 }
 0x7d9   : > { %v1916_v0 = vmul.f32 %v2484_v63, %v1914_v62  ;;  %vm1922_vm13 = vweird.f32 %v2484_v63 }
 0x7da   : > { %vm1923_vm15 = vmor %vm1921_vm14, %vm1922_vm13 }
 0x7db   : > { %v1917_v1 = vmul.f32 %v2484_v63, %v1916_v0 }
 0x7dd   : > { %v1918_v2 = vmul.f32 0.5, %v1917_v1 }
 0x7df   : > { %v1919_v4 = vsub.f32 1.5, %v1918_v2 }
 0x7e1   : > { %v1920_v5 = vmul.f32 %v2484_v63, %v1919_v4 }
 0x7e3   : > { %v1924_v7 = vsel %vm1923_vm15, %v2484_v63, %v1920_v5 }
 0x7e4   : > { %v1925_v8 = vmul.f32 %v1924_v7, %v1908_v57 }
 0x7e6   : > { %v1929_v9 = vmul.f32 %v2481_v6, %v1925_v8 }
 0x7e8   : > { %v1933_v10 = vadd.f32 %v2482_v11, %v1929_v9 }
 0x7ea   : > { %1934 = vst.msk [vmem:[%s2777_s14] sm:$0xff] %vm999_vm1, %v1933_v10 }
 0x7eb PF: > { %s3061_s27 = sld [smem:[#allocation10_spill]] }
 0x7ec   : > { %s3062_s3 = sld [smem:[#allocation8_spill]] }
 0x7ed   : > { %s3063_s28 = sld [smem:[#allocation9_spill]] }
 0x7ee   : > { %s3064_s29 = sld [smem:[#allocation11_spill]] }
 0x7ef   : > { %s3065_s0 = sld [smem:[#allocation12_spill]] }
 0x7f1   : > { %s39_s4 = sadd.s32 1, %s3061_s27  }
 0x7f2   : > { %p36_p9 = scmp.ge.s32.totalorder %s39_s4, 6  }
 0x7f4   :  { %38 = sbr.rel (!%p36_p9) target bundleno = 33 (0x21), region = 186 }

// kernel: transformer_forward.3
= control target key start
LH: loop header
LB: loop body
LE: loop exit
PB: predicated region body
PF: predicated region fallthrough
CT: control target
= control target key end

     0   :  { %s4703_s6 = smov 1   ;;  %s4704_s10 = smov 2   ;;  %s5402_s0 = inlined_call_operand.smem [shape: u32[40], index: -1, kind: input, shape index: {}] }
   0x1   :  { %s4755_s5 = sld [smem:[%s5402_s0]]   ;;  %s4705_s14 = smov 3  }
   0x2   :  { %s4760_s9 = sld [smem:[%s5402_s0 + %s4703_s6]]   ;;  %s4706_s18 = smov 4  }
   0x3   :  { %s4765_s13 = sld [smem:[%s5402_s0 + %s4704_s10]]   ;;  %s4707_s22 = smov 5  }
   0x4   :  { %s4770_s17 = sld [smem:[%s5402_s0 + %s4705_s14]]   ;;  %s4708_s26 = smov 6  }
   0x5   :  { %s4775_s21 = sld [smem:[%s5402_s0 + %s4706_s18]]   ;;  %s4709_s30 = smov 7  }
   0x6   :  { %s4780_s25 = sld [smem:[%s5402_s0 + %s4707_s22]]   ;;  %s4710_s4 = smov 8  }
   0x7   :  { %s4785_s29 = sld [smem:[%s5402_s0 + %s4708_s26]]   ;;  %s4711_s10 = smov 9  }
   0x8   :  { %5422 = sst [smem:[#allocation6_spill]] %s4760_s9  ;;  %s4712_s15 = smov 10  }
   0x9   :  { %5423 = sst [smem:[#allocation7_spill]] %s4765_s13  ;;  %s4713_s20 = smov 11  }
   0xa   :  { %5424 = sst [smem:[#allocation8_spill]] %s4770_s17  ;;  %s4714_s26 = smov 12  }
   0xb   :  { %5425 = sst [smem:[#allocation9_spill]] %s4775_s21  ;;  %s4715_s1 = smov 13  }
   0xc   :  { %5426 = sst [smem:[#allocation10_spill]] %s4780_s25  ;;  %s4716_s7 = smov 14  }
   0xd   :  { %5427 = sst [smem:[#allocation11_spill]] %s4785_s29  ;;  %s4718_s22 = smov 16  }
   0xe   :  { %s4790_s3 = sld [smem:[%s5402_s0 + %s4709_s30]]   ;;  %s4719_s28 = smov 17  }
   0xf   :  { %s4795_s8 = sld [smem:[%s5402_s0 + %s4710_s4]]   ;;  %s4740_s11 = smov 38  }
  0x10   :  { %s4800_s14 = sld [smem:[%s5402_s0 + %s4711_s10]]   ;;  %s4741_s18 = smov 39  }
  0x11   :  { %s4805_s19 = sld [smem:[%s5402_s0 + %s4712_s15]]   ;;  %s4717_s15 = smov 15  }
  0x12   :  { %s4810_s24 = sld [smem:[%s5402_s0 + %s4713_s20]]  }
  0x13   :  { %s4815_s30 = sld [smem:[%s5402_s0 + %s4714_s26]]  }
  0x14   :  { %5428 = sst [smem:[#allocation12_spill]] %s4790_s3 }
  0x15   :  { %5429 = sst [smem:[#allocation13_spill]] %s4795_s8 }
  0x16   :  { %5430 = sst [smem:[#allocation14_spill]] %s4800_s14 }
  0x17   :  { %5431 = sst [smem:[#allocation15_spill]] %s4805_s19 }
  0x18   :  { %5432 = sst [smem:[#allocation16_spill]] %s4810_s24 }
  0x19   :  { %5433 = sst [smem:[#allocation17_spill]] %s4815_s30 }
  0x1a   :  { %s4820_s6 = sld [smem:[%s5402_s0 + %s4715_s1]]  }
  0x1b   :  { %s4825_s12 = sld [smem:[%s5402_s0 + %s4716_s7]]   ;;  %s4720_s7 = smov 18  }
  0x1c   :  { %s4830_s20 = sld [smem:[%s5402_s0 + %s4717_s15]]   ;;  %s4721_s15 = smov 19  }
  0x1d   :  { %s4835_s27 = sld [smem:[%s5402_s0 + %s4718_s22]]   ;;  %s4722_s22 = smov 20  }
  0x1e   :  { %s4840_s4 = sld [smem:[%s5402_s0 + %s4719_s28]]   ;;  %s4723_s28 = smov 21  }
  0x1f   :  { %s4845_s13 = sld [smem:[%s5402_s0 + %s4720_s7]]   ;;  %s4724_s7 = smov 22  }
  0x20   :  { %5434 = sst [smem:[#allocation18_spill]] %s4820_s6 }
  0x21   :  { %5435 = sst [smem:[#allocation19_spill]] %s4825_s12 }
  0x22   :  { %5436 = sst [smem:[#allocation20_spill]] %s4830_s20 }
  0x23   :  { %5437 = sst [smem:[#allocation21_spill]] %s4835_s27 }
  0x24   :  { %5438 = sst [smem:[#allocation22_spill]] %s4840_s4 }
  0x25   :  { %5439 = sst [smem:[#allocation23_spill]] %s4845_s13 }
  0x26   :  { %s4850_s25 = sld [smem:[%s5402_s0 + %s4721_s15]]   ;;  %s4725_s15 = smov 23  }
  0x27   :  { %s4855_s21 = sld [smem:[%s5402_s0 + %s4722_s22]]   ;;  %s4726_s22 = smov 24  }
  0x28   :  { %s4860_s4 = sld [smem:[%s5402_s0 + %s4723_s28]]   ;;  %s4727_s28 = smov 25  }
  0x29   :  { %s4865_s13 = sld [smem:[%s5402_s0 + %s4724_s7]]   ;;  %s4728_s7 = smov 26  }
  0x2c   :  { %5440 = sst [smem:[#allocation24_spill]] %s4850_s25 }
  0x2d   :  { %5441 = sst [smem:[#allocation25_spill]] %s4855_s21 }
  0x2e   :  { %5442 = sst [smem:[#allocation26_spill]] %s4860_s4 }
  0x2f   :  { %5443 = sst [smem:[#allocation27_spill]] %s4865_s13 }
  0x30   :  { %s4870_s25 = sld [smem:[%s5402_s0 + %s4725_s15]]   ;;  %s4729_s15 = smov 27  }
  0x31   :  { %s4875_s21 = sld [smem:[%s5402_s0 + %s4726_s22]]   ;;  %s4730_s22 = smov 28  }
  0x32   :  { %s4880_s4 = sld [smem:[%s5402_s0 + %s4727_s28]]   ;;  %s4731_s28 = smov 29  }
  0x33   :  { %s4885_s13 = sld [smem:[%s5402_s0 + %s4728_s7]]   ;;  %s4732_s7 = smov 30  }
  0x34   :  { %s4905_s16 = sld [smem:[%s5402_s0 + %s4732_s7]]   ;;  %s4736_s7 = smov 34  }
  0x36   :  { %5444 = sst [smem:[#allocation28_spill]] %s4870_s25 }
  0x37   :  { %5445 = sst [smem:[#allocation29_spill]] %s4875_s21 }
  0x38   :  { %5446 = sst [smem:[#allocation30_spill]] %s4880_s4 }
  0x39   :  { %5447 = sst [smem:[#allocation31_spill]] %s4885_s13 }
  0x3a   :  { %s4890_s25 = sld [smem:[%s5402_s0 + %s4729_s15]]   ;;  %s4733_s15 = smov 31  }
  0x3b   :  { %s4895_s21 = sld [smem:[%s5402_s0 + %s4730_s22]]   ;;  %s4734_s22 = smov 32  }
  0x3c   :  { %s4900_s4 = sld [smem:[%s5402_s0 + %s4731_s28]]   ;;  %s4735_s28 = smov 33  }
  0x3d   :  { %5451 = sst [smem:[#allocation35_spill]] %s4905_s16 }
  0x3e   :  { %s4910_s23 = sld [smem:[%s5402_s0 + %s4733_s15]]  }
  0x3f   :  { %s4915_s1 = sld [smem:[%s5402_s0 + %s4734_s22]]   ;;  %s4738_s22 = smov 36  }
  0x40   :  { %5448 = sst [smem:[#allocation32_spill]] %s4890_s25  ;;  %s4737_s25 = smov 35  }
  0x41   :  { %5449 = sst [smem:[#allocation33_spill]] %s4895_s21 }
  0x42   :  { %5450 = sst [smem:[#allocation34_spill]] %s4900_s4 }
  0x43   :  { %s4920_s10 = sld [smem:[%s5402_s0 + %s4735_s28]]   ;;  %s4739_s28 = smov 37  }
  0x44   :  { %5452 = sst [smem:[#allocation36_spill]] %s4910_s23 }
  0x45   :  { %5453 = sst [smem:[#allocation37_spill]] %s4915_s1 }
  0x46   :  { %s4925_s13 = sld [smem:[%s5402_s0 + %s4736_s7]]   ;;  %s86_s7 = sshll.u32 %s4755_s5, 4  ;;  %s87_s7 = int_to_ptr.vmem [resolvable:$true] %s86_s7 }
  0x47   :  { %s4930_s21 = sld [smem:[%s5402_s0 + %s4737_s25]]  }
  0x48   :  { %s4935_s4 = sld [smem:[%s5402_s0 + %s4738_s22]]   ;;  %s4649_s22 = sshra.s32 %s87_s7, 4  ;;  %s4650_s22 = int_to_ptr.vmem [resolvable:$true] %s4649_s22 }
  0x49   :  { %5454 = sst [smem:[#allocation38_spill]] %s4920_s10  ;;  %s4651_s26 = scalar_lea.vmem %s4650_s22, 1 }
  0x4a   :  { %s4940_s16 = sld [smem:[%s5402_s0 + %s4739_s28]]   ;;  %p4652_p0 = scmp.ne.s32.totalorder %s4650_s22, %s4651_s26 }
  0x4b   :  { %s4946_s25 = sld [smem:[%s5402_s0 + %s4740_s11]]   ;;  %s4653_s10 = scalar_lea.vmem %s4755_s5, 1 }
  0x4c   :  { %5455 = sst [smem:[#allocation39_spill]] %s4925_s13  ;;  %p4654_p1 = scmp.lt.s32.totalorder %s4650_s22, %s4755_s5 }
  0x4d   :  { %5456 = sst [smem:[#allocation40_spill]] %s4930_s21  ;;  %p4655_p2 = scmp.lt.s32.totalorder %s4653_s10, %s4651_s26 }
  0x4e   :  { %5457 = sst [smem:[#allocation41_spill]] %s4935_s4 }
  0x4f   :  { %s4951_s1 = sld [smem:[%s5402_s0 + %s4741_s18]]   ;;  %p4656_p3 = por %p4655_p2, %p4654_p1 }
  0x50   :  { %5458 = sst [smem:[#allocation42_spill]] %s4940_s16 }
  0x51   :  { %5459 = sst [smem:[#allocation43_spill]] %s4946_s25  ;;  %p4657_p4 = pnand %p4656_p3, %p4652_p0 }
  0x55   :  { %5460 = sst [smem:[#allocation44_spill]] %s4951_s1 }
  0x56   :  { %4660 = shalt.err (!%p4657_p4)  }
  0x57   :  { %s4742_s13 = smov [#allocation4]  }
  0x58   :  { %89 = dma.vmem_to_smem %s87_s7, 16, %s4742_s13, [#allocation3] }
  0x59   :  { %4681 = dma.done.wait [#allocation3], 16 }
  0x5a   :  { %4682 = vsyncadd [#allocation3], 4294967280 }
  0x5b   :  { %92 = sfence }
  0x5c   :  { %s4955_s28 = smov 0   ;;  %s4957_s23 = smov 0  }
  0x5d   :  { %s4959_s0 = smov 0   ;;  %s4961_s21 = smov 0  }
  0x5e   :  { %s4963_s2 = smov 0  }
  0x5f LB: > { %5461 = sst [smem:[#allocation45_spill]] %s4685_s28  ;;  %s107_s5 = sadd.s32 1, %s4693_s0  ;;  %s4701_s2 = sphi %s4963_s2, %s98_s2   ;;  %s4697_s21 = sphi %s4961_s21, %s5564_s21   ;;  %s4693_s0 = sphi %s4959_s0, %s5563_s0   ;;  %s4689_s23 = sphi %s4957_s23, %s5562_s23   ;;  %s4685_s28 = sphi %s4955_s28, %s5561_s28  }
  0x60   : > { %5462 = sst [smem:[#allocation46_spill]] %s4689_s23  ;;  %s110_s7 = sadd.s32 1, %s4697_s21 }
  0x61   : > { %5463 = sst [smem:[#allocation47_spill]] %s4693_s0  ;;  %p108_p5 = scmp.ge.s32.totalorder %s107_s5, 2 }
  0x62   : > { %5464 = sst [smem:[#allocation48_spill]] %s4697_s21  ;;  %p4075_p6 = scmp.ge.s32.totalorder %s4701_s2, 1 }
  0x63   : > { %5465 = sst [smem:[#allocation49_spill]] %s4701_s2  ;;  %p1336_p7 = scmp.lt.s32.totalorder %s4701_s2, 5 }
  0x64   : > { %s5566_s5 = smov (%p108_p5, %s107_s5), 0  ;;  %s5568_s7 = smov (!%p108_p5, %s110_s7), %s4697_s21 }
  0x65   : > { %5466 = sst [smem:[#allocation50_spill]] %s5566_s5  ;;  %p1337_p8 = pnand %p4075_p6, %p1336_p7 }
  0x66   : > { %p112_p9 = scmp.ge.s32.totalorder %s5568_s7, 2 }
  0x67   : > { %1340 = sbr.rel (%p1337_p8) target bundleno = 3800 (0xed8), region = 168 }
  0x68   : > { %s5570_s7 = smov (%p112_p9, %s5568_s7), 0 }
  0x69   : > { %5467 = sst [smem:[#allocation51_spill]] %s5570_s7 }
  0x6c   : > { %s5473_s8 = sld [smem:[#allocation13_spill]]  ;;  %p1547_p10 = scmp.lt.s32.totalorder %s4689_s23, 1 }
  0x6d   : > { %s5474_s14 = sld [smem:[#allocation14_spill]]  ;;  %p1555_p11 = scmp.lt.s32.totalorder %s4685_s28, 1 }
  0x6e   : > { %s5475_s19 = sld [smem:[#allocation15_spill]] }
  0x6f   : > { %s5476_s24 = sld [smem:[#allocation16_spill]] }
  0x70   : > { %s5477_s30 = sld [smem:[#allocation17_spill]] }
  0x71   : > { %s5478_s6 = sld [smem:[#allocation18_spill]] }
  0x72   : > { %s4992_s11 = scalar_select %p1547_p10, %s4689_s23, 1 }
  0x73   : > { %s4995_s15 = scalar_select %p1555_p11, %s4685_s28, 1 }
  0x74   : > { %5479 = sst [smem:[#allocation52_spill]] %s4992_s11  ;;  %s4998_s18 = sshll.u32 %s4992_s11, 3 }
  0x75   : > { %s5481_s12 = sld [smem:[#allocation19_spill]]  ;;  %s4406_s23 = sshll.u32 %s4995_s15, 6 }
  0x76   : > { %s5484_s7 = sld [smem:[#allocation23_spill]]  ;;  %s4080_s25 = sshll.u32 %s4995_s15, 2 }
  0x77   : > { %s5485_s21 = sld [smem:[#allocation24_spill]]  ;;  %s5013_s4 = scalar_lea.vmem %s5473_s8, %s4406_s23 }
  0x78   : > { %s5486_s2 = sld [smem:[#allocation25_spill]]  ;;  %s5016_s11 = scalar_lea.vmem %s5474_s14, %s4080_s25 }
  0x79   : > { %s5487_s28 = sld [smem:[#allocation26_spill]]  ;;  %s5019_s9 = scalar_lea.vmem %s5475_s19, %s4406_s23 }
  0x7a   : > { %s5488_s16 = sld [smem:[#allocation27_spill]]  ;;  %s5022_s13 = scalar_lea.vmem %s5476_s24, %s4080_s25 }
  0x7b   : > { %5489 = sst [smem:[#allocation53_spill]] %s5013_s4  ;;  %s5025_s0 = scalar_lea.vmem %s5477_s30, %s4406_s23 }
  0x7c   : > { %s5490_s1 = sld [smem:[#allocation28_spill]]  ;;  %s5028_s3 = scalar_lea.vmem %s5478_s6, %s4080_s25 }
  0x7d   : > { %5491 = sst [smem:[#allocation54_spill]] %s5016_s11  ;;  %s4409_s29 = sshll.u32 %s4995_s15, 4 }
  0x7e   : > { %s5492_s22 = sld [smem:[#allocation29_spill]]  ;;  %s5034_s19 = scalar_lea.vmem %s5481_s12, %s4409_s29 }
  0x7f   : > { %5493 = sst [smem:[#allocation55_spill]] %s5019_s9  ;;  %s5041_s6 = scalar_lea.vmem %s5484_s7, %s4406_s23 }
  0x80   : > { %s5494_s26 = sld [smem:[#allocation30_spill]]  ;;  %s5044_s11 = scalar_lea.vmem %s5485_s21, %s4080_s25 }
  0x81   : > { %5495 = sst [smem:[#allocation56_spill]] %s5022_s13  ;;  %s5047_s20 = scalar_lea.vmem %s5486_s2, %s4406_s23 }
  0x82   : > { %s5496_s5 = sld [smem:[#allocation31_spill]]  ;;  %s5050_s12 = scalar_lea.vmem %s5487_s28, %s4080_s25 }
  0x83   : > { %5497 = sst [smem:[#allocation57_spill]] %s5025_s0  ;;  %s5056_s24 = scalar_lea.vmem %s5490_s1, %s4080_s25 }
  0x84   : > { %s5498_s17 = sld [smem:[#allocation32_spill]]  ;;  %s5059_s27 = scalar_lea.vmem %s5492_s22, %s4409_s29 }
  0x85   : > { %5499 = sst [smem:[#allocation58_spill]] %s5028_s3 }
  0x86   : > { %s5500_s8 = sld [smem:[#allocation33_spill]]  ;;  %s1636_s10 = scalar_lea.vmem %s5494_s26, %s4995_s15 }
  0x87   : > { %s5501_s14 = sld [smem:[#allocation34_spill]] }
  0x88   : > { %s5502_s4 = sld [smem:[#allocation35_spill]]  ;;  %s1639_s30 = scalar_lea.vmem %s5496_s5, %s4995_s15 }
  0x89   : > { %5503 = sst [smem:[#allocation59_spill]] %s5034_s19  ;;  %s5053_s19 = scalar_lea.vmem %s5488_s16, %s4406_s23 }
  0x8a   : > { %s5504_s9 = sld [smem:[#allocation36_spill]]  ;;  %s1642_s7 = scalar_lea.vmem %s5498_s17, %s4995_s15 }
  0x8b   : > { %s5505_s13 = sld [smem:[#allocation41_spill]] }
  0x8c   : > { %s5506_s0 = sld [smem:[#allocation42_spill]] }
  0x8d   : > { %5507 = sst [smem:[#allocation60_spill]] %s5041_s6  ;;  %s5068_s6 = scalar_lea.vmem %s5500_s8, %s4409_s29 }
  0x8e   : > { %s5508_s3 = sld [smem:[#allocation43_spill]]  ;;  %s1650_s21 = scalar_lea.vmem %s5501_s14, %s4995_s15 }
  0x8f   : > { %5509 = sst [smem:[#allocation61_spill]] %s5044_s11  ;;  %s5073_s11 = scalar_lea.vmem %s5502_s4, %s4406_s23 }
  0x90   : > { %5510 = sst [smem:[#allocation62_spill]] %s5047_s20  ;;  %s1658_s2 = scalar_lea.vmem %s5504_s9, %s4995_s15 }
  0x91   : > { %5511 = sst [smem:[#allocation63_spill]] %s5050_s12  ;;  %s1662_s20 = scalar_lea.vmem %s5505_s13, %s4998_s18 }
  0x92   : > { %5512 = sst [smem:[#allocation64_spill]] %s5053_s19  ;;  %s1666_s28 = scalar_lea.vmem %s5506_s0, %s4998_s18 }
  0x93   : > { %s5513_s16 = sld [smem:[#allocation45_spill]] }
  0x94   : > { %s1670_s12 = scalar_lea.vmem %s5508_s3, %s4998_s18 }
  0x99   : > { %p4107_p12 = scmp.ne.s32.totalorder %s5513_s16, 0 }
  0x9a   : > { %s5514_s19 = sld [smem:[#allocation9_spill]] (!%p4107_p12) }
  0x9b   : > { %1678 = sbr.rel (%p4107_p12) target bundleno = 299 (0x12b), region = 172  ;;  %s5515_s25 = sld [smem:[#allocation6_spill]] (!%p4107_p12) }
  0x9c   : > { %s5516_s1 = sld [smem:[#allocation10_spill]] (!%p4107_p12) }
  0x9d   : > { %s5517_s22 = sld [smem:[#allocation7_spill]] (!%p4107_p12) }
  0xa0   : > { %v4416_v0 = vld [vmem:[%s5514_s19] sm:$0xff]  ;;  %vm1693_vm0 = vcmask 130048   ;;  %vm1712_vm1 = vcmask 261120  }
  0xa1   : > { %s5518_s5 = scalar_lea.vmem %s5515_s25, %s4998_s18  ;;  %1704 = vmatpush.bf16.msra.mxu0 %v4416_v0 }
  0xa2   : > { %v1679_v1 = vld [vmem:[%s5518_s5] sm:$0xff] }
  0xa3   : > { %v1682_v2 = vpack.c.bf16 %v1679_v1, %v1679_v1  ;;  %v4565_v3 = vld [vmem:[%s5516_s1] ss:$0 sm:$0xff] }
  0xa4   : > { %v1710_v5 = vld [vmem:[%s5517_s22] sm:$0xff] }
  0xa5   : > { %4112 = vmatmul.msk.bf16.vlgmr.msra.gmra.mxu0 %vm1693_vm0, %v1682_v2 }
 0x122   : > { %v1706_v4 = vpop.f32.mrf.mxu0 }
 0x123   : > { %v1707_v6 = vadd.f32 %v4565_v3, %v1706_v4 }
 0x125   : > { %v1711_v7 = vadd.f32 %v1710_v5, %v1707_v6 }
 0x127   : > { %1713 = vst.msk [vmem:[#allocation2] sm:$0xff] %vm1712_vm1, %v1711_v7 }
 0x12a   : > { %v1708_v8 = vpop.f32.mrf.mxu0 }
 0x12b PF: > { %vm1790_vm2 = vcmask 261120   ;;  %s5519_s9 = sld [smem:[#allocation53_spill]]  ;;  %v4743_v11 = vmov 32.0   ;;  %vm2176_vm7 = vcmask 64512   ;;  %vm2368_vm8 = vcmask 1043456  }
 0x12c   : > { %4600 = vrcp.f32 %v4743_v11  ;;  %s5520_s17 = sld [smem:[#allocation55_spill]] }
 0x12d   : > { %s5521_s29 = sld [smem:[#allocation57_spill]] }
 0x12e   : > { %v5090_v9 = vld [vmem:[#allocation2] sm:$0xff]  ;;  %s5522_s3 = sld [smem:[#allocation11_spill]] }
 0x12f   : > { %v1791_v10 = vsel %vm1790_vm2, %v5090_v9, 0.0  ;;  %s5523_s8 = sld [smem:[#allocation12_spill]] }
 0x130   : > { %1792 = vadd.xlane.f32.xlu0 %v1791_v10  ;;  %s5526_s4 = sld [smem:[#allocation56_spill]] }
 0x131   : > { %v4418_v23 = vld [vmem:[%s5519_s9 + $0x8] sm:$0xff]  ;;  %v4420_v24 = vld [vmem:[%s5519_s9 + $0x18] sm:$0xff]  ;;  %v4417_v27 = vld [vmem:[%s5519_s9] sm:$0xff]  ;;  %s5527_s23 = sld [smem:[#allocation54_spill]] }
 0x132   : > { %v4601_v12 = vpop.eup %4600  ;;  %v4424_v25 = vld [vmem:[%s5519_s9 + $0x38] sm:$0xff]  ;;  %1862 = vmatpush.bf16.msra.mxu0 %v4418_v23  ;;  %1887 = vmatpush.bf16.msra.mxu2 %v4420_v24  ;;  %v4419_v28 = vld [vmem:[%s5519_s9 + $0x10] sm:$0xff]  ;;  %v4422_v32 = vld [vmem:[%s5519_s9 + $0x28] sm:$0xff]  ;;  %s5528_s0 = sld [smem:[#allocation58_spill]] }
 0x133   : > { %v1795_v13 = vmul.f32 32.0, %v4601_v12  ;;  %vm1799_vm3 = vweird.f32 %v4601_v12  ;;  %v4428_v26 = vld [vmem:[%s5520_s17 + $0x18] sm:$0xff]  ;;  %1937 = vmatpush.bf16.msra.mxu3 %v4424_v25  ;;  %v4423_v29 = vld [vmem:[%s5519_s9 + $0x30] sm:$0xff]  ;;  %v4426_v33 = vld [vmem:[%s5520_s17 + $0x8] sm:$0xff]  ;;  %s5529_s26 = sld [smem:[#allocation59_spill]] }
 0x134   : > { %1999 = vmatpush.bf16.msra.mxu1 %v4428_v26  ;;  %v4427_v30 = vld [vmem:[%s5520_s17 + $0x10] sm:$0xff]  ;;  %v4432_v34 = vld [vmem:[%s5520_s17 + $0x38] sm:$0xff]  ;;  %v4421_v37 = vld [vmem:[%s5519_s9 + $0x20] sm:$0xff]  ;;  %s5524_s14 = scalar_lea.vmem %s5522_s3, %s4995_s15  ;;  %s5530_s13 = sld [smem:[#allocation20_spill]] }
 0x135   : > { %v1796_v14 = vsub.f32 1.0, %v1795_v13  ;;  %v4436_v36 = vld [vmem:[%s5521_s29 + $0x18] sm:$0xff]  ;;  %v4425_v38 = vld [vmem:[%s5520_s17] sm:$0xff]  ;;  %v4431_v40 = vld [vmem:[%s5520_s17 + $0x30] sm:$0xff]  ;;  %s5525_s19 = scalar_lea.vmem %s5523_s8, %s4995_s15  ;;  %s5531_s16 = sld [smem:[#allocation60_spill]] }
 0x136   : > { %1863 = vmatpush.bf16.msra.mxu0 %v4417_v27  ;;  %1888 = vmatpush.bf16.msra.mxu2 %v4419_v28  ;;  %v4435_v41 = vld [vmem:[%s5521_s29 + $0x10] sm:$0xff]  ;;  %v4566_v48 = vld [vmem:[%s5524_s14] ss:$0 sm:$0xff]  ;;  %v4430_v55 = vld [vmem:[%s5520_s17 + $0x28] sm:$0xff]  ;;  %s5533_s1 = sld [smem:[#allocation62_spill]] }
 0x137   : > { %v1797_v15 = vmul.f32 %v4601_v12, %v1796_v14  ;;  %1938 = vmatpush.bf16.msra.mxu3 %v4423_v29  ;;  %v4567_v50 = vld [vmem:[%s5525_s19] ss:$0 sm:$0xff]  ;;  %v4434_v56 = vld [vmem:[%s5521_s29 + $0x8] sm:$0xff]  ;;  %v4440_v57 = vld [vmem:[%s5521_s29 + $0x38] sm:$0xff]  ;;  %s5534_s22 = sld [smem:[#allocation21_spill]] }
 0x138   : > { %2000 = vmatpush.bf16.msra.mxu1 %v4427_v30  ;;  %v4429_v58 = vld [vmem:[%s5520_s17 + $0x20] sm:$0xff]  ;;  %v4439_v60 = vld [vmem:[%s5521_s29 + $0x30] sm:$0xff]  ;;  %v4438_v61 = vld [vmem:[%s5521_s29 + $0x28] sm:$0xff]  ;;  %s5535_s5 = sld [smem:[#allocation22_spill]] }
 0x139   : > { %v1798_v16 = vadd.f32 %v4601_v12, %v1797_v15  ;;  %v4433_v59 = vld [vmem:[%s5521_s29] sm:$0xff]  ;;  %s5536_s9 = sld [smem:[#allocation8_spill]] }
 0x13a   : > { %1912 = vmatpush.bf16.msrb.mxu2 %v4422_v32  ;;  %1974 = vmatpush.bf16.msrb.mxu0 %v4426_v33  ;;  %v4437_v62 = vld [vmem:[%s5521_s29 + $0x20] sm:$0xff]  ;;  %s5532_s25 = scalar_lea.vmem %s5530_s13, %s4995_s15  ;;  %s5538_s29 = sld [smem:[#allocation64_spill]] }
 0x13b   : > { %v5094_v17 = vsel %vm1799_vm3, %v4601_v12, %v1798_v16  ;;  %2049 = vmatpush.bf16.msrb.mxu3 %v4432_v34  ;;  %v4569_v63 = vld [vmem:[%s5526_s4 + $0x1] ss:$0 sm:$0xff]  ;;  %v4572_v13 = vld [vmem:[%s5526_s4] ss:$0 sm:$0xff]  ;;  %v4575_v25 = vld [vmem:[%s5526_s4 + $0x3] ss:$0 sm:$0xff] }
 0x13c   : > { %2111 = vmatpush.bf16.msrb.mxu1 %v4436_v36  ;;  %v4570_v4 = vld [vmem:[%s5527_s23 + $0x1] ss:$0 sm:$0xff]  ;;  %v4571_v34 = vld [vmem:[%s5527_s23 + $0x3] ss:$0 sm:$0xff]  ;;  %s5541_s14 = sld [smem:[#allocation63_spill]] }
 0x13d   : > { %v4573_v15 = vld [vmem:[%s5528_s0 + $0x1] ss:$0 sm:$0xff]  ;;  %s5537_s17 = scalar_lea.vmem %s5534_s22, %s4995_s15  ;;  %s5542_s19 = sld [smem:[#allocation61_spill]] }
 0x13e   : > { %1913 = vmatpush.bf16.msrb.mxu2 %v4421_v37  ;;  %1975 = vmatpush.bf16.msrb.mxu0 %v4425_v38  ;;  %v4576_v38 = vld [vmem:[%s5528_s0] ss:$0 sm:$0xff]  ;;  %s5539_s3 = scalar_lea.vmem %s5535_s5, %s4995_s15 }
 0x13f   : > { %2050 = vmatpush.bf16.msrb.mxu3 %v4431_v40  ;;  %s5540_s8 = scalar_lea.vmem %s5536_s9, %s4998_s18 }
 0x140   : > { %2112 = vmatpush.bf16.msrb.mxu1 %v4435_v41 }
 0x1a3   : > { %v1793_v18 = vpop.xlane.xlu0 %1792 }
 0x1a4   : > { %v1801_v19 = vmul.f32 %v5094_v17, %v1793_v18 }
 0x1a6   : > { %v1802_v20 = vsub.f32 %v5090_v9, %v1801_v19 }
 0x1a8   : > { %v1803_v21 = vmul.f32 %v1802_v20, %v1802_v20 }
 0x1aa   : > { %v1804_v22 = vsel %vm1790_vm2, %v1803_v21, 0.0 }
 0x1ab   : > { %1805 = vadd.xlane.f32.xlu0 %v1804_v22  ;;  %v4568_v22 = vld [vmem:[%s5527_s23] ss:$0 sm:$0xff] }
 0x21e   : > { %v1806_v31 = vpop.xlane.xlu0 %1805 }
 0x21f   : > { %v1807_v35 = vmul.f32 %v1806_v31, %v5094_v17 }
 0x221   : > { %v1808_v39 = vadd.f32 1e-05, %v1807_v35 }
 0x223   : > { %4602 = vrsqrt.f32 %v1808_v39  ;;  %vm1815_vm5 = vweird.f32 %v1808_v39 }
 0x229   : > { %v4603_v42 = vpop.eup %4602 }
 0x22a   : > { %v1810_v43 = vmul.f32 %v4603_v42, %v1808_v39  ;;  %vm1816_vm4 = vweird.f32 %v4603_v42 }
 0x22b   : > { %vm1817_vm6 = vmor %vm1815_vm5, %vm1816_vm4 }
 0x22c   : > { %v1811_v44 = vmul.f32 %v4603_v42, %v1810_v43 }
 0x22e   : > { %v1812_v45 = vmul.f32 0.5, %v1811_v44 }
 0x230   : > { %v1813_v46 = vsub.f32 1.5, %v1812_v45 }
 0x232   : > { %v1814_v47 = vmul.f32 %v4603_v42, %v1813_v46  ;;  %v4577_v46 = vld [vmem:[%s5526_s4 + $0x2] ss:$0 sm:$0xff]  ;;  %s5543_s4 = sld [smem:[#allocation46_spill]] }
 0x234   : > { %v1818_v49 = vsel %vm1817_vm6, %v4603_v42, %v1814_v47  ;;  %v4578_v47 = vld [vmem:[%s5528_s0 + $0x3] ss:$0 sm:$0xff] }
 0x235   : > { %v1819_v51 = vmul.f32 %v1818_v49, %v1802_v20 }
 0x237   : > { %v1823_v52 = vmul.f32 %v4566_v48, %v1819_v51 }
 0x239   : > { %v1827_v53 = vadd.f32 %v4567_v50, %v1823_v52 }
 0x23b   : > { %v1828_v54 = vpack.c.bf16 %v1827_v53, %v1827_v53 }
 0x23d   : > { %4121 = vmatmul.msk.bf16.vlgmr.msra.gmra.mxu0 %vm1790_vm2, %v1828_v54  ;;  %4130 = vmatmul.msk.bf16.vlgmr.msra.gmra.mxu2 %vm1790_vm2, %v1828_v54 }
 0x23e   : > { %4148 = vmatmul.msk.bf16.vlgmr.msra.gmra.mxu3 %vm1790_vm2, %v1828_v54  ;;  %4166 = vmatmul.msk.bf16.vlgmr.msra.gmra.mxu1 %vm1790_vm2, %v1828_v54 }
 0x23f   : > { %2024 = vmatpush.bf16.msra.mxu2 %v4430_v55  ;;  %2086 = vmatpush.bf16.msra.mxu0 %v4434_v56 }
 0x240   : > { %2161 = vmatpush.bf16.msra.mxu3 %v4440_v57 }
 0x243   : > { %2025 = vmatpush.bf16.msra.mxu2 %v4429_v58  ;;  %2087 = vmatpush.bf16.msra.mxu0 %v4433_v59 }
 0x244   : > { %2162 = vmatpush.bf16.msra.mxu3 %v4439_v60 }
 0x24d   : > { %4139 = vmatmul.msk.bf16.vlgmr.msrb.gmra.mxu2 %vm1790_vm2, %v1828_v54  ;;  %4157 = vmatmul.msk.bf16.vlgmr.msrb.gmra.mxu0 %vm1790_vm2, %v1828_v54 }
 0x24e   : > { %4184 = vmatmul.msk.bf16.vlgmr.msrb.gmra.mxu3 %vm1790_vm2, %v1828_v54  ;;  %4202 = vmatmul.msk.bf16.vlgmr.msrb.gmra.mxu1 %vm1790_vm2, %v1828_v54 }
 0x24f   : > { %2136 = vmatpush.bf16.msrb.mxu2 %v4438_v61 }
 0x253   : > { %2137 = vmatpush.bf16.msrb.mxu2 %v4437_v62 }
 0x25d   : > { %4175 = vmatmul.msk.bf16.vlgmr.msra.gmra.mxu2 %vm1790_vm2, %v1828_v54  ;;  %4193 = vmatmul.msk.bf16.vlgmr.msra.gmra.mxu0 %vm1790_vm2, %v1828_v54 }
 0x25e   : > { %4220 = vmatmul.msk.bf16.vlgmr.msra.gmra.mxu3 %vm1790_vm2, %v1828_v54 }
 0x26d   : > { %4211 = vmatmul.msk.bf16.vlgmr.msrb.gmra.mxu2 %vm1790_vm2, %v1828_v54  ;;  %v4574_v54 = vld [vmem:[%s5527_s23 + $0x2] ss:$0 sm:$0xff] }
 0x2ba   : > { %v1865_v0 = vpop.f32.mrf.mxu0 }
 0x2bb   : > { %v2002_v1 = vpop.f32.mrf.mxu1  ;;  %v1866_v29 = vadd.f32 %v4568_v22, %v1865_v0 }
 0x2bc   : > { %v2003_v2 = vadd.f32 %v4569_v63, %v2002_v1  ;;  %v4579_v63 = vld [vmem:[%s5528_s0 + $0x2] ss:$0 sm:$0xff] }
 0x2bd   : > { %v2168_v36 = vpack.c.bf16 %v1866_v29, %v1866_v29 }
 0x2be   : > { %v2173_v3 = vpack.c.bf16 %v2003_v2, %v2003_v2 }
 0x2c0   : > { %v2200_v5 = vsel %vm2176_vm7, %v2173_v3, 0  ;;  %v1890_v6 = vpop.f32.mrf.mxu2 }
 0x2c1   : > { %v1940_v7 = vpop.f32.mrf.mxu3  ;;  %2209 = vmatpush.bf16.xpose.msra.mxu1 %v2200_v5  ;;  %v1891_v8 = vadd.f32 %v4570_v4, %v1890_v6  ;;  %v1717_v6 = vlaneseq }
 0x2c2   : > { %v1867_v10 = vpop.f32.mrf.mxu0  ;;  %v1941_v39 = vadd.f32 %v4571_v34, %v1940_v7 }
 0x2c3   : > { %v2004_v11 = vpop.f32.mrf.mxu1  ;;  %v2169_v12 = vpack.c.bf16 %v1891_v8, %v1891_v8  ;;  %v1718_v8 = vshrl.u32 %v1717_v6, 7  ;;  %v5166_v10 = vand.u32 127, %v1717_v6 }
 0x2c4   : > { %v2171_v44 = vpack.c.bf16 %v1941_v39, %v1941_v39 }
 0x2c5   : > { %vm1721_vm9 = vcmp.gt.s32.totalorder %v5166_v10, %v1718_v8 }
 0x2c8   : > { %4222 = vmatmul.msk.bf16.vlgmr.msra.gmra.mxu1 %vm2176_vm7, %v2169_v12  ;;  %v1892_v14 = vpop.f32.mrf.mxu2 }
 0x2c9   : > { %v1942_v16 = vpop.f32.mrf.mxu3 }
 0x2ca   : > { %v1977_v18 = vpop.f32.mrf.mxu0 }
 0x2cb   : > { %v1978_v19 = vadd.f32 %v4572_v13, %v1977_v18  ;;  %v2114_v20 = vpop.f32.mrf.mxu1  ;;  %v4744_v13 = vmov 0.0  }
 0x2cc   : > { %v2115_v21 = vadd.f32 %v4573_v15, %v2114_v20  ;;  %v1722_v14 = vsel %vm1721_vm9, -1e+09, %v4744_v13 }
 0x2cd   : > { %v2172_v23 = vpack.c.bf16 %v1978_v19, %v1978_v19 }
 0x2ce   : > { %v2362_v24 = vpack.c.bf16 %v2115_v21, %v2115_v21 }
 0x2cf   : > { %v2181_v26 = vsel %vm2176_vm7, %v2172_v23, 0 }
 0x2d0   : > { %v2389_v27 = vsel %vm2368_vm8, %v2362_v24, 0  ;;  %v1915_v28 = vpop.f32.mrf.mxu2  ;;  %2190 = vmatpush.bf16.xpose.msrb.mxu0 %v2181_v26 }
 0x2d1   : > { %v2052_v30 = vpop.f32.mrf.mxu3  ;;  %2398 = vmatpush.bf16.msrb.mxu1 %v2389_v27  ;;  %v1916_v59 = vadd.f32 %v4574_v54, %v1915_v28 }
 0x2d2   : > { %v2053_v31 = vadd.f32 %v4575_v25, %v2052_v30  ;;  %v1979_v32 = vpop.f32.mrf.mxu0 }
 0x2d3   : > { %v2116_v33 = vpop.f32.mrf.mxu1  ;;  %v2170_v62 = vpack.c.bf16 %v1916_v59, %v1916_v59 }
 0x2d4   : > { %v2175_v35 = vpack.c.bf16 %v2053_v31, %v2053_v31 }
 0x2d6   : > { %v2238_v37 = vsel %vm2176_vm7, %v2175_v35, 0 }
 0x2d7   : > { %2247 = vmatpush.bf16.xpose.msrb.mxu3 %v2238_v37  ;;  %4221 = vmatmul.msk.bf16.vlgmr.msrb.gmra.mxu0 %vm2176_vm7, %v2168_v36 }
 0x2d8   : > { %v1917_v40 = vpop.f32.mrf.mxu2 }
 0x2d9   : > { %v2054_v41 = vpop.f32.mrf.mxu3 }
 0x2da   : > { %v2089_v42 = vpop.f32.mrf.mxu0 }
 0x2db   : > { %v2090_v43 = vadd.f32 %v4576_v38, %v2089_v42 }
 0x2dd   : > { %v2361_v45 = vpack.c.bf16 %v2090_v43, %v2090_v43 }
 0x2de   : > { %4224 = vmatmul.msk.bf16.vlgmr.msrb.gmra.mxu3 %vm2176_vm7, %v2171_v44 }
 0x2df   : > { %v2370_v48 = vsel %vm2368_vm8, %v2361_v45, 0 }
 0x2e0   : > { %v2027_v49 = vpop.f32.mrf.mxu2  ;;  %2379 = vmatpush.bf16.msra.mxu0 %v2370_v48 }
 0x2e1   : > { %v2028_v50 = vadd.f32 %v4577_v46, %v2027_v49  ;;  %v2164_v51 = vpop.f32.mrf.mxu3 }
 0x2e2   : > { %v2165_v52 = vadd.f32 %v4578_v47, %v2164_v51  ;;  %v2091_v53 = vpop.f32.mrf.mxu0 }
 0x2e3   : > { %v2174_v55 = vpack.c.bf16 %v2028_v50, %v2028_v50 }
 0x2e4   : > { %v2364_v56 = vpack.c.bf16 %v2165_v52, %v2165_v52 }
 0x2e5   : > { %v2219_v57 = vsel %vm2176_vm7, %v2174_v55, 0 }
 0x2e6   : > { %v2427_v58 = vsel %vm2368_vm8, %v2364_v56, 0  ;;  %2228 = vmatpush.bf16.xpose.msra.mxu2 %v2219_v57 }
 0x2e7   : > { %2436 = vmatpush.bf16.msra.mxu3 %v2427_v58 }
 0x2e8   : > { %v2029_v60 = vpop.f32.mrf.mxu2 }
 0x2e9   : > { %v2166_v61 = vpop.f32.mrf.mxu3 }
 0x2ed   : > { %4223 = vmatmul.msk.bf16.vlgmr.msra.gmra.mxu2 %vm2176_vm7, %v2170_v62 }
 0x2f0   : > { %v2139_v0 = vpop.f32.mrf.mxu2 }
 0x2f1   : > { %v2140_v1 = vadd.f32 %v4579_v63, %v2139_v0 }
 0x2f3   : > { %v2363_v2 = vpack.c.bf16 %v2140_v1, %v2140_v1 }
 0x2f5   : > { %v2408_v3 = vsel %vm2368_vm8, %v2363_v2, 0 }
 0x2f6   : > { %2417 = vmatpush.bf16.msrb.mxu2 %v2408_v3 }
 0x2f8   : > { %v2141_v4 = vpop.f32.mrf.mxu2 }
 0x345   : > { %v2211_v5 = vpop.f32.mrf.mxu1 }
 0x346   : > { %v2254_v16 = vmul.f32 0.35355338, %v2211_v5 }
 0x348   : > { %v2258_v20 = vadd.f32 %v2254_v16, %v1722_v14 }
 0x34a   : > { %v2264_v22 = vsel %vm2176_vm7, %v2258_v20, -inf }
 0x34d   : > { %v2213_v7 = vpop.f32.mrf.mxu1 }
 0x354   : > { %v2192_v11 = vpop.f32.mrf.mxu0 }
 0x355   : > { %v2253_v12 = vmul.f32 0.35355338, %v2192_v11 }
 0x357   : > { %v2257_v15 = vadd.f32 %v2253_v12, %v1722_v14 }
 0x359   : > { %v2261_v18 = vsel %vm2176_vm7, %v2257_v15, -inf }
 0x35a   : > { %2262 = vmax.xlane.f32.xlu2 %v2261_v18 }
 0x35c   : > { %v2194_v19 = vpop.f32.mrf.mxu0 }
 0x361   : > { %v2249_v21 = vpop.f32.mrf.mxu3 }
 0x362   : > { %2265 = vmax.xlane.f32.xlu2 %v2264_v22  ;;  %v2256_v27 = vmul.f32 0.35355338, %v2249_v21 }
 0x364   : > { %v2260_v30 = vadd.f32 %v2256_v27, %v1722_v14 }
 0x366   : > { %v2270_v31 = vsel %vm2176_vm7, %v2260_v30, -inf }
 0x369   : > { %v2251_v23 = vpop.f32.mrf.mxu3 }
 0x370   : > { %v2230_v24 = vpop.f32.mrf.mxu2 }
 0x371   : > { %v2255_v25 = vmul.f32 0.35355338, %v2230_v24 }
 0x373   : > { %v2259_v26 = vadd.f32 %v2255_v25, %v1722_v14 }
 0x375   : > { %v2267_v28 = vsel %vm2176_vm7, %v2259_v26, -inf }
 0x376   : > { %2268 = vmax.xlane.f32.xlu1 %v2267_v28 }
 0x378   : > { %v2232_v29 = vpop.f32.mrf.mxu2 }
 0x37e   : > { %2271 = vmax.xlane.f32.xlu1 %v2270_v31 }
 0x3cd   : > { %v2263_v32 = vpop.xlane.xlu2 %2262 }
 0x3ce   : > { %v2273_v33 = vsub.f32 %v2257_v15, %v2263_v32 }
 0x3d0   : > { %v2277_v34 = vmul.f32 1.442695, %v2273_v33 }
 0x3d2   : > { %4604 = vpow2.f32 %v2277_v34 }
 0x3d5   : > { %v2266_v37 = vpop.xlane.xlu2 %2265 }
 0x3d6   : > { %v2274_v40 = vsub.f32 %v2258_v20, %v2266_v37 }
 0x3d8   : > { %v4605_v35 = vpop.eup %4604  ;;  %v2279_v42 = vmul.f32 1.442695, %v2274_v40 }
 0x3d9   : > { %v2285_v36 = vsel %vm2176_vm7, %v4605_v35, 0.0 }
 0x3da   : > { %2286 = vadd.xlane.f32.xlu2 %v2285_v36 }
 0x3e9   : > { %v2269_v38 = vpop.xlane.xlu1 %2268 }
 0x3ea   : > { %v2275_v39 = vsub.f32 %v2259_v26, %v2269_v38 }
 0x3ec   : > { %v2281_v41 = vmul.f32 1.442695, %v2275_v39 }
 0x3ee   : > { %4606 = vpow2.f32 %v2281_v41 }
 0x3ef   : > { %4608 = vpow2.f32 %v2279_v42 }
 0x3f1   : > { %v2272_v43 = vpop.xlane.xlu1 %2271 }
 0x3f2   : > { %v2276_v44 = vsub.f32 %v2260_v30, %v2272_v43 }
 0x3f4   : > { %v4607_v45 = vpop.eup %4606  ;;  %v2283_v46 = vmul.f32 1.442695, %v2276_v44  ;;  %v1785_v44 = vld [vmem:[%s5529_s26] sm:$0xf] }
 0x3f5   : > { %v2291_v47 = vsel %vm2176_vm7, %v4607_v45, 0.0  ;;  %v5176_v48 = vpop.eup %4608 }
 0x3f6   : > { %4610 = vpow2.f32 %v2283_v46  ;;  %2292 = vadd.xlane.f32.xlu0 %v2291_v47  ;;  %v2288_v51 = vsel %vm2176_vm7, %v5176_v48, 0.0 }
 0x3fc   : > { %v5178_v49 = vpop.eup %4610 }
 0x3fd   : > { %v2294_v50 = vsel %vm2176_vm7, %v5178_v49, 0.0 }
 0x3fe   : > { %2295 = vadd.xlane.f32.xlu1 %v2294_v50  ;;  %2289 = vadd.xlane.f32.xlu0 %v2288_v51  ;;  %v1787_v50 = vld [vmem:[%s5529_s26 + $0x8] sm:$0xf] }
 0x44d   : > { %v2287_v52 = vpop.xlane.xlu2 %2286 }
 0x44e   : > { %4612 = vrcp.f32 %v2287_v52  ;;  %v2308_v56 = vand.u32 2147483648, %v2287_v52  ;;  %v2306_v58 = vand.u32 2147483647, %v2287_v52  ;;  %vm2302_vm11 = vweird.f32 %v2287_v52 }
 0x450   : > { %v2309_v60 = vor.u32 1.1754944e-38, %v2308_v56  ;;  %vm2307_vm13 = vcmp.eq.f32.partialorder %v2306_v58, 8.507059e+37 }
 0x454   : > { %v4613_v53 = vpop.eup %4612 }
 0x455   : > { %v2298_v54 = vmul.f32 %v4613_v53, %v2287_v52  ;;  %vm2303_vm10 = vweird.f32 %v4613_v53  ;;  %v1788_v52 = vld [vmem:[%s5529_s26 + $0xc] sm:$0xf] }
 0x456   : > { %vm2304_vm12 = vmor %vm2302_vm11, %vm2303_vm10 }
 0x457   : > { %v2299_v55 = vsub.f32 1.0, %v2298_v54 }
 0x459   : > { %v2300_v57 = vmul.f32 %v4613_v53, %v2299_v55 }
 0x45b   : > { %v2301_v59 = vadd.f32 %v4613_v53, %v2300_v57 }
 0x45d   : > { %v2305_v61 = vsel %vm2304_vm12, %v4613_v53, %v2301_v59  ;;  %v2507_v53 = vsel %vm2368_vm8, %v1788_v52, 0  ;;  %v4581_v52 = vld [vmem:[%s5537_s17] ss:$0 sm:$0xff] }
 0x45e   : > { %v2310_v62 = vsel %vm2307_vm13, %v2309_v60, %v2305_v61  ;;  %2516 = vmatpush.bf16.msrb.mxu3 %v2507_v53 }
 0x45f   : > { %v2311_v63 = vmul.f32 %v4605_v35, %v2310_v62 }
 0x461   : > { %v2357_v0 = vpack.c.bf16 %v2311_v63, %v2311_v63 }
 0x463   : > { %4225 = vmatmul.msk.bf16.vlgmr.msra.gmra.mxu0 %vm2176_vm7, %v2357_v0 }
 0x469   : > { %v2293_v1 = vpop.xlane.xlu0 %2292 }
 0x46a   : > { %4614 = vrcp.f32 %v2293_v1  ;;  %v2338_v7 = vand.u32 2147483648, %v2293_v1  ;;  %v2336_v11 = vand.u32 2147483647, %v2293_v1  ;;  %vm2332_vm15 = vweird.f32 %v2293_v1 }
 0x46c   : > { %v2339_v15 = vor.u32 1.1754944e-38, %v2338_v7  ;;  %vm2337_vm1 = vcmp.eq.f32.partialorder %v2336_v11, 8.507059e+37 }
 0x470   : > { %v4615_v2 = vpop.eup %4614 }
 0x471   : > { %v2328_v3 = vmul.f32 %v4615_v2, %v2293_v1  ;;  %v2296_v4 = vpop.xlane.xlu1 %2295  ;;  %v2290_v5 = vpop.xlane.xlu0 %2289  ;;  %vm2333_vm14 = vweird.f32 %v4615_v2 }
 0x472   : > { %4616 = vrcp.f32 %v2296_v4  ;;  %vm2334_vm0 = vmor %vm2332_vm15, %vm2333_vm14  ;;  %v2351_v24 = vand.u32 2147483647, %v2296_v4  ;;  %v2353_v25 = vand.u32 2147483648, %v2296_v4  ;;  %v2323_v28 = vand.u32 2147483648, %v2290_v5 }
 0x473   : > { %v2329_v6 = vsub.f32 1.0, %v2328_v3  ;;  %4618 = vrcp.f32 %v2290_v5  ;;  %v2321_v31 = vand.u32 2147483647, %v2290_v5  ;;  %vm2347_vm5 = vweird.f32 %v2296_v4 }
 0x474   : > { %v2354_v33 = vor.u32 1.1754944e-38, %v2353_v25  ;;  %vm2317_vm9 = vweird.f32 %v2290_v5  ;;  %vm2352_vm10 = vcmp.eq.f32.partialorder %v2351_v24, 8.507059e+37  ;;  %v2324_v36 = vor.u32 1.1754944e-38, %v2323_v28  ;;  %v4444_v28 = vld [vmem:[%s5531_s16 + $0x18] sm:$0xff] }
 0x475   : > { %v2330_v8 = vmul.f32 %v4615_v2, %v2329_v6  ;;  %vm2322_vm12 = vcmp.eq.f32.partialorder %v2321_v31, 8.507059e+37  ;;  %v4441_v31 = vld [vmem:[%s5531_s16] sm:$0xff] }
 0x477   : > { %v2331_v12 = vadd.f32 %v4615_v2, %v2330_v8 }
 0x478   : > { %v4617_v14 = vpop.eup %4616 }
 0x479   : > { %v4619_v16 = vpop.eup %4618  ;;  %v2335_v18 = vsel %vm2334_vm0, %v4615_v2, %v2331_v12  ;;  %v2343_v19 = vmul.f32 %v4617_v14, %v2296_v4  ;;  %vm2348_vm3 = vweird.f32 %v4617_v14 }
 0x47a   : > { %v2340_v20 = vsel %vm2337_vm1, %v2339_v15, %v2335_v18  ;;  %v2313_v21 = vmul.f32 %v4619_v16, %v2290_v5  ;;  %vm2318_vm4 = vweird.f32 %v4619_v16  ;;  %vm2349_vm6 = vmor %vm2347_vm5, %vm2348_vm3  ;;  %v4580_v18 = vld [vmem:[%s5532_s25] ss:$0 sm:$0xff] }
 0x47b   : > { %v2341_v22 = vmul.f32 %v4607_v45, %v2340_v20  ;;  %v2344_v23 = vsub.f32 1.0, %v2343_v19  ;;  %vm2319_vm11 = vmor %vm2317_vm9, %vm2318_vm4  ;;  %v2450_v45 = vsel %vm2368_vm8, %v1785_v44, 0  ;;  %v4453_v44 = vld [vmem:[%s5533_s1 + $0x20] sm:$0xff] }
 0x47c   : > { %v2314_v26 = vsub.f32 1.0, %v2313_v21  ;;  %2459 = vmatpush.bf16.msrb.mxu0 %v2450_v45  ;;  %v4455_v45 = vld [vmem:[%s5533_s1 + $0x30] sm:$0xff] }
 0x47d   : > { %v2345_v27 = vmul.f32 %v4617_v14, %v2344_v23  ;;  %v2359_v29 = vpack.c.bf16 %v2341_v22, %v2341_v22 }
 0x47e   : > { %v2315_v30 = vmul.f32 %v4619_v16, %v2314_v26 }
 0x47f   : > { %v2346_v32 = vadd.f32 %v4617_v14, %v2345_v27  ;;  %4227 = vmatmul.msk.bf16.vlgmr.msrb.gmra.mxu2 %vm2176_vm7, %v2359_v29  ;;  %v4446_v29 = vld [vmem:[%s5531_s16 + $0x28] sm:$0xff] }
 0x480   : > { %v2316_v34 = vadd.f32 %v4619_v16, %v2315_v30  ;;  %v4448_v30 = vld [vmem:[%s5531_s16 + $0x38] sm:$0xff] }
 0x481   : > { %v2350_v35 = vsel %vm2349_vm6, %v4617_v14, %v2346_v32  ;;  %v4443_v32 = vld [vmem:[%s5531_s16 + $0x10] sm:$0xff] }
 0x482   : > { %v2355_v37 = vsel %vm2352_vm10, %v2354_v33, %v2350_v35  ;;  %v2320_v38 = vsel %vm2319_vm11, %v4619_v16, %v2316_v34  ;;  %v4445_v33 = vld [vmem:[%s5531_s16 + $0x20] sm:$0xff]  ;;  %v4447_v34 = vld [vmem:[%s5531_s16 + $0x30] sm:$0xff] }
 0x483   : > { %v2356_v39 = vmul.f32 %v5178_v49, %v2355_v37  ;;  %v2325_v40 = vsel %vm2322_vm12, %v2324_v36, %v2320_v38  ;;  %v2488_v49 = vsel %vm2368_vm8, %v1787_v50, 0  ;;  %v4450_v36 = vld [vmem:[%s5533_s1 + $0x8] sm:$0xff]  ;;  %v4452_v37 = vld [vmem:[%s5533_s1 + $0x18] sm:$0xff] }
 0x484   : > { %v2326_v41 = vmul.f32 %v5176_v48, %v2325_v40  ;;  %2497 = vmatpush.bf16.msra.mxu2 %v2488_v49  ;;  %v1786_v48 = vld [vmem:[%s5529_s26 + $0x4] sm:$0xf]  ;;  %v4454_v38 = vld [vmem:[%s5533_s1 + $0x28] sm:$0xff]  ;;  %v4456_v40 = vld [vmem:[%s5533_s1 + $0x38] sm:$0xff] }
 0x485   : > { %v2360_v42 = vpack.c.bf16 %v2356_v39, %v2356_v39  ;;  %v2469_v51 = vsel %vm2368_vm8, %v1786_v48, 0 }
 0x486   : > { %v2358_v43 = vpack.c.bf16 %v2326_v41, %v2326_v41  ;;  %2478 = vmatpush.bf16.msra.mxu1 %v2469_v51  ;;  %v4449_v41 = vld [vmem:[%s5533_s1] sm:$0xff] }
 0x487   : > { %4228 = vmatmul.msk.bf16.vlgmr.msra.gmra.mxu3 %vm2176_vm7, %v2360_v42  ;;  %v4451_v42 = vld [vmem:[%s5533_s1 + $0x10] sm:$0xff] }
 0x488   : > { %4226 = vmatmul.msk.bf16.vlgmr.msrb.gmra.mxu1 %vm2176_vm7, %v2358_v43  ;;  %2719 = vmatpush.bf16.msrb.mxu2 %v4446_v29 }
 0x489   : > { %2744 = vmatpush.bf16.msra.mxu3 %v4448_v30 }
 0x48a   : > { %2694 = vmatpush.bf16.msrb.mxu1 %v4444_v28  ;;  %v4590_v28 = vld [vmem:[%s5541_s14 + $0x3] ss:$0 sm:$0xff] }
 0x48c   : > { %2720 = vmatpush.bf16.msrb.mxu2 %v4445_v33 }
 0x48d   : > { %2745 = vmatpush.bf16.msra.mxu3 %v4447_v34 }
 0x48e   : > { %2695 = vmatpush.bf16.msrb.mxu1 %v4443_v32 }
 0x4e0   : > { %v2381_v46 = vpop.f32.mrf.mxu0 }
 0x4e1   : > { %v2442_v47 = vpack.c.bf16 %v2381_v46, %v2381_v46 }
 0x4e3   : > { %4229 = vmatmul.msk.bf16.vlgmr.msrb.gmra.mxu0 %vm2176_vm7, %v2442_v47 }
 0x4e8   : > { %v2383_v54 = vpop.f32.mrf.mxu0 }
 0x502   : > { %v2419_v55 = vpop.f32.mrf.mxu2 }
 0x503   : > { %v2444_v56 = vpack.c.bf16 %v2419_v55, %v2419_v55  ;;  %v4582_v55 = vld [vmem:[%s5539_s3] ss:$0 sm:$0xff] }
 0x505   : > { %v2400_v57 = vpop.f32.mrf.mxu1  ;;  %4231 = vmatmul.msk.bf16.vlgmr.msra.gmra.mxu2 %vm2176_vm7, %v2444_v56 }
 0x506   : > { %v2443_v58 = vpack.c.bf16 %v2400_v57, %v2400_v57  ;;  %2834 = vmatpush.bf16.msra.mxu2 %v4454_v38 }
 0x508   : > { %4230 = vmatmul.msk.bf16.vlgmr.msra.gmra.mxu1 %vm2176_vm7, %v2443_v58 }
 0x509   : > { %2809 = vmatpush.bf16.msra.mxu1 %v4452_v37 }
 0x50a   : > { %v2421_v59 = vpop.f32.mrf.mxu2  ;;  %v2438_v60 = vpop.f32.mrf.mxu3  ;;  %2835 = vmatpush.bf16.msra.mxu2 %v4453_v44 }
 0x50b   : > { %v2445_v61 = vpack.c.bf16 %v2438_v60, %v2438_v60  ;;  %v1715_v59 = vld [vmem:[%s5540_s8] sm:$0xff] }
 0x50c   : > { %v2635_v60 = vpack.c.bf16 %v1715_v59, %v1715_v59  ;;  %v4593_v59 = vld [vmem:[%s5056_s24 + $0x2] ss:$0 sm:$0xff] }
 0x50d   : > { %v2402_v62 = vpop.f32.mrf.mxu1  ;;  %4232 = vmatmul.msk.bf16.vlgmr.msrb.gmra.mxu3 %vm2176_vm7, %v2445_v61  ;;  %2810 = vmatpush.bf16.msra.mxu1 %v4451_v42  ;;  %v4462_v61 = vld [vmem:[%s5538_s29 + $0x28] sm:$0xff] }
 0x50e   : > { %2859 = vmatpush.bf16.msrb.mxu3 %v4456_v40  ;;  %v4458_v62 = vld [vmem:[%s5538_s29 + $0x8] sm:$0xff]  ;;  %v4586_v40 = vld [vmem:[%s5542_s19 + $0x3] ss:$0 sm:$0xff] }
 0x512   : > { %v2440_v63 = vpop.f32.mrf.mxu3  ;;  %2860 = vmatpush.bf16.msrb.mxu3 %v4455_v45 }
 0x513   : > { %v4460_v63 = vld [vmem:[%s5538_s29 + $0x18] sm:$0xff] }
 0x560   : > { %v2461_v0 = vpop.f32.mrf.mxu0 }
 0x561   : > { %v2522_v5 = vsel %vm1790_vm2, %v2461_v0, 0.0  ;;  %v4464_v0 = vld [vmem:[%s5538_s29 + $0x38] sm:$0xff] }
 0x568   : > { %v2463_v1 = vpop.f32.mrf.mxu0 }
 0x569   : > { %v4461_v1 = vld [vmem:[%s5538_s29 + $0x20] sm:$0xff] }
 0x585   : > { %v2480_v2 = vpop.f32.mrf.mxu1 }
 0x586   : > { %v2523_v4 = vsel %vm1790_vm2, %v2480_v2, 0.0  ;;  %v4457_v2 = vld [vmem:[%s5538_s29] sm:$0xff] }
 0x587   : > { %v2524_v8 = vadd.f32 %v2523_v4, %v2522_v5  ;;  %v4463_v4 = vld [vmem:[%s5538_s29 + $0x30] sm:$0xff] }
 0x588   : > { %v2499_v3 = vpop.f32.mrf.mxu2 }
 0x589   : > { %v2525_v6 = vsel %vm1790_vm2, %v2499_v3, 0.0  ;;  %v4459_v3 = vld [vmem:[%s5538_s29 + $0x10] sm:$0xff] }
 0x58a   : > { %v2526_v11 = vadd.f32 %v2525_v6, %v2524_v8 }
 0x58d   : > { %v2482_v7 = vpop.f32.mrf.mxu1 }
 0x590   : > { %v2501_v12 = vpop.f32.mrf.mxu2  ;;  %v2518_v14 = vpop.f32.mrf.mxu3 }
 0x591   : > { %v2527_v15 = vsel %vm1790_vm2, %v2518_v14, 0.0  ;;  %v4587_v14 = vld [vmem:[%s5541_s14] ss:$0 sm:$0xff] }
 0x592   : > { %v2528_v16 = vadd.f32 %v2527_v15, %v2526_v11  ;;  %v4588_v15 = vld [vmem:[%s5541_s14 + $0x1] ss:$0 sm:$0xff] }
 0x594   : > { %v2529_v19 = vadd.f32 %v2528_v16, %v5090_v9  ;;  %v4442_v9 = vld [vmem:[%s5531_s16 + $0x8] sm:$0xff] }
 0x595   : > { %2669 = vmatpush.bf16.msra.mxu0 %v4442_v9  ;;  %v4589_v9 = vld [vmem:[%s5541_s14 + $0x2] ss:$0 sm:$0xff] }
 0x596   : > { %v5210_v20 = vadd.f32 %v4580_v18, %v2529_v19 }
 0x598   : > { %v2520_v21 = vpop.f32.mrf.mxu3  ;;  %v2604_v22 = vsel %vm1790_vm2, %v5210_v20, 0.0 }
 0x599   : > { %2605 = vadd.xlane.f32.xlu1 %v2604_v22  ;;  %2670 = vmatpush.bf16.msra.mxu0 %v4441_v31 }
 0x59d   : > { %2784 = vmatpush.bf16.msrb.mxu0 %v4450_v36 }
 0x5a1   : > { %2785 = vmatpush.bf16.msrb.mxu0 %v4449_v41 }
 0x60c   : > { %v2606_v23 = vpop.xlane.xlu1 %2605 }
 0x60d   : > { %v2607_v24 = vmul.f32 %v2606_v23, %v5094_v17 }
 0x60f   : > { %v2608_v25 = vsub.f32 %v5210_v20, %v2607_v24  ;;  %v4583_v24 = vld [vmem:[%s5542_s19] ss:$0 sm:$0xff] }
 0x611   : > { %v2609_v26 = vmul.f32 %v2608_v25, %v2608_v25 }
 0x613   : > { %v2610_v27 = vsel %vm1790_vm2, %v2609_v26, 0.0 }
 0x614   : > { %2611 = vadd.xlane.f32.xlu2 %v2610_v27  ;;  %v4584_v27 = vld [vmem:[%s5542_s19 + $0x1] ss:$0 sm:$0xff] }
 0x687   : > { %v2612_v35 = vpop.xlane.xlu2 %2611 }
 0x688   : > { %v2613_v39 = vmul.f32 %v2612_v35, %v5094_v17 }
 0x68a   : > { %v2614_v43 = vadd.f32 1e-05, %v2613_v39  ;;  %v4585_v39 = vld [vmem:[%s5542_s19 + $0x2] ss:$0 sm:$0xff] }
 0x68c   : > { %4620 = vrsqrt.f32 %v2614_v43  ;;  %vm2621_vm14 = vweird.f32 %v2614_v43 }
 0x692   : > { %v4621_v46 = vpop.eup %4620 }
 0x693   : > { %v2616_v47 = vmul.f32 %v4621_v46, %v2614_v43  ;;  %vm2622_vm13 = vweird.f32 %v4621_v46 }
 0x694   : > { %vm2623_vm15 = vmor %vm2621_vm14, %vm2622_vm13 }
 0x695   : > { %v2617_v50 = vmul.f32 %v4621_v46, %v2616_v47 }
 0x697   : > { %v2618_v49 = vmul.f32 0.5, %v2617_v50 }
 0x699   : > { %v2619_v48 = vsub.f32 1.5, %v2618_v49 }
 0x69b   : > { %v2620_v51 = vmul.f32 %v4621_v46, %v2619_v48 }
 0x69d   : > { %v2624_v53 = vsel %vm2623_vm15, %v4621_v46, %v2620_v51 }
 0x69e   : > { %v2625_v54 = vmul.f32 %v2624_v53, %v2608_v25  ;;  %v4591_v53 = vld [vmem:[%s5056_s24] ss:$0 sm:$0xff] }
 0x6a0   : > { %v2629_v56 = vmul.f32 %v4581_v52, %v2625_v54  ;;  %v4592_v54 = vld [vmem:[%s5056_s24 + $0x1] ss:$0 sm:$0xff] }
 0x6a2   : > { %v2633_v57 = vadd.f32 %v4582_v55, %v2629_v56 }
 0x6a4   : > { %v2634_v58 = vpack.c.bf16 %v2633_v57, %v2633_v57 }
 0x6a6   : > { %4241 = vmatmul.msk.bf16.vlgmr.msra.gmra.mxu0 %vm1790_vm2, %v2634_v58  ;;  %4250 = vmatmul.msk.bf16.vlgmr.msrb.gmra.mxu1 %vm1790_vm2, %v2634_v58 }
 0x6a7   : > { %4259 = vmatmul.msk.bf16.vlgmr.msrb.gmra.mxu2 %vm1790_vm2, %v2634_v58  ;;  %4268 = vmatmul.msk.bf16.vlgmr.msra.gmra.mxu3 %vm1790_vm2, %v2634_v58 }
 0x6a8   : > { %2946 = vmatpush.bf16.msrb.mxu2 %v4462_v61  ;;  %2896 = vmatpush.bf16.msra.mxu0 %v4458_v62 }
 0x6a9   : > { %2921 = vmatpush.bf16.msrb.mxu1 %v4460_v63  ;;  %2971 = vmatpush.bf16.msra.mxu3 %v4464_v0  ;;  %v4594_v63 = vld [vmem:[%s5056_s24 + $0x3] ss:$0 sm:$0xff]  ;;  %s1716_s24 = sld [smem:[#allocation4 + %s5543_s4]] }
 0x6ac   : > { %2947 = vmatpush.bf16.msrb.mxu2 %v4461_v1  ;;  %2897 = vmatpush.bf16.msra.mxu0 %v4457_v2 }
 0x6ad   : > { %2922 = vmatpush.bf16.msrb.mxu1 %v4459_v3  ;;  %2972 = vmatpush.bf16.msra.mxu3 %v4463_v4 }
 0x6b6   : > { %4277 = vmatmul.msk.bf16.vlgmr.msrb.gmra.mxu0 %vm1790_vm2, %v2635_v60  ;;  %4286 = vmatmul.msk.bf16.vlgmr.msra.gmra.mxu1 %vm1790_vm2, %v2635_v60 }
 0x6b7   : > { %4295 = vmatmul.msk.bf16.vlgmr.msra.gmra.mxu2 %vm1790_vm2, %v2635_v60  ;;  %4304 = vmatmul.msk.bf16.vlgmr.msrb.gmra.mxu3 %vm1790_vm2, %v2635_v60 }
 0x6c6   : > { %4313 = vmatmul.msk.bf16.vlgmr.msra.gmra.mxu0 %vm1790_vm2, %v2635_v60  ;;  %4322 = vmatmul.msk.bf16.vlgmr.msrb.gmra.mxu1 %vm1790_vm2, %v2635_v60 }
 0x6c7   : > { %4331 = vmatmul.msk.bf16.vlgmr.msrb.gmra.mxu2 %vm1790_vm2, %v2635_v60  ;;  %4340 = vmatmul.msk.bf16.vlgmr.msra.gmra.mxu3 %vm1790_vm2, %v2635_v60 }
 0x723   : > { %v2672_v5 = vpop.f32.mrf.mxu0  ;;  %v2697_v6 = vpop.f32.mrf.mxu1 }
 0x724   : > { %v2673_v33 = vadd.f32 %v4583_v24, %v2672_v5  ;;  %v2698_v34 = vadd.f32 %v4584_v27, %v2697_v6 }
 0x726   : > { %v2978_v43 = vpack.c.bf16 %v2673_v33, %v2673_v33  ;;  %v2979_v44 = vpack.c.bf16 %v2698_v34, %v2698_v34 }
 0x72a   : > { %v2722_v7 = vpop.f32.mrf.mxu2  ;;  %v2747_v8 = vpop.f32.mrf.mxu3 }
 0x72b   : > { %v2674_v11 = vpop.f32.mrf.mxu0  ;;  %v2699_v12 = vpop.f32.mrf.mxu1  ;;  %v2723_v47 = vadd.f32 %v4585_v39, %v2722_v7  ;;  %v2748_v50 = vadd.f32 %v4586_v40, %v2747_v8 }
 0x72d   : > { %v2980_v51 = vpack.c.bf16 %v2723_v47, %v2723_v47  ;;  %v2981_v52 = vpack.c.bf16 %v2748_v50, %v2748_v50 }
 0x732   : > { %v2724_v16 = vpop.f32.mrf.mxu2  ;;  %v2749_v18 = vpop.f32.mrf.mxu3 }
 0x733   : > { %v2787_v19 = vpop.f32.mrf.mxu0  ;;  %v2812_v21 = vpop.f32.mrf.mxu1  ;;  %v2534_v16 = vstv %s1716_s24 }
 0x734   : > { %v2788_v22 = vadd.f32 %v4587_v14, %v2787_v19  ;;  %v2813_v23 = vadd.f32 %v4588_v15, %v2812_v21  ;;  %vm2535_vm0 = vcmp.ge.s32.totalorder %v5166_v10, %v2534_v16 }
 0x735   : > { %v2536_v21 = vsel %vm2535_vm0, -1e+09, %v4744_v13 }
 0x736   : > { %v2982_v25 = vpack.c.bf16 %v2788_v22, %v2788_v22  ;;  %v2983_v26 = vpack.c.bf16 %v2813_v23, %v2813_v23 }
 0x738   : > { %v2990_v29 = vsel %vm2176_vm7, %v2982_v25, 0  ;;  %v3009_v30 = vsel %vm2176_vm7, %v2983_v26, 0 }
 0x739   : > { %2999 = vmatpush.bf16.xpose.msrb.mxu0 %v2990_v29  ;;  %3018 = vmatpush.bf16.xpose.msra.mxu1 %v3009_v30 }
 0x73a   : > { %v2837_v31 = vpop.f32.mrf.mxu2  ;;  %v2862_v32 = vpop.f32.mrf.mxu3 }
 0x73b   : > { %v2838_v35 = vadd.f32 %v4589_v9, %v2837_v31  ;;  %v2863_v36 = vadd.f32 %v4590_v28, %v2862_v32  ;;  %v2789_v37 = vpop.f32.mrf.mxu0  ;;  %v2814_v38 = vpop.f32.mrf.mxu1 }
 0x73d   : > { %v2984_v41 = vpack.c.bf16 %v2838_v35, %v2838_v35  ;;  %v2985_v42 = vpack.c.bf16 %v2863_v36, %v2863_v36 }
 0x73f   : > { %v3028_v45 = vsel %vm2176_vm7, %v2984_v41, 0  ;;  %v3047_v46 = vsel %vm2176_vm7, %v2985_v42, 0 }
 0x740   : > { %3037 = vmatpush.bf16.xpose.msra.mxu2 %v3028_v45  ;;  %3056 = vmatpush.bf16.xpose.msrb.mxu3 %v3047_v46 }
 0x741   : > { %4341 = vmatmul.msk.bf16.vlgmr.msrb.gmra.mxu0 %vm2176_vm7, %v2978_v43  ;;  %4342 = vmatmul.msk.bf16.vlgmr.msra.gmra.mxu1 %vm2176_vm7, %v2979_v44 }
 0x742   : > { %v2839_v49 = vpop.f32.mrf.mxu2  ;;  %v2864_v48 = vpop.f32.mrf.mxu3 }
 0x743   : > { %v2899_v55 = vpop.f32.mrf.mxu0  ;;  %v2924_v56 = vpop.f32.mrf.mxu1 }
 0x744   : > { %v2900_v57 = vadd.f32 %v4591_v53, %v2899_v55  ;;  %v2925_v58 = vadd.f32 %v4592_v54, %v2924_v56 }
 0x746   : > { %v3170_v60 = vpack.c.bf16 %v2900_v57, %v2900_v57  ;;  %v3171_v61 = vpack.c.bf16 %v2925_v58, %v2925_v58 }
 0x747   : > { %4343 = vmatmul.msk.bf16.vlgmr.msra.gmra.mxu2 %vm2176_vm7, %v2980_v51  ;;  %4344 = vmatmul.msk.bf16.vlgmr.msrb.gmra.mxu3 %vm2176_vm7, %v2981_v52 }
 0x748   : > { %v3178_v0 = vsel %vm2368_vm8, %v3170_v60, 0  ;;  %v3197_v1 = vsel %vm2368_vm8, %v3171_v61, 0 }
 0x749   : > { %3187 = vmatpush.bf16.msra.mxu0 %v3178_v0  ;;  %3206 = vmatpush.bf16.msrb.mxu1 %v3197_v1 }
 0x74a   : > { %v2949_v62 = vpop.f32.mrf.mxu2  ;;  %v2974_v4 = vpop.f32.mrf.mxu3 }
 0x74b   : > { %v2950_v2 = vadd.f32 %v4593_v59, %v2949_v62  ;;  %v2901_v5 = vpop.f32.mrf.mxu0  ;;  %v2926_v6 = vpop.f32.mrf.mxu1  ;;  %v2975_v7 = vadd.f32 %v4594_v63, %v2974_v4 }
 0x74d   : > { %v3172_v3 = vpack.c.bf16 %v2950_v2, %v2950_v2  ;;  %v3173_v11 = vpack.c.bf16 %v2975_v7, %v2975_v7 }
 0x74f   : > { %v3216_v8 = vsel %vm2368_vm8, %v3172_v3, 0  ;;  %v3235_v12 = vsel %vm2368_vm8, %v3173_v11, 0 }
 0x750   : > { %3225 = vmatpush.bf16.msrb.mxu2 %v3216_v8  ;;  %3244 = vmatpush.bf16.msra.mxu3 %v3235_v12 }
 0x752   : > { %v2951_v14 = vpop.f32.mrf.mxu2  ;;  %v2976_v15 = vpop.f32.mrf.mxu3 }
 0x7be   : > { %v3001_v18 = vpop.f32.mrf.mxu0  ;;  %v3020_v19 = vpop.f32.mrf.mxu1 }
 0x7bf   : > { %v3062_v22 = vmul.f32 0.35355338, %v3001_v18  ;;  %v3063_v32 = vmul.f32 0.35355338, %v3020_v19 }
 0x7c1   : > { %v3066_v23 = vadd.f32 %v3062_v22, %v2536_v21  ;;  %v3067_v35 = vadd.f32 %v3063_v32, %v2536_v21 }
 0x7c3   : > { %v3070_v24 = vsel %vm2176_vm7, %v3066_v23, -inf  ;;  %v3073_v36 = vsel %vm2176_vm7, %v3067_v35, -inf }
 0x7c4   : > { %3071 = vmax.xlane.f32.xlu2 %v3070_v24 }
 0x7c6   : > { %v3003_v25 = vpop.f32.mrf.mxu0  ;;  %v3022_v26 = vpop.f32.mrf.mxu1 }
 0x7ca   : > { %v3039_v27 = vpop.f32.mrf.mxu2  ;;  %v3058_v9 = vpop.f32.mrf.mxu3 }
 0x7cb   : > { %v3064_v28 = vmul.f32 0.35355338, %v3039_v27  ;;  %v3065_v29 = vmul.f32 0.35355338, %v3058_v9 }
 0x7cd   : > { %v3069_v30 = vadd.f32 %v3065_v29, %v2536_v21  ;;  %v3068_v31 = vadd.f32 %v3064_v28, %v2536_v21 }
 0x7cf   : > { %v3079_v10 = vsel %vm2176_vm7, %v3069_v30, -inf  ;;  %v3076_v33 = vsel %vm2176_vm7, %v3068_v31, -inf }
 0x7d0   : > { %3080 = vmax.xlane.f32.xlu1 %v3079_v10  ;;  %3077 = vmax.xlane.f32.xlu0 %v3076_v33 }
 0x7d2   : > { %v3041_v13 = vpop.f32.mrf.mxu2  ;;  %v3060_v34 = vpop.f32.mrf.mxu3 }
 0x7d8   : > { %3074 = vmax.xlane.f32.xlu0 %v3073_v36 }
 0x837   : > { %v3072_v37 = vpop.xlane.xlu2 %3071 }
 0x838   : > { %v3082_v38 = vsub.f32 %v3066_v23, %v3072_v37 }
 0x83a   : > { %v3086_v39 = vmul.f32 1.442695, %v3082_v38 }
 0x83c   : > { %4622 = vpow2.f32 %v3086_v39 }
 0x842   : > { %v4623_v40 = vpop.eup %4622 }
 0x843   : > { %v3081_v41 = vpop.xlane.xlu1 %3080  ;;  %v3078_v42 = vpop.xlane.xlu0 %3077  ;;  %v3094_v43 = vsel %vm2176_vm7, %v4623_v40, 0.0 }
 0x844   : > { %v3085_v44 = vsub.f32 %v3069_v30, %v3081_v41  ;;  %v3084_v45 = vsub.f32 %v3068_v31, %v3078_v42  ;;  %3095 = vadd.xlane.f32.xlu0 %v3094_v43 }
 0x846   : > { %v3092_v46 = vmul.f32 1.442695, %v3085_v44  ;;  %v3090_v47 = vmul.f32 1.442695, %v3084_v45 }
 0x848   : > { %4624 = vpow2.f32 %v3092_v46 }
 0x849   : > { %4626 = vpow2.f32 %v3090_v47  ;;  %v2599_v47 = vld [vmem:[%s5059_s27] sm:$0xf] }
 0x84b   : > { %v3075_v50 = vpop.xlane.xlu0 %3074 }
 0x84c   : > { %v3083_v49 = vsub.f32 %v3067_v35, %v3075_v50  ;;  %v3258_v50 = vsel %vm2368_vm8, %v2599_v47, 0  ;;  %v4597_v47 = vld [vmem:[%s1642_s7] ss:$0 sm:$0xff] }
 0x84d   : > { %3267 = vmatpush.bf16.msrb.mxu0 %v3258_v50 }
 0x84e   : > { %v5295_v48 = vpop.eup %4624  ;;  %v3088_v51 = vmul.f32 1.442695, %v3083_v49  ;;  %v2601_v49 = vld [vmem:[%s5059_s27 + $0x8] sm:$0xf] }
 0x84f   : > { %v5297_v52 = vpop.eup %4626  ;;  %v3103_v53 = vsel %vm2176_vm7, %v5295_v48, 0.0 }
 0x850   : > { %4628 = vpow2.f32 %v3088_v51  ;;  %v3100_v54 = vsel %vm2176_vm7, %v5297_v52, 0.0  ;;  %3104 = vadd.xlane.f32.xlu2 %v3103_v53  ;;  %v3296_v51 = vsel %vm2368_vm8, %v2601_v49, 0  ;;  %v2600_v53 = vld [vmem:[%s5059_s27 + $0x4] sm:$0xf] }
 0x851   : > { %3101 = vadd.xlane.f32.xlu1 %v3100_v54  ;;  %3305 = vmatpush.bf16.msra.mxu2 %v3296_v51  ;;  %v3277_v54 = vsel %vm2368_vm8, %v2600_v53, 0  ;;  %v4467_v53 = vld [vmem:[%s5073_s11] sm:$0xff] }
 0x852   : > { %3286 = vmatpush.bf16.msra.mxu1 %v3277_v54  ;;  %v4598_v54 = vld [vmem:[%s1650_s21] ss:$0 sm:$0xff] }
 0x856   : > { %v5303_v55 = vpop.eup %4628 }
 0x857   : > { %v3097_v56 = vsel %vm2176_vm7, %v5303_v55, 0.0 }
 0x859   : > { %3098 = vadd.xlane.f32.xlu1 %v3097_v56 }
 0x8b7   : > { %v3096_v57 = vpop.xlane.xlu0 %3095 }
 0x8b8   : > { %4630 = vrcp.f32 %v3096_v57  ;;  %v3117_v61 = vand.u32 2147483648, %v3096_v57  ;;  %v3115_v63 = vand.u32 2147483647, %v3096_v57  ;;  %vm3111_vm3 = vweird.f32 %v3096_v57 }
 0x8ba   : > { %v3118_v3 = vor.u32 1.1754944e-38, %v3117_v61  ;;  %vm3116_vm5 = vcmp.eq.f32.partialorder %v3115_v63, 8.507059e+37 }
 0x8be   : > { %v4631_v58 = vpop.eup %4630 }
 0x8bf   : > { %v3107_v59 = vmul.f32 %v4631_v58, %v3096_v57  ;;  %vm3112_vm1 = vweird.f32 %v4631_v58 }
 0x8c0   : > { %vm3113_vm4 = vmor %vm3111_vm3, %vm3112_vm1 }
 0x8c1   : > { %v3108_v60 = vsub.f32 1.0, %v3107_v59 }
 0x8c3   : > { %v3109_v62 = vmul.f32 %v4631_v58, %v3108_v60  ;;  %v3105_v0 = vpop.xlane.xlu2 %3104 }
 0x8c4   : > { %v3102_v1 = vpop.xlane.xlu1 %3101  ;;  %4632 = vrcp.f32 %v3105_v0  ;;  %v3162_v19 = vand.u32 2147483648, %v3105_v0  ;;  %v3160_v23 = vand.u32 2147483647, %v3105_v0  ;;  %vm3156_vm10 = vweird.f32 %v3105_v0 }
 0x8c5   : > { %v3110_v2 = vadd.f32 %v4631_v58, %v3109_v62  ;;  %4634 = vrcp.f32 %v3102_v1  ;;  %v3147_v21 = vand.u32 2147483648, %v3102_v1  ;;  %v3145_v25 = vand.u32 2147483647, %v3102_v1 }
 0x8c6   : > { %vm3141_vm11 = vweird.f32 %v3102_v1  ;;  %v3163_v9 = vor.u32 1.1754944e-38, %v3162_v19  ;;  %vm3161_vm14 = vcmp.eq.f32.partialorder %v3160_v23, 8.507059e+37 }
 0x8c7   : > { %v3114_v4 = vsel %vm3113_vm4, %v4631_v58, %v3110_v2  ;;  %v3148_v29 = vor.u32 1.1754944e-38, %v3147_v21  ;;  %vm3146_vm15 = vcmp.eq.f32.partialorder %v3145_v25, 8.507059e+37  ;;  %v4595_v21 = vld [vmem:[%s1636_s10] ss:$0 sm:$0xff] }
 0x8c8   : > { %v3119_v5 = vsel %vm3116_vm5, %v3118_v3, %v3114_v4 }
 0x8c9   : > { %v3120_v6 = vmul.f32 %v4623_v40, %v3119_v5 }
 0x8ca   : > { %v4633_v7 = vpop.eup %4632 }
 0x8cb   : > { %v4635_v8 = vpop.eup %4634  ;;  %v3152_v11 = vmul.f32 %v4633_v7, %v3105_v0  ;;  %v3166_v12 = vpack.c.bf16 %v3120_v6, %v3120_v6  ;;  %vm3157_vm6 = vweird.f32 %v4633_v7 }
 0x8cc   : > { %v3137_v14 = vmul.f32 %v4635_v8, %v3102_v1  ;;  %v3099_v15 = vpop.xlane.xlu1 %3098  ;;  %vm3142_vm9 = vweird.f32 %v4635_v8  ;;  %vm3158_vm12 = vmor %vm3156_vm10, %vm3157_vm6 }
 0x8cd   : > { %v3153_v16 = vsub.f32 1.0, %v3152_v11  ;;  %4636 = vrcp.f32 %v3099_v15  ;;  %4345 = vmatmul.msk.bf16.vlgmr.msra.gmra.mxu0 %vm2176_vm7, %v3166_v12  ;;  %vm3143_vm13 = vmor %vm3141_vm11, %vm3142_vm9  ;;  %v3132_v36 = vand.u32 2147483648, %v3099_v15  ;;  %v3130_v39 = vand.u32 2147483647, %v3099_v15 }
 0x8ce   : > { %v3138_v18 = vsub.f32 1.0, %v3137_v14  ;;  %vm3126_vm1 = vweird.f32 %v3099_v15 }
 0x8cf   : > { %v3154_v22 = vmul.f32 %v4633_v7, %v3153_v16  ;;  %v3133_v42 = vor.u32 1.1754944e-38, %v3132_v36  ;;  %vm3131_vm4 = vcmp.eq.f32.partialorder %v3130_v39, 8.507059e+37  ;;  %v4471_v36 = vld [vmem:[%s5073_s11 + $0x20] sm:$0xff]  ;;  %v4470_v39 = vld [vmem:[%s5073_s11 + $0x18] sm:$0xff] }
 0x8d0   : > { %v3139_v24 = vmul.f32 %v4635_v8, %v3138_v18 }
 0x8d1   : > { %v3155_v26 = vadd.f32 %v4633_v7, %v3154_v22 }
 0x8d2   : > { %v3140_v27 = vadd.f32 %v4635_v8, %v3139_v24 }
 0x8d3   : > { %v4637_v28 = vpop.eup %4636  ;;  %v3159_v30 = vsel %vm3158_vm12, %v4633_v7, %v3155_v26 }
 0x8d4   : > { %v3144_v31 = vsel %vm3143_vm13, %v4635_v8, %v3140_v27  ;;  %v3164_v32 = vsel %vm3161_vm14, %v3163_v9, %v3159_v30  ;;  %v3122_v10 = vmul.f32 %v4637_v28, %v3099_v15  ;;  %vm3127_vm0 = vweird.f32 %v4637_v28 }
 0x8d5   : > { %v3149_v33 = vsel %vm3146_vm15, %v3148_v29, %v3144_v31  ;;  %v3165_v13 = vmul.f32 %v5295_v48, %v3164_v32  ;;  %vm3128_vm3 = vmor %vm3126_vm1, %vm3127_vm0  ;;  %v2602_v48 = vld [vmem:[%s5059_s27 + $0xc] sm:$0xf]  ;;  %v4474_v32 = vld [vmem:[%s5073_s11 + $0x38] sm:$0xff] }
 0x8d6   : > { %v3150_v34 = vmul.f32 %v5297_v52, %v3149_v33  ;;  %v3123_v35 = vsub.f32 1.0, %v3122_v10  ;;  %v3315_v52 = vsel %vm2368_vm8, %v2602_v48, 0  ;;  %v4466_v31 = vld [vmem:[%s5068_s6 + $0x8] sm:$0xff] }
 0x8d7   : > { %v3169_v37 = vpack.c.bf16 %v3165_v13, %v3165_v13  ;;  %3324 = vmatpush.bf16.msrb.mxu3 %v3315_v52  ;;  %3421 = vmatpush.bf16.msra.mxu0 %v4466_v31  ;;  %v4473_v13 = vld [vmem:[%s5073_s11 + $0x30] sm:$0xff]  ;;  %v4468_v52 = vld [vmem:[%s5073_s11 + $0x8] sm:$0xff] }
 0x8d8   : > { %v3124_v38 = vmul.f32 %v4637_v28, %v3123_v35  ;;  %v3168_v40 = vpack.c.bf16 %v3150_v34, %v3150_v34  ;;  %v4472_v35 = vld [vmem:[%s5073_s11 + $0x28] sm:$0xff] }
 0x8d9   : > { %4348 = vmatmul.msk.bf16.vlgmr.msra.gmra.mxu3 %vm2176_vm7, %v3169_v37 }
 0x8da   : > { %v3125_v41 = vadd.f32 %v4637_v28, %v3124_v38  ;;  %4347 = vmatmul.msk.bf16.vlgmr.msrb.gmra.mxu2 %vm2176_vm7, %v3168_v40 }
 0x8dc   : > { %v3129_v43 = vsel %vm3128_vm3, %v4637_v28, %v3125_v41 }
 0x8dd   : > { %v3134_v44 = vsel %vm3131_vm4, %v3133_v42, %v3129_v43  ;;  %v4469_v42 = vld [vmem:[%s5073_s11 + $0x10] sm:$0xff] }
 0x8de   : > { %v3135_v45 = vmul.f32 %v5303_v55, %v3134_v44 }
 0x8e0   : > { %v3167_v46 = vpack.c.bf16 %v3135_v45, %v3135_v45  ;;  %v4596_v45 = vld [vmem:[%s1639_s30] ss:$0 sm:$0xff]  ;;  %s5549_s30 = sld [smem:[#allocation45_spill]] }
 0x8e2   : > { %4346 = vmatmul.msk.bf16.vlgmr.msrb.gmra.mxu1 %vm2176_vm7, %v3167_v46 }
 0x8e3   : > { %3478 = vmatpush.bf16.msrb.mxu1 %v4474_v32 }
 0x8e6   : > { %p4394_p13 = scmp.ne.s32.totalorder %s5549_s30, 1 }
 0x8e7   : > { %3479 = vmatpush.bf16.msrb.mxu1 %v4473_v13  ;;  %s5550_s11 = sld [smem:[#allocation39_spill]] (!%p4394_p13)  ;;  %s4745_s21 = smov (!%p4394_p13), 16  }
 0x8e8   : > { %s5552_s15 = sld [smem:[#allocation37_spill]] (!%p4394_p13) }
 0x8e9   : > { %s5554_s26 = sld [smem:[#allocation40_spill]] (!%p4394_p13) }
 0x8ea   : > { %s5558_s18 = sld [smem:[#allocation52_spill]] (!%p4394_p13) }
 0x8eb   : > { %3480 = vmatpush.bf16.msrb.mxu1 %v4472_v35 }
 0x8ef   : > { %3481 = vmatpush.bf16.msrb.mxu1 %v4471_v36 }
 0x8f3   : > { %3482 = vmatpush.bf16.msrb.mxu1 %v4470_v39 }
 0x8f7   : > { %3483 = vmatpush.bf16.msrb.mxu1 %v4469_v42 }
 0x8fb   : > { %3484 = vmatpush.bf16.msrb.mxu1 %v4468_v52 }
 0x8ff   : > { %3485 = vmatpush.bf16.msrb.mxu1 %v4467_v53 }
 0x94a   : > { %v3189_v55 = vpop.f32.mrf.mxu0 }
 0x94b   : > { %v3250_v56 = vpack.c.bf16 %v3189_v55, %v3189_v55 }
 0x94d   : > { %4349 = vmatmul.msk.bf16.vlgmr.msrb.gmra.mxu0 %vm2176_vm7, %v3250_v56 }
 0x952   : > { %v3191_v57 = vpop.f32.mrf.mxu0 }
 0x95c   : > { %v3246_v58 = vpop.f32.mrf.mxu3 }
 0x95d   : > { %v3227_v59 = vpop.f32.mrf.mxu2  ;;  %v3253_v60 = vpack.c.bf16 %v3246_v58, %v3246_v58 }
 0x95e   : > { %v3252_v61 = vpack.c.bf16 %v3227_v59, %v3227_v59 }
 0x95f   : > { %v3208_v62 = vpop.f32.mrf.mxu1  ;;  %4352 = vmatmul.msk.bf16.vlgmr.msrb.gmra.mxu3 %vm2176_vm7, %v3253_v60  ;;  %v4599_v60 = vld [vmem:[%s1658_s2] ss:$0 sm:$0xff]  ;;  %s5553_s2 = sld [smem:[#allocation38_spill]] (!%p4394_p13) }
 0x960   : > { %v3251_v63 = vpack.c.bf16 %v3208_v62, %v3208_v62  ;;  %4351 = vmatmul.msk.bf16.vlgmr.msra.gmra.mxu2 %vm2176_vm7, %v3252_v61 }
 0x962   : > { %4350 = vmatmul.msk.bf16.vlgmr.msra.gmra.mxu1 %vm2176_vm7, %v3251_v63 }
 0x964   : > { %v3248_v0 = vpop.f32.mrf.mxu3 }
 0x965   : > { %v3229_v1 = vpop.f32.mrf.mxu2 }
 0x967   : > { %v3210_v2 = vpop.f32.mrf.mxu1 }
 0x9ca   : > { %v3269_v3 = vpop.f32.mrf.mxu0 }
 0x9cb   : > { %v3330_v7 = vsel %vm1790_vm2, %v3269_v3, 0.0 }
 0x9d2   : > { %v3271_v4 = vpop.f32.mrf.mxu0 }
 0x9df   : > { %v3288_v5 = vpop.f32.mrf.mxu1 }
 0x9e0   : > { %v3331_v6 = vsel %vm1790_vm2, %v3288_v5, 0.0 }
 0x9e1   : > { %v3332_v11 = vadd.f32 %v3331_v6, %v3330_v7 }
 0x9e2   : > { %v3326_v8 = vpop.f32.mrf.mxu3 }
 0x9e3   : > { %v3307_v12 = vpop.f32.mrf.mxu2  ;;  %v3335_v16 = vsel %vm1790_vm2, %v3326_v8, 0.0 }
 0x9e4   : > { %v3333_v14 = vsel %vm1790_vm2, %v3307_v12, 0.0 }
 0x9e5   : > { %v3334_v15 = vadd.f32 %v3333_v14, %v3332_v11 }
 0x9e7   : > { %v3336_v18 = vadd.f32 %v3335_v16, %v3334_v15  ;;  %v3290_v19 = vpop.f32.mrf.mxu1 }
 0x9e9   : > { %v3337_v22 = vadd.f32 %v3336_v18, %v5210_v20  ;;  %v4465_v20 = vld [vmem:[%s5068_s6] sm:$0xff] }
 0x9ea   : > { %v3328_v23 = vpop.f32.mrf.mxu3  ;;  %3422 = vmatpush.bf16.msra.mxu0 %v4465_v20 }
 0x9eb   : > { %v3309_v24 = vpop.f32.mrf.mxu2  ;;  %v3341_v25 = vadd.f32 %v4595_v21, %v3337_v22 }
 0x9ed   : > { %v3366_v26 = vsel %vm1790_vm2, %v3341_v25, 0.0 }
 0x9ee   : > { %3367 = vadd.xlane.f32.xlu2 %v3366_v26 }
 0xa61   : > { %v3368_v27 = vpop.xlane.xlu2 %3367 }
 0xa62   : > { %v3369_v9 = vmul.f32 %v3368_v27, %v5094_v17 }
 0xa64   : > { %v3370_v28 = vsub.f32 %v3341_v25, %v3369_v9 }
 0xa66   : > { %v3371_v29 = vmul.f32 %v3370_v28, %v3370_v28 }
 0xa68   : > { %v3372_v30 = vsel %vm1790_vm2, %v3371_v29, 0.0 }
 0xa69   : > { %3373 = vadd.xlane.f32.xlu0 %v3372_v30 }
 0xadc   : > { %v3374_v10 = vpop.xlane.xlu0 %3373 }
 0xadd   : > { %v3375_v33 = vmul.f32 %v3374_v10, %v5094_v17 }
 0xadf   : > { %v3376_v34 = vadd.f32 1e-05, %v3375_v33 }
 0xae1   : > { %4638 = vrsqrt.f32 %v3376_v34  ;;  %vm3383_vm8 = vweird.f32 %v3376_v34 }
 0xae7   : > { %v4639_v37 = vpop.eup %4638 }
 0xae8   : > { %v3378_v38 = vmul.f32 %v4639_v37, %v3376_v34  ;;  %vm3384_vm7 = vweird.f32 %v4639_v37 }
 0xae9   : > { %vm3385_vm5 = vmor %vm3383_vm8, %vm3384_vm7 }
 0xaea   : > { %v3379_v40 = vmul.f32 %v4639_v37, %v3378_v38 }
 0xaec   : > { %v3380_v41 = vmul.f32 0.5, %v3379_v40 }
 0xaee   : > { %v3381_v43 = vsub.f32 1.5, %v3380_v41 }
 0xaf0   : > { %v3382_v44 = vmul.f32 %v4639_v37, %v3381_v43 }
 0xaf2   : > { %v3386_v46 = vsel %vm3385_vm5, %v4639_v37, %v3382_v44 }
 0xaf3   : > { %v3387_v50 = vmul.f32 %v3386_v46, %v3370_v28 }
 0xaf5   : > { %v3391_v49 = vmul.f32 %v4596_v45, %v3387_v50 }
 0xaf7   : > { %v3395_v48 = vadd.f32 %v4597_v47, %v3391_v49 }
 0xaf9   : > { %v3396_v51 = vpack.c.bf16 %v3395_v48, %v3395_v48 }
 0xafb   : > { %4361 = vmatmul.msk.bf16.vlgmr.msra.gmra.mxu0 %vm1790_vm2, %v3396_v51 }
 0xb78   : > { %v3424_v55 = vpop.f32.mrf.mxu0 }
 0xb79   : > { %v3425_v56 = vadd.f32 %v4598_v54, %v3424_v55 }
 0xb7b   : > { %v3428_v57 = vmax.f32 %v3425_v56, 0.0 }
 0xb7d   : > { %v3429_v58 = vpack.c.bf16 %v3428_v57, %v3428_v57 }
 0xb7f   : > { %3486 = vmatmul.bf16.vlgmr.msrb.gmra.mxu1 %v3429_v58 }
 0xb80   : > { %v3426_v59 = vpop.f32.mrf.mxu0 }
 0xbfc   : > { %v3487_v61 = vpop.f32.mrf.mxu1 }
 0xbfd   : > { %v3491_v62 = vadd.f32 %v3487_v61, %v3341_v25 }
 0xbff   : > { %v3495_v63 = vadd.f32 %v4599_v60, %v3491_v62 }
 0xc00   : > { %3500 = sbr.rel (%p4394_p13) target bundleno = 3800 (0xed8), region = 176 }
 0xc01   : > { %3496 = vst.msk [vmem:[#allocation2] sm:$0xff] %vm1790_vm2, %v3495_v63 }
 0xc04   : > { %v3489_v0 = vpop.f32.mrf.mxu1 }
 0xc05   : > { %v3503_v1 = vsel %vm1790_vm2, %v3495_v63, 0.0  ;;  %v4476_v7 = vld [vmem:[%s5550_s11 + $0x8] sm:$0xff]  ;;  %v4475_v8 = vld [vmem:[%s5550_s11] sm:$0xff]  ;;  %vm3570_vm11 = vcmask 138240   ;;  %vm3575_vm12 = vcmask 130048   ;;  %vm3623_vm13 = vcmask 8192  }
 0xc06   : > { %3504 = vadd.xlane.f32.xlu0 %v3503_v1  ;;  %3563 = vmatpush.bf16.msra.mxu0 %v4476_v7  ;;  %v3587_v11 = vld [vmem:[%s1666_s28] sm:$0xff] }
 0xc07   : > { %3592 = vrot.lane.b32.xlu1 %v3587_v11, %s4745_s21  ;;  %v4640_v24 = vld [vmem:[%s5552_s15] ss:$0 sm:$0xff]  ;;  %v3588_v53 = vmul.f32 4.0, %v3587_v11 }
 0xc08   : > { %v4642_v29 = vld [vmem:[%s5554_s26] ss:$0 sm:$0xff] }
 0xc09   : > { %v3572_v31 = vld [vmem:[%s1662_s20] sm:$0xff]  ;;  %v3589_v54 = vadd.f32 1.0, %v3588_v53  ;;  %s5557_s20 = sld [smem:[#allocation44_spill]] }
 0xc0a   : > { %3564 = vmatpush.bf16.msra.mxu0 %v4475_v8 }
 0xc0f   : > { %s5559_s1 = scalar_lea.vmem %s5557_s20, %s5558_s18 }
 0xc79   : > { %v3505_v2 = vpop.xlane.xlu0 %3504  ;;  %v3593_v39 = vpop.permute.xlu1 %3592 }
 0xc7a   : > { %v3506_v3 = vmul.f32 %v3505_v2, %v5094_v17 }
 0xc7c   : > { %v3507_v4 = vsub.f32 %v3495_v63, %v3506_v3 }
 0xc7e   : > { %v3508_v5 = vmul.f32 %v3507_v4, %v3507_v4 }
 0xc80   : > { %v3509_v6 = vsel %vm1790_vm2, %v3508_v5, 0.0 }
 0xc81   : > { %3510 = vadd.xlane.f32.xlu0 %v3509_v6 }
 0xcf4   : > { %v3511_v12 = vpop.xlane.xlu0 %3510 }
 0xcf5   : > { %v3512_v14 = vmul.f32 %v3511_v12, %v5094_v17  ;;  %v4641_v17 = vld [vmem:[%s5553_s2] ss:$0 sm:$0xff] }
 0xcf7   : > { %v3513_v15 = vadd.f32 1e-05, %v3512_v14 }
 0xcf9   : > { %4643 = vrsqrt.f32 %v3513_v15  ;;  %vm3520_vm9 = vweird.f32 %v3513_v15 }
 0xcff   : > { %v4644_v16 = vpop.eup %4643 }
 0xd00   : > { %v3515_v18 = vmul.f32 %v4644_v16, %v3513_v15  ;;  %vm3521_vm6 = vweird.f32 %v4644_v16 }
 0xd01   : > { %vm3522_vm10 = vmor %vm3520_vm9, %vm3521_vm6 }
 0xd02   : > { %v3516_v19 = vmul.f32 %v4644_v16, %v3515_v18 }
 0xd04   : > { %v3517_v21 = vmul.f32 0.5, %v3516_v19 }
 0xd06   : > { %v3518_v22 = vsub.f32 1.5, %v3517_v21 }
 0xd08   : > { %v3519_v23 = vmul.f32 %v4644_v16, %v3518_v22 }
 0xd0a   : > { %v3523_v25 = vsel %vm3522_vm10, %v4644_v16, %v3519_v23 }
 0xd0b   : > { %v3524_v26 = vmul.f32 %v3523_v25, %v3507_v4 }
 0xd0d   : > { %v3528_v27 = vmul.f32 %v4640_v24, %v3524_v26 }
 0xd0f   : > { %v3532_v9 = vadd.f32 %v4641_v17, %v3528_v27 }
 0xd11   : > { %v3537_v28 = vpack.c.bf16 %v3532_v9, %v3532_v9 }
 0xd13   : > { %4403 = vmatmul.msk.bf16.vlgmr.msra.gmra.mxu0 %vm1790_vm2, %v3537_v28  ;;  %vm3610_vm2 = vcmask 7168  }
 0xd90   : > { %v3566_v30 = vpop.f32.mrf.mxu0 }
 0xd91   : > { %v3567_v20 = vadd.f32 %v4642_v29, %v3566_v30 }
 0xd93   : > { %3571 = vst.msk [vmem:[%s1670_s12] sm:$0xff] %vm3570_vm11, %v3567_v20  ;;  %v3573_v32 = vsub.f32 %v3567_v20, %v3572_v31  ;;  %v3597_v10 = vand.u32 2147483647, %v3567_v20  ;;  %v3590_v40 = vmax.f32 %v3567_v20, 0.0  ;;  %v3595_v41 = vmul.f32 %v3593_v39, %v3567_v20  ;;  %s4746_s12 = smov 112  }
 0xd95   : > { %v3574_v33 = vmul.f32 %v3573_v32, %v3573_v32  ;;  %v3598_v13 = vsub.f32 0.0, %v3597_v10  ;;  %v3596_v43 = vsub.f32 %v3590_v40, %v3595_v41 }
 0xd97   : > { %v3576_v34 = vsel %vm3575_vm12, %v3574_v33, 0.0  ;;  %v3599_v35 = vmul.f32 1.442695, %v3598_v13 }
 0xd98   : > { %v3568_v36 = vpop.f32.mrf.mxu0  ;;  %3577 = vadd.xlane.f32.xlu2 %v3576_v34 }
 0xd99   : > { %4645 = vpow2.f32 %v3599_v35 }
 0xd9f   : > { %v4646_v37 = vpop.eup %4645 }
 0xda0   : > { %v3601_v38 = vadd.f32 1.0, %v4646_v37 }
 0xda2   : > { %4647 = vlog2.f32 %v3601_v38 }
 0xda8   : > { %v4648_v42 = vpop.eup %4647 }
 0xda9   : > { %v3603_v44 = vmul.f32 0.6931472, %v4648_v42 }
 0xdab   : > { %v3604_v45 = vadd.f32 %v3603_v44, %v3596_v43 }
 0xdad   : > { %3606 = vrot.lane.b32.xlu1 %v3604_v45, %s4746_s12 }
 0xe0b   : > { %v3578_v46 = vpop.xlane.xlu2 %3577 }
 0xe0c   : > { %v3579_v47 = vrot.slane %v3578_v46, 4 }
 0xe0e   : > { %v3580_v50 = vadd.f32 %v3579_v47, %v3578_v46 }
 0xe10   : > { %v3581_v49 = vrot.slane %v3580_v50, 2 }
 0xe12   : > { %v3582_v48 = vadd.f32 %v3581_v49, %v3580_v50 }
 0xe14   : > { %v3583_v51 = vrot.slane %v3582_v48, 1 }
 0xe16   : > { %v3584_v52 = vadd.f32 %v3583_v51, %v3582_v48 }
 0xe18   : > { %4477 = vpush %v3584_v52 }
 0xe1f   : > { %v3607_v55 = vpop.permute.xlu1 %3606 }
 0xe20   : > { %v3609_v56 = vmul.f32 %v3607_v55, %v3589_v54 }
 0xe22   : > { %v3611_v57 = vsel %vm3610_vm2, %v3609_v56, 0.0 }
 0xe23   : > { %3612 = vadd.xlane.f32.xlu2 %v3611_v57 }
 0xe49   : > { %s4478_s16 = spop %4477 }
 0xe4a   : > { %v3586_v1 = vstv %s4478_s16 }
 0xe96   : > { %v3613_v58 = vpop.xlane.xlu2 %3612 }
 0xe97   : > { %v3614_v59 = vrot.slane %v3613_v58, 4 }
 0xe99   : > { %v3615_v60 = vadd.f32 %v3614_v59, %v3613_v58 }
 0xe9b   : > { %v3616_v61 = vrot.slane %v3615_v60, 2 }
 0xe9d   : > { %v3617_v62 = vadd.f32 %v3616_v61, %v3615_v60 }
 0xe9f   : > { %v3618_v63 = vrot.slane %v3617_v62, 1 }
 0xea1   : > { %v3619_v0 = vadd.f32 %v3618_v63, %v3617_v62 }
 0xea3   : > { %4479 = vpush %v3619_v0 }
 0xed4   : > { %s4480_s25 = spop %4479 }
 0xed5   : > { %v3621_v2 = vstv %s4480_s25 }
 0xed6   : > { %v3622_v3 = vsel %vm3610_vm2, %v3586_v1, %v3621_v2 }
 0xed7   : > { %3624 = vst.msk [vmem:[%s5559_s1] sm:$0x1] %vm3623_vm13, %v3622_v3 }
 0xed8 PF: > { %s5560_s22 = sld [smem:[#allocation49_spill]] }
 0xed9   : > { %s5561_s28 = sld [smem:[#allocation47_spill]] }
 0xeda   : > { %s5562_s23 = sld [smem:[#allocation48_spill]] }
 0xedb   : > { %s5563_s0 = sld [smem:[#allocation50_spill]] }
 0xedc   : > { %s5564_s21 = sld [smem:[#allocation51_spill]] }
 0xede   : > { %s98_s2 = sadd.s32 1, %s5560_s22  }
 0xedf   : > { %p95_p0 = scmp.ge.s32.totalorder %s98_s2, 6  }
 0xee1   :  { %97 = sbr.rel (!%p95_p0) target bundleno = 95 (0x5f), region = 344 }

</bundles_post_ra>
